<compile_context>
chip_gen: v7x
topology: tpu7x:2x2x1
jax: 0.10.0
libtpu: 0.0.40
codegen_flags: <defaults>
</compile_context>

<pallas_src>
import numpy as np

import jax
import jax.numpy as jnp
from jax import lax
from jax.experimental import pallas as pl
from jax.experimental.pallas import tpu as pltpu


def _pick_row_chunk(h, wp, target=512):
    """Largest divisor RH of h with RH*wp <= target (accumulator stays ~<=64KB*2)."""
    rh = 1
    for cand in range(1, h + 1):
        if h % cand == 0 and cand * wp <= target:
            rh = cand
    return rh


def _make_double_conv_kernel(H, W, Cin, Cp, RH):
    Wp = W + 2                  # padded row width (flat layout row stride)
    Mwin = H * Wp               # flat window length covering all output rows
    MC = RH * Wp                # rows per matmul chunk
    top = W + 3                 # flat rows [0, top) are pure halo -> zero
    tail_start = (H + 1) * Wp + 1

    def kernel(x_ref, mask_ref, w1_ref, b1_ref, w2_ref, b2_ref, o_ref,
               xh_ref, mid_ref):
        # x_ref:    (1, Mwin, Cin) bf16  input, W already padded by 2 zero cols
        # mask_ref: (Mwin, 1)      f32   1.0 on valid columns, 0.0 on the 2 pads
        # w1_ref:   (3, 3, Cin, Cp) bf16 ; b1_ref: (1, Cp) f32
        # w2_ref:   (3, 3, Cp, Cp)  bf16 ; b2_ref: (1, Cp) f32
        # o_ref:    (1, Mwin, Cp)  f32   flat, lane-dense output
        # xh_ref:   (Pm, Cin)      bf16  flat input with zero halo
        # mid_ref:  (Pm, Cp)       bf16  flat intermediate with zero halo
        Pm = xh_ref.shape[0]
        tail = Pm - tail_start

        # ---- zero ONLY the halo border strips (not the whole scratch) --------
        xh_ref[0:top, :] = jnp.zeros((top, Cin), xh_ref.dtype)
        xh_ref[tail_start:Pm, :] = jnp.zeros((tail, Cin), xh_ref.dtype)
        mid_ref[0:top, :] = jnp.zeros((top, Cp), mid_ref.dtype)
        mid_ref[tail_start:Pm, :] = jnp.zeros((tail, Cp), mid_ref.dtype)

        # Interior fill: one contiguous store. Because x carries 2 trailing zero
        # columns per row, this also writes the left/right halo columns as zero.
        xh_ref[top:top + Mwin, :] = x_ref[0]

        # ---- stage 1: conv3x3(x) + bias + ReLU -> bf16 VMEM intermediate -----
        for h0 in range(0, H, RH):
            m0 = h0 * Wp
            acc = jnp.zeros((MC, Cp), jnp.float32)
            for dy in range(3):
                for dx in range(3):
                    off = dy * Wp + dx + m0         # static flat window offset
                    acc = acc + jnp.dot(
                        xh_ref[off:off + MC, :], w1_ref[dy, dx],
                        preferred_element_type=jnp.float32)
            # mask zeroes the 2 in-row halo columns so SAME padding stays exact
            mid = jnp.maximum(acc + b1_ref[...], 0.0) * mask_ref[m0:m0 + MC, :]
            mid_ref[top + m0:top + m0 + MC, :] = mid.astype(mid_ref.dtype)

        # ---- stage 2: conv3x3(mid) + bias + ReLU -> lane-dense flat output ---
        for h0 in range(0, H, RH):
            m0 = h0 * Wp
            acc = jnp.zeros((MC, Cp), jnp.float32)
            for dy in range(3):
                for dx in range(3):
                    off = dy * Wp + dx + m0
                    acc = acc + jnp.dot(
                        mid_ref[off:off + MC, :], w2_ref[dy, dx],
                        preferred_element_type=jnp.float32)
            out = jnp.maximum(acc + b2_ref[...], 0.0)
            o_ref[0, m0:m0 + MC, :] = out.astype(o_ref.dtype)

    return kernel


def double_conv(x_nchw, params):
    """DoubleConv forward. x_nchw: (N, Cin, H, W) like PyTorch."""
    w1, b1, w2, b2 = params
    N, Cin, H, W = x_nchw.shape
    Cout = w1.shape[-1]
    # Lane-dense channel padding (right for UNet-scale channels).
    # TODO(synk): make the padding rule channel-count-aware for tiny Cout.
    c_pad = ((Cout + 127) // 128) * 128

    Wp = W + 2
    Mwin = H * Wp
    Pm = (((H + 2) * Wp + 2) + 7) // 8 * 8       # flat scratch rows (+OOB slack)
    RH = _pick_row_chunk(H, Wp)

    # Input prep: NCHW -> NHWC, pad W by 2 zero columns (enables the single
    # contiguous halo-aware fill in the kernel), flatten (H, W+2), cast bf16
    # (matches the reference, halves input HBM traffic).
    x = jnp.transpose(x_nchw, (0, 2, 3, 1))
    x = jnp.pad(x, ((0, 0), (0, 0), (0, 2), (0, 0)))
    x = x.reshape(N, Mwin, Cin).astype(jnp.bfloat16)

    # Valid-column mask (compile-time constant pattern), used to zero the
    # intermediate's in-row halo columns inside the kernel.
    mask_np = np.zeros((H, Wp, 1), np.float32)
    mask_np[:, :W, :] = 1.0
    mask = jnp.asarray(mask_np.reshape(Mwin, 1))

    # Weight/bias prep (tiny, one-time): zero-pad channels, bf16 MXU operands,
    # f32 biases.
    w1p = jnp.pad(w1, ((0, 0), (0, 0), (0, 0), (0, c_pad - Cout))
                  ).astype(jnp.bfloat16)
    w2p = jnp.pad(w2, ((0, 0), (0, 0), (0, c_pad - Cout), (0, c_pad - Cout))
                  ).astype(jnp.bfloat16)
    b1p = jnp.pad(b1, (0, c_pad - Cout)).reshape(1, c_pad).astype(jnp.float32)
    b2p = jnp.pad(b2, (0, c_pad - Cout)).reshape(1, c_pad).astype(jnp.float32)

    kernel = _make_double_conv_kernel(H, W, Cin, c_pad, RH)

    out = pl.pallas_call(
        kernel,
        out_shape=jax.ShapeDtypeStruct((N, Mwin, c_pad), jnp.float32),
        grid_spec=pltpu.PrefetchScalarGridSpec(
            num_scalar_prefetch=0,
            grid=(N,),
            in_specs=[
                pl.BlockSpec((1, Mwin, Cin), lambda n: (n, 0, 0)),
                pl.BlockSpec((Mwin, 1), lambda n: (0, 0)),
                pl.BlockSpec((3, 3, Cin, c_pad), lambda n: (0, 0, 0, 0)),
                pl.BlockSpec((1, c_pad), lambda n: (0, 0)),
                pl.BlockSpec((3, 3, c_pad, c_pad), lambda n: (0, 0, 0, 0)),
                pl.BlockSpec((1, c_pad), lambda n: (0, 0)),
            ],
            out_specs=pl.BlockSpec((1, Mwin, c_pad), lambda n: (n, 0, 0)),
            scratch_shapes=[
                pltpu.VMEM((Pm, Cin), jnp.bfloat16),
                pltpu.VMEM((Pm, c_pad), jnp.bfloat16),
            ],
        ),
        compiler_params=pltpu.CompilerParams(
            dimension_semantics=("parallel",)),
    )(x, mask, w1p, b1p, w2p, b2p)

    # Drop the 2 garbage columns + channel padding and go back to NCHW in one
    # fused XLA copy.
    out = out.reshape(N, H, Wp, c_pad)[:, :, :W, :Cout]
    return jnp.transpose(out, (0, 3, 1, 2))


def init_params(key, in_channels, out_channels):
    k1, k2, k3, k4 = jax.random.split(key, 4)
    # Deterministic small random init (synthetic; shapes match nn.Conv2d, HWIO).
    w1 = jax.random.normal(k1, (3, 3, in_channels, out_channels),
                           jnp.float32) * 0.1
    b1 = jax.random.normal(k2, (out_channels,), jnp.float32) * 0.1
    w2 = jax.random.normal(k3, (3, 3, out_channels, out_channels),
                           jnp.float32) * 0.1
    b2 = jax.random.normal(k4, (out_channels,), jnp.float32) * 0.1
    return (w1, b1, w2, b2)


def reference_double_conv(x_nchw, params):
    """Pure-JAX reference (lax.conv; bf16 operands / f32 accumulation to match
    the kernel's numerics — the kernel also stores the intermediate in bf16)."""
    w1, b1, w2, b2 = params

    def conv_relu(x, w, b):
        y = lax.conv_general_dilated(
            x.astype(jnp.bfloat16), w.astype(jnp.bfloat16),
            window_strides=(1, 1), padding="SAME",
            dimension_numbers=("NCHW", "HWIO", "NCHW"),
            preferred_element_type=jnp.float32)
        y = y + b.reshape(1, -1, 1, 1)
        return jnp.maximum(y, 0.0)

    return conv_relu(conv_relu(x_nchw, w1, b1), w2, b2)


if __name__ == "__main__":
    key = jax.random.PRNGKey(0)
    kx, kp = jax.random.split(key)

    N, Cin, Cout, H, W = 2, 4, 8, 16, 16
    x = jax.random.normal(kx, (N, Cin, H, W), jnp.float32)
    params = init_params(kp, Cin, Cout)

    out = jax.block_until_ready(double_conv(x, params))
    ref = reference_double_conv(x, params)

    assert out.shape == (N, Cout, H, W)
    assert jnp.allclose(out, ref, atol=1e-2, rtol=1e-2), \
        float(jnp.max(jnp.abs(out - ref)))

    print("KERNEL_OK")
</pallas_src>

<mosaic_0001>
module attributes {stable_mosaic.version = 11 : i64} {
  func.func @kernel(%arg0: i32, %arg1: memref<1x288x4xbf16, #tpu.memory_space<vmem>>, %arg2: memref<288x1xf32, #tpu.memory_space<vmem>>, %arg3: memref<3x3x4x128xbf16, #tpu.memory_space<vmem>>, %arg4: memref<1x128xf32, #tpu.memory_space<vmem>>, %arg5: memref<3x3x128x128xbf16, #tpu.memory_space<vmem>>, %arg6: memref<1x128xf32, #tpu.memory_space<vmem>>, %arg7: memref<1x288x128xf32, #tpu.memory_space<vmem>>, %arg8: memref<328x4xbf16, #tpu.memory_space<vmem>>, %arg9: memref<328x128xbf16, #tpu.memory_space<vmem>>) attributes {dimension_semantics = [#tpu.dimension_semantics<parallel>], iteration_bounds = array<i64: 2>, scalar_prefetch = 0 : i64, scratch_operands = 2 : i64, tpu.core_type = #tpu.core_type<tc>, window_params = [{transform_indices = @transform_0, window_bounds = array<i64: 1, 288, 4>}, {pipeline_mode = #tpu.pipeline_mode<synchronous>, transform_indices = @transform_1, window_bounds = array<i64: 288, 1>}, {pipeline_mode = #tpu.pipeline_mode<synchronous>, transform_indices = @transform_2, window_bounds = array<i64: 3, 3, 4, 128>}, {pipeline_mode = #tpu.pipeline_mode<synchronous>, transform_indices = @transform_3, window_bounds = array<i64: 1, 128>}, {pipeline_mode = #tpu.pipeline_mode<synchronous>, transform_indices = @transform_4, window_bounds = array<i64: 3, 3, 128, 128>}, {pipeline_mode = #tpu.pipeline_mode<synchronous>, transform_indices = @transform_5, window_bounds = array<i64: 1, 128>}, {transform_indices = @transform_6, window_bounds = array<i64: 1, 288, 128>}]} {
    %cst = arith.constant 0.000000e+00 : bf16
    %0 = vector.broadcast %cst : bf16 to vector<19x4xbf16>
    %c0 = arith.constant 0 : index
    %c0_0 = arith.constant 0 : index
    %1 = vector.load %arg8[%c0, %c0_0] : memref<328x4xbf16, #tpu.memory_space<vmem>>, vector<19x4xbf16>
    tpu.vector_store %arg8[%c0, %c0_0], %0 {strides = array<i32>} : memref<328x4xbf16, #tpu.memory_space<vmem>>, vector<19x4xbf16>,
    %cst_1 = arith.constant 0.000000e+00 : bf16
    %2 = vector.broadcast %cst_1 : bf16 to vector<21x4xbf16>
    %c307 = arith.constant 307 : index
    %c0_2 = arith.constant 0 : index
    %3 = vector.load %arg8[%c307, %c0_2] : memref<328x4xbf16, #tpu.memory_space<vmem>>, vector<21x4xbf16>
    tpu.vector_store %arg8[%c307, %c0_2], %2 {strides = array<i32>} : memref<328x4xbf16, #tpu.memory_space<vmem>>, vector<21x4xbf16>,
    %cst_3 = arith.constant 0.000000e+00 : bf16
    %4 = vector.broadcast %cst_3 : bf16 to vector<19x128xbf16>
    %c0_4 = arith.constant 0 : index
    %c0_5 = arith.constant 0 : index
    %5 = vector.load %arg9[%c0_4, %c0_5] : memref<328x128xbf16, #tpu.memory_space<vmem>>, vector<19x128xbf16>
    tpu.vector_store %arg9[%c0_4, %c0_5], %4 {strides = array<i32>} : memref<328x128xbf16, #tpu.memory_space<vmem>>, vector<19x128xbf16>,
    %cst_6 = arith.constant 0.000000e+00 : bf16
    %6 = vector.broadcast %cst_6 : bf16 to vector<21x128xbf16>
    %c307_7 = arith.constant 307 : index
    %c0_8 = arith.constant 0 : index
    %7 = vector.load %arg9[%c307_7, %c0_8] : memref<328x128xbf16, #tpu.memory_space<vmem>>, vector<21x128xbf16>
    tpu.vector_store %arg9[%c307_7, %c0_8], %6 {strides = array<i32>} : memref<328x128xbf16, #tpu.memory_space<vmem>>, vector<21x128xbf16>,
    %c0_9 = arith.constant 0 : index
    %c0_10 = arith.constant 0 : index
    %c0_11 = arith.constant 0 : index
    %8 = vector.load %arg1[%c0_9, %c0_10, %c0_11] : memref<1x288x4xbf16, #tpu.memory_space<vmem>>, vector<1x288x4xbf16>
    %9 = vector.shape_cast %8 : vector<1x288x4xbf16> to vector<288x4xbf16>
    %c19 = arith.constant 19 : index
    %c0_12 = arith.constant 0 : index
    %10 = vector.load %arg8[%c19, %c0_12] : memref<328x4xbf16, #tpu.memory_space<vmem>>, vector<288x4xbf16>
    tpu.vector_store %arg8[%c19, %c0_12], %9 {strides = array<i32>} : memref<328x4xbf16, #tpu.memory_space<vmem>>, vector<288x4xbf16>,
    %cst_13 = arith.constant 0.000000e+00 : f32
    %11 = vector.broadcast %cst_13 : f32 to vector<288x128xf32>
    %c0_14 = arith.constant 0 : index
    %c0_15 = arith.constant 0 : index
    %12 = vector.load %arg8[%c0_14, %c0_15] : memref<328x4xbf16, #tpu.memory_space<vmem>>, vector<288x4xbf16>
    %c0_16 = arith.constant 0 : index
    %c0_17 = arith.constant 0 : index
    %c0_18 = arith.constant 0 : index
    %c0_19 = arith.constant 0 : index
    %13 = vector.load %arg3[%c0_16, %c0_17, %c0_18, %c0_19] : memref<3x3x4x128xbf16, #tpu.memory_space<vmem>>, vector<1x1x4x128xbf16>
    %14 = vector.shape_cast %13 : vector<1x1x4x128xbf16> to vector<4x128xbf16>
    %cst_20 = arith.constant dense<0.000000e+00> : vector<288x128xf32>
    %15 = tpu.matmul %12, %14, %cst_20 {dimension_numbers = #tpu.dot_dimension_numbers<[1], [0], [0], [1], [0, 0, 1, 1], [], []>} : vector<288x4xbf16>, vector<4x128xbf16>, vector<288x128xf32> -> vector<288x128xf32>
    %16 = arith.addf %11, %15 : vector<288x128xf32>
    %c1 = arith.constant 1 : index
    %c0_21 = arith.constant 0 : index
    %17 = vector.load %arg8[%c1, %c0_21] : memref<328x4xbf16, #tpu.memory_space<vmem>>, vector<288x4xbf16>
    %c0_22 = arith.constant 0 : index
    %c1_23 = arith.constant 1 : index
    %c0_24 = arith.constant 0 : index
    %c0_25 = arith.constant 0 : index
    %18 = vector.load %arg3[%c0_22, %c1_23, %c0_24, %c0_25] : memref<3x3x4x128xbf16, #tpu.memory_space<vmem>>, vector<1x1x4x128xbf16>
    %19 = vector.shape_cast %18 : vector<1x1x4x128xbf16> to vector<4x128xbf16>
    %cst_26 = arith.constant dense<0.000000e+00> : vector<288x128xf32>
    %20 = tpu.matmul %17, %19, %cst_26 {dimension_numbers = #tpu.dot_dimension_numbers<[1], [0], [0], [1], [0, 0, 1, 1], [], []>} : vector<288x4xbf16>, vector<4x128xbf16>, vector<288x128xf32> -> vector<288x128xf32>
    %21 = arith.addf %16, %20 : vector<288x128xf32>
    %c2 = arith.constant 2 : index
    %c0_27 = arith.constant 0 : index
    %22 = vector.load %arg8[%c2, %c0_27] : memref<328x4xbf16, #tpu.memory_space<vmem>>, vector<288x4xbf16>
    %c0_28 = arith.constant 0 : index
    %c2_29 = arith.constant 2 : index
    %c0_30 = arith.constant 0 : index
    %c0_31 = arith.constant 0 : index
    %23 = vector.load %arg3[%c0_28, %c2_29, %c0_30, %c0_31] : memref<3x3x4x128xbf16, #tpu.memory_space<vmem>>, vector<1x1x4x128xbf16>
    %24 = vector.shape_cast %23 : vector<1x1x4x128xbf16> to vector<4x128xbf16>
    %cst_32 = arith.constant dense<0.000000e+00> : vector<288x128xf32>
    %25 = tpu.matmul %22, %24, %cst_32 {dimension_numbers = #tpu.dot_dimension_numbers<[1], [0], [0], [1], [0, 0, 1, 1], [], []>} : vector<288x4xbf16>, vector<4x128xbf16>, vector<288x128xf32> -> vector<288x128xf32>
    %26 = arith.addf %21, %25 : vector<288x128xf32>
    %c18 = arith.constant 18 : index
    %c0_33 = arith.constant 0 : index
    %27 = vector.load %arg8[%c18, %c0_33] : memref<328x4xbf16, #tpu.memory_space<vmem>>, vector<288x4xbf16>
    %c1_34 = arith.constant 1 : index
    %c0_35 = arith.constant 0 : index
    %c0_36 = arith.constant 0 : index
    %c0_37 = arith.constant 0 : index
    %28 = vector.load %arg3[%c1_34, %c0_35, %c0_36, %c0_37] : memref<3x3x4x128xbf16, #tpu.memory_space<vmem>>, vector<1x1x4x128xbf16>
    %29 = vector.shape_cast %28 : vector<1x1x4x128xbf16> to vector<4x128xbf16>
    %cst_38 = arith.constant dense<0.000000e+00> : vector<288x128xf32>
    %30 = tpu.matmul %27, %29, %cst_38 {dimension_numbers = #tpu.dot_dimension_numbers<[1], [0], [0], [1], [0, 0, 1, 1], [], []>} : vector<288x4xbf16>, vector<4x128xbf16>, vector<288x128xf32> -> vector<288x128xf32>
    %31 = arith.addf %26, %30 : vector<288x128xf32>
    %c19_39 = arith.constant 19 : index
    %c0_40 = arith.constant 0 : index
    %32 = vector.load %arg8[%c19_39, %c0_40] : memref<328x4xbf16, #tpu.memory_space<vmem>>, vector<288x4xbf16>
    %c1_41 = arith.constant 1 : index
    %c1_42 = arith.constant 1 : index
    %c0_43 = arith.constant 0 : index
    %c0_44 = arith.constant 0 : index
    %33 = vector.load %arg3[%c1_41, %c1_42, %c0_43, %c0_44] : memref<3x3x4x128xbf16, #tpu.memory_space<vmem>>, vector<1x1x4x128xbf16>
    %34 = vector.shape_cast %33 : vector<1x1x4x128xbf16> to vector<4x128xbf16>
    %cst_45 = arith.constant dense<0.000000e+00> : vector<288x128xf32>
    %35 = tpu.matmul %32, %34, %cst_45 {dimension_numbers = #tpu.dot_dimension_numbers<[1], [0], [0], [1], [0, 0, 1, 1], [], []>} : vector<288x4xbf16>, vector<4x128xbf16>, vector<288x128xf32> -> vector<288x128xf32>
    %36 = arith.addf %31, %35 : vector<288x128xf32>
    %c20 = arith.constant 20 : index
    %c0_46 = arith.constant 0 : index
    %37 = vector.load %arg8[%c20, %c0_46] : memref<328x4xbf16, #tpu.memory_space<vmem>>, vector<288x4xbf16>
    %c1_47 = arith.constant 1 : index
    %c2_48 = arith.constant 2 : index
    %c0_49 = arith.constant 0 : index
    %c0_50 = arith.constant 0 : index
    %38 = vector.load %arg3[%c1_47, %c2_48, %c0_49, %c0_50] : memref<3x3x4x128xbf16, #tpu.memory_space<vmem>>, vector<1x1x4x128xbf16>
    %39 = vector.shape_cast %38 : vector<1x1x4x128xbf16> to vector<4x128xbf16>
    %cst_51 = arith.constant dense<0.000000e+00> : vector<288x128xf32>
    %40 = tpu.matmul %37, %39, %cst_51 {dimension_numbers = #tpu.dot_dimension_numbers<[1], [0], [0], [1], [0, 0, 1, 1], [], []>} : vector<288x4xbf16>, vector<4x128xbf16>, vector<288x128xf32> -> vector<288x128xf32>
    %41 = arith.addf %36, %40 : vector<288x128xf32>
    %c36 = arith.constant 36 : index
    %c0_52 = arith.constant 0 : index
    %42 = vector.load %arg8[%c36, %c0_52] : memref<328x4xbf16, #tpu.memory_space<vmem>>, vector<288x4xbf16>
    %c2_53 = arith.constant 2 : index
    %c0_54 = arith.constant 0 : index
    %c0_55 = arith.constant 0 : index
    %c0_56 = arith.constant 0 : index
    %43 = vector.load %arg3[%c2_53, %c0_54, %c0_55, %c0_56] : memref<3x3x4x128xbf16, #tpu.memory_space<vmem>>, vector<1x1x4x128xbf16>
    %44 = vector.shape_cast %43 : vector<1x1x4x128xbf16> to vector<4x128xbf16>
    %cst_57 = arith.constant dense<0.000000e+00> : vector<288x128xf32>
    %45 = tpu.matmul %42, %44, %cst_57 {dimension_numbers = #tpu.dot_dimension_numbers<[1], [0], [0], [1], [0, 0, 1, 1], [], []>} : vector<288x4xbf16>, vector<4x128xbf16>, vector<288x128xf32> -> vector<288x128xf32>
    %46 = arith.addf %41, %45 : vector<288x128xf32>
    %c37 = arith.constant 37 : index
    %c0_58 = arith.constant 0 : index
    %47 = vector.load %arg8[%c37, %c0_58] : memref<328x4xbf16, #tpu.memory_space<vmem>>, vector<288x4xbf16>
    %c2_59 = arith.constant 2 : index
    %c1_60 = arith.constant 1 : index
    %c0_61 = arith.constant 0 : index
    %c0_62 = arith.constant 0 : index
    %48 = vector.load %arg3[%c2_59, %c1_60, %c0_61, %c0_62] : memref<3x3x4x128xbf16, #tpu.memory_space<vmem>>, vector<1x1x4x128xbf16>
    %49 = vector.shape_cast %48 : vector<1x1x4x128xbf16> to vector<4x128xbf16>
    %cst_63 = arith.constant dense<0.000000e+00> : vector<288x128xf32>
    %50 = tpu.matmul %47, %49, %cst_63 {dimension_numbers = #tpu.dot_dimension_numbers<[1], [0], [0], [1], [0, 0, 1, 1], [], []>} : vector<288x4xbf16>, vector<4x128xbf16>, vector<288x128xf32> -> vector<288x128xf32>
    %51 = arith.addf %46, %50 : vector<288x128xf32>
    %c38 = arith.constant 38 : index
    %c0_64 = arith.constant 0 : index
    %52 = vector.load %arg8[%c38, %c0_64] : memref<328x4xbf16, #tpu.memory_space<vmem>>, vector<288x4xbf16>
    %c2_65 = arith.constant 2 : index
    %c2_66 = arith.constant 2 : index
    %c0_67 = arith.constant 0 : index
    %c0_68 = arith.constant 0 : index
    %53 = vector.load %arg3[%c2_65, %c2_66, %c0_67, %c0_68] : memref<3x3x4x128xbf16, #tpu.memory_space<vmem>>, vector<1x1x4x128xbf16>
    %54 = vector.shape_cast %53 : vector<1x1x4x128xbf16> to vector<4x128xbf16>
    %cst_69 = arith.constant dense<0.000000e+00> : vector<288x128xf32>
    %55 = tpu.matmul %52, %54, %cst_69 {dimension_numbers = #tpu.dot_dimension_numbers<[1], [0], [0], [1], [0, 0, 1, 1], [], []>} : vector<288x4xbf16>, vector<4x128xbf16>, vector<288x128xf32> -> vector<288x128xf32>
    %56 = arith.addf %51, %55 : vector<288x128xf32>
    %c0_70 = arith.constant 0 : index
    %c0_71 = arith.constant 0 : index
    %57 = vector.load %arg4[%c0_70, %c0_71] : memref<1x128xf32, #tpu.memory_space<vmem>>, vector<1x128xf32>
    %58 = vector.broadcast %57 : vector<1x128xf32> to vector<288x128xf32>
    %59 = arith.addf %56, %58 : vector<288x128xf32>
    %cst_72 = arith.constant 0.000000e+00 : f32
    %60 = vector.broadcast %cst_72 : f32 to vector<288x128xf32>
    %61 = arith.maximumf %59, %60 : vector<288x128xf32>
    %c0_73 = arith.constant 0 : index
    %c0_74 = arith.constant 0 : index
    %62 = vector.load %arg2[%c0_73, %c0_74] : memref<288x1xf32, #tpu.memory_space<vmem>>, vector<288x1xf32>
    %63 = vector.broadcast %62 : vector<288x1xf32> to vector<288x128xf32>
    %64 = arith.mulf %61, %63 : vector<288x128xf32>
    %65 = arith.truncf %64 : vector<288x128xf32> to vector<288x128xbf16>
    %c19_75 = arith.constant 19 : index
    %c0_76 = arith.constant 0 : index
    %66 = vector.load %arg9[%c19_75, %c0_76] : memref<328x128xbf16, #tpu.memory_space<vmem>>, vector<288x128xbf16>
    tpu.vector_store %arg9[%c19_75, %c0_76], %65 {strides = array<i32>} : memref<328x128xbf16, #tpu.memory_space<vmem>>, vector<288x128xbf16>,
    %cst_77 = arith.constant 0.000000e+00 : f32
    %67 = vector.broadcast %cst_77 : f32 to vector<288x128xf32>
    %c0_78 = arith.constant 0 : index
    %c0_79 = arith.constant 0 : index
    %68 = vector.load %arg9[%c0_78, %c0_79] : memref<328x128xbf16, #tpu.memory_space<vmem>>, vector<288x128xbf16>
    %c0_80 = arith.constant 0 : index
    %c0_81 = arith.constant 0 : index
    %c0_82 = arith.constant 0 : index
    %c0_83 = arith.constant 0 : index
    %69 = vector.load %arg5[%c0_80, %c0_81, %c0_82, %c0_83] : memref<3x3x128x128xbf16, #tpu.memory_space<vmem>>, vector<1x1x128x128xbf16>
    %70 = vector.shape_cast %69 : vector<1x1x128x128xbf16> to vector<128x128xbf16>
    %cst_84 = arith.constant dense<0.000000e+00> : vector<288x128xf32>
    %71 = tpu.matmul %68, %70, %cst_84 {dimension_numbers = #tpu.dot_dimension_numbers<[1], [0], [0], [1], [0, 0, 1, 1], [], []>} : vector<288x128xbf16>, vector<128x128xbf16>, vector<288x128xf32> -> vector<288x128xf32>
    %72 = arith.addf %67, %71 : vector<288x128xf32>
    %c1_85 = arith.constant 1 : index
    %c0_86 = arith.constant 0 : index
    %73 = vector.load %arg9[%c1_85, %c0_86] : memref<328x128xbf16, #tpu.memory_space<vmem>>, vector<288x128xbf16>
    %c0_87 = arith.constant 0 : index
    %c1_88 = arith.constant 1 : index
    %c0_89 = arith.constant 0 : index
    %c0_90 = arith.constant 0 : index
    %74 = vector.load %arg5[%c0_87, %c1_88, %c0_89, %c0_90] : memref<3x3x128x128xbf16, #tpu.memory_space<vmem>>, vector<1x1x128x128xbf16>
    %75 = vector.shape_cast %74 : vector<1x1x128x128xbf16> to vector<128x128xbf16>
    %cst_91 = arith.constant dense<0.000000e+00> : vector<288x128xf32>
    %76 = tpu.matmul %73, %75, %cst_91 {dimension_numbers = #tpu.dot_dimension_numbers<[1], [0], [0], [1], [0, 0, 1, 1], [], []>} : vector<288x128xbf16>, vector<128x128xbf16>, vector<288x128xf32> -> vector<288x128xf32>
    %77 = arith.addf %72, %76 : vector<288x128xf32>
    %c2_92 = arith.constant 2 : index
    %c0_93 = arith.constant 0 : index
    %78 = vector.load %arg9[%c2_92, %c0_93] : memref<328x128xbf16, #tpu.memory_space<vmem>>, vector<288x128xbf16>
    %c0_94 = arith.constant 0 : index
    %c2_95 = arith.constant 2 : index
    %c0_96 = arith.constant 0 : index
    %c0_97 = arith.constant 0 : index
    %79 = vector.load %arg5[%c0_94, %c2_95, %c0_96, %c0_97] : memref<3x3x128x128xbf16, #tpu.memory_space<vmem>>, vector<1x1x128x128xbf16>
    %80 = vector.shape_cast %79 : vector<1x1x128x128xbf16> to vector<128x128xbf16>
    %cst_98 = arith.constant dense<0.000000e+00> : vector<288x128xf32>
    %81 = tpu.matmul %78, %80, %cst_98 {dimension_numbers = #tpu.dot_dimension_numbers<[1], [0], [0], [1], [0, 0, 1, 1], [], []>} : vector<288x128xbf16>, vector<128x128xbf16>, vector<288x128xf32> -> vector<288x128xf32>
    %82 = arith.addf %77, %81 : vector<288x128xf32>
    %c18_99 = arith.constant 18 : index
    %c0_100 = arith.constant 0 : index
    %83 = vector.load %arg9[%c18_99, %c0_100] : memref<328x128xbf16, #tpu.memory_space<vmem>>, vector<288x128xbf16>
    %c1_101 = arith.constant 1 : index
    %c0_102 = arith.constant 0 : index
    %c0_103 = arith.constant 0 : index
    %c0_104 = arith.constant 0 : index
    %84 = vector.load %arg5[%c1_101, %c0_102, %c0_103, %c0_104] : memref<3x3x128x128xbf16, #tpu.memory_space<vmem>>, vector<1x1x128x128xbf16>
    %85 = vector.shape_cast %84 : vector<1x1x128x128xbf16> to vector<128x128xbf16>
    %cst_105 = arith.constant dense<0.000000e+00> : vector<288x128xf32>
    %86 = tpu.matmul %83, %85, %cst_105 {dimension_numbers = #tpu.dot_dimension_numbers<[1], [0], [0], [1], [0, 0, 1, 1], [], []>} : vector<288x128xbf16>, vector<128x128xbf16>, vector<288x128xf32> -> vector<288x128xf32>
    %87 = arith.addf %82, %86 : vector<288x128xf32>
    %c19_106 = arith.constant 19 : index
    %c0_107 = arith.constant 0 : index
    %88 = vector.load %arg9[%c19_106, %c0_107] : memref<328x128xbf16, #tpu.memory_space<vmem>>, vector<288x128xbf16>
    %c1_108 = arith.constant 1 : index
    %c1_109 = arith.constant 1 : index
    %c0_110 = arith.constant 0 : index
    %c0_111 = arith.constant 0 : index
    %89 = vector.load %arg5[%c1_108, %c1_109, %c0_110, %c0_111] : memref<3x3x128x128xbf16, #tpu.memory_space<vmem>>, vector<1x1x128x128xbf16>
    %90 = vector.shape_cast %89 : vector<1x1x128x128xbf16> to vector<128x128xbf16>
    %cst_112 = arith.constant dense<0.000000e+00> : vector<288x128xf32>
    %91 = tpu.matmul %88, %90, %cst_112 {dimension_numbers = #tpu.dot_dimension_numbers<[1], [0], [0], [1], [0, 0, 1, 1], [], []>} : vector<288x128xbf16>, vector<128x128xbf16>, vector<288x128xf32> -> vector<288x128xf32>
    %92 = arith.addf %87, %91 : vector<288x128xf32>
    %c20_113 = arith.constant 20 : index
    %c0_114 = arith.constant 0 : index
    %93 = vector.load %arg9[%c20_113, %c0_114] : memref<328x128xbf16, #tpu.memory_space<vmem>>, vector<288x128xbf16>
    %c1_115 = arith.constant 1 : index
    %c2_116 = arith.constant 2 : index
    %c0_117 = arith.constant 0 : index
    %c0_118 = arith.constant 0 : index
    %94 = vector.load %arg5[%c1_115, %c2_116, %c0_117, %c0_118] : memref<3x3x128x128xbf16, #tpu.memory_space<vmem>>, vector<1x1x128x128xbf16>
    %95 = vector.shape_cast %94 : vector<1x1x128x128xbf16> to vector<128x128xbf16>
    %cst_119 = arith.constant dense<0.000000e+00> : vector<288x128xf32>
    %96 = tpu.matmul %93, %95, %cst_119 {dimension_numbers = #tpu.dot_dimension_numbers<[1], [0], [0], [1], [0, 0, 1, 1], [], []>} : vector<288x128xbf16>, vector<128x128xbf16>, vector<288x128xf32> -> vector<288x128xf32>
    %97 = arith.addf %92, %96 : vector<288x128xf32>
    %c36_120 = arith.constant 36 : index
    %c0_121 = arith.constant 0 : index
    %98 = vector.load %arg9[%c36_120, %c0_121] : memref<328x128xbf16, #tpu.memory_space<vmem>>, vector<288x128xbf16>
    %c2_122 = arith.constant 2 : index
    %c0_123 = arith.constant 0 : index
    %c0_124 = arith.constant 0 : index
    %c0_125 = arith.constant 0 : index
    %99 = vector.load %arg5[%c2_122, %c0_123, %c0_124, %c0_125] : memref<3x3x128x128xbf16, #tpu.memory_space<vmem>>, vector<1x1x128x128xbf16>
    %100 = vector.shape_cast %99 : vector<1x1x128x128xbf16> to vector<128x128xbf16>
    %cst_126 = arith.constant dense<0.000000e+00> : vector<288x128xf32>
    %101 = tpu.matmul %98, %100, %cst_126 {dimension_numbers = #tpu.dot_dimension_numbers<[1], [0], [0], [1], [0, 0, 1, 1], [], []>} : vector<288x128xbf16>, vector<128x128xbf16>, vector<288x128xf32> -> vector<288x128xf32>
    %102 = arith.addf %97, %101 : vector<288x128xf32>
    %c37_127 = arith.constant 37 : index
    %c0_128 = arith.constant 0 : index
    %103 = vector.load %arg9[%c37_127, %c0_128] : memref<328x128xbf16, #tpu.memory_space<vmem>>, vector<288x128xbf16>
    %c2_129 = arith.constant 2 : index
    %c1_130 = arith.constant 1 : index
    %c0_131 = arith.constant 0 : index
    %c0_132 = arith.constant 0 : index
    %104 = vector.load %arg5[%c2_129, %c1_130, %c0_131, %c0_132] : memref<3x3x128x128xbf16, #tpu.memory_space<vmem>>, vector<1x1x128x128xbf16>
    %105 = vector.shape_cast %104 : vector<1x1x128x128xbf16> to vector<128x128xbf16>
    %cst_133 = arith.constant dense<0.000000e+00> : vector<288x128xf32>
    %106 = tpu.matmul %103, %105, %cst_133 {dimension_numbers = #tpu.dot_dimension_numbers<[1], [0], [0], [1], [0, 0, 1, 1], [], []>} : vector<288x128xbf16>, vector<128x128xbf16>, vector<288x128xf32> -> vector<288x128xf32>
    %107 = arith.addf %102, %106 : vector<288x128xf32>
    %c38_134 = arith.constant 38 : index
    %c0_135 = arith.constant 0 : index
    %108 = vector.load %arg9[%c38_134, %c0_135] : memref<328x128xbf16, #tpu.memory_space<vmem>>, vector<288x128xbf16>
    %c2_136 = arith.constant 2 : index
    %c2_137 = arith.constant 2 : index
    %c0_138 = arith.constant 0 : index
    %c0_139 = arith.constant 0 : index
    %109 = vector.load %arg5[%c2_136, %c2_137, %c0_138, %c0_139] : memref<3x3x128x128xbf16, #tpu.memory_space<vmem>>, vector<1x1x128x128xbf16>
    %110 = vector.shape_cast %109 : vector<1x1x128x128xbf16> to vector<128x128xbf16>
    %cst_140 = arith.constant dense<0.000000e+00> : vector<288x128xf32>
    %111 = tpu.matmul %108, %110, %cst_140 {dimension_numbers = #tpu.dot_dimension_numbers<[1], [0], [0], [1], [0, 0, 1, 1], [], []>} : vector<288x128xbf16>, vector<128x128xbf16>, vector<288x128xf32> -> vector<288x128xf32>
    %112 = arith.addf %107, %111 : vector<288x128xf32>
    %c0_141 = arith.constant 0 : index
    %c0_142 = arith.constant 0 : index
    %113 = vector.load %arg6[%c0_141, %c0_142] : memref<1x128xf32, #tpu.memory_space<vmem>>, vector<1x128xf32>
    %114 = vector.broadcast %113 : vector<1x128xf32> to vector<288x128xf32>
    %115 = arith.addf %112, %114 : vector<288x128xf32>
    %cst_143 = arith.constant 0.000000e+00 : f32
    %116 = vector.broadcast %cst_143 : f32 to vector<288x128xf32>
    %117 = arith.maximumf %115, %116 : vector<288x128xf32>
    %c0_144 = arith.constant 0 : index
    %c0_145 = arith.constant 0 : index
    %c0_146 = arith.constant 0 : index
    %118 = vector.load %arg7[%c0_144, %c0_145, %c0_146] : memref<1x288x128xf32, #tpu.memory_space<vmem>>, vector<1x288x128xf32>
    %119 = vector.shape_cast %118 : vector<1x288x128xf32> to vector<288x128xf32>
    %120 = vector.shape_cast %117 : vector<288x128xf32> to vector<1x288x128xf32>
    tpu.vector_store %arg7[%c0_144, %c0_145, %c0_146], %120 {strides = array<i32>} : memref<1x288x128xf32, #tpu.memory_space<vmem>>, vector<1x288x128xf32>,
    return
  }
  func.func @transform_0(%arg0: i32) -> (i32, i32, i32) {
    %c0_i32 = arith.constant 0 : i32
    %c0_i32_0 = arith.constant 0 : i32
    %c0_i32_1 = arith.constant 0 : i32
    return %arg0, %c0_i32, %c0_i32_0 : i32, i32, i32
  }
  func.func @transform_1(%arg0: i32) -> (i32, i32) {
    %c0_i32 = arith.constant 0 : i32
    %c0_i32_0 = arith.constant 0 : i32
    %c0_i32_1 = arith.constant 0 : i32
    return %c0_i32, %c0_i32_0 : i32, i32
  }
  func.func @transform_2(%arg0: i32) -> (i32, i32, i32, i32) {
    %c0_i32 = arith.constant 0 : i32
    %c0_i32_0 = arith.constant 0 : i32
    %c0_i32_1 = arith.constant 0 : i32
    %c0_i32_2 = arith.constant 0 : i32
    %c0_i32_3 = arith.constant 0 : i32
    return %c0_i32, %c0_i32_0, %c0_i32_1, %c0_i32_2 : i32, i32, i32, i32
  }
  func.func @transform_3(%arg0: i32) -> (i32, i32) {
    %c0_i32 = arith.constant 0 : i32
    %c0_i32_0 = arith.constant 0 : i32
    %c0_i32_1 = arith.constant 0 : i32
    return %c0_i32, %c0_i32_0 : i32, i32
  }
  func.func @transform_4(%arg0: i32) -> (i32, i32, i32, i32) {
    %c0_i32 = arith.constant 0 : i32
    %c0_i32_0 = arith.constant 0 : i32
    %c0_i32_1 = arith.constant 0 : i32
    %c0_i32_2 = arith.constant 0 : i32
    %c0_i32_3 = arith.constant 0 : i32
    return %c0_i32, %c0_i32_0, %c0_i32_1, %c0_i32_2 : i32, i32, i32, i32
  }
  func.func @transform_5(%arg0: i32) -> (i32, i32) {
    %c0_i32 = arith.constant 0 : i32
    %c0_i32_0 = arith.constant 0 : i32
    %c0_i32_1 = arith.constant 0 : i32
    return %c0_i32, %c0_i32_0 : i32, i32
  }
  func.func @transform_6(%arg0: i32) -> (i32, i32, i32) {
    %c0_i32 = arith.constant 0 : i32
    %c0_i32_0 = arith.constant 0 : i32
    %c0_i32_1 = arith.constant 0 : i32
    return %arg0, %c0_i32, %c0_i32_0 : i32, i32, i32
  }
}

</mosaic_0001>

<bundles_post_ra>
// kernel: tpu_custom_call.1
= control target key start
LH: loop header
LB: loop body
LE: loop exit
PB: predicated region body
PF: predicated region fallthrough
CT: control target
= control target key end

     0   :  { %11 = vsyncpa [#allocation5], 0  ;;  %s14128_s0 = inlined_call_operand.vmem [shape: bf16[2,288,4], index: 0, kind: input, shape index: {}]   ;;  %s14129_s1 = inlined_call_operand.vmem [shape: f32[288,1], index: 1, kind: input, shape index: {}]   ;;  %s14130_s2 = inlined_call_operand.vmem [shape: bf16[3,3,4,128], index: 2, kind: input, shape index: {}]   ;;  %s14131_s3 = inlined_call_operand.vmem [shape: f32[1,128], index: 3, kind: input, shape index: {}]   ;;  %s14132_s4 = inlined_call_operand.vmem [shape: bf16[3,3,128,128], index: 4, kind: input, shape index: {}]   ;;  %s14133_s5 = inlined_call_operand.vmem [shape: f32[1,128], index: 5, kind: input, shape index: {}]   ;;  %s14134_s6 = inlined_call_operand.hbm [shape: f32[2,288,128], index: 6, kind: output, shape index: {}]  }
   0x1   :  { %13 = vsyncpa [#allocation5 + $0x1], 0  ;;  %s11707_s21 = smov 0   ;;  %s11709_s22 = smov 0  }
   0x2   :  { %s11711_s23 = smov 0   ;;  %s11713_s24 = smov 0  }
   0x3 LB: > { %s11728_s25 = sadd.s32 4294967295, %s11666_s24   ;;  %s8946_s26 = sadd.s32 4294967294, %s11666_s24   ;;  %s11666_s24 = sphi %s11713_s24, %s14289_s24   ;;  %s11662_s23 = sphi %s11711_s23, %s14288_s23   ;;  %s11658_s22 = sphi %s11709_s22, %s14287_s22   ;;  %s11654_s21 = sphi %s11707_s21, %s14286_s21  }
   0x4   : > { %s11732_s27 = sadd.s32 1, %s11666_s24   ;;  %s157_s28 = sadd.s32 1, %s11662_s23 }
   0x5   : > { %s154_s29 = ssub.s32 %s11666_s24, %s11732_s27  ;;  %p167_p0 = scmp.ne.s32.totalorder %s11662_s23, %s11658_s22 }
   0x6   : > { %p155_p1 = scmp.eq.s32.totalorder %s154_s29, 0  ;;  %p168_p2 = scmp.eq.s32.totalorder %s11728_s25, 1 }
   0x7   : > { %p173_p3 = scmp.ne.s32.totalorder %s11658_s22, %s11654_s21  ;;  %p174_p4 = scmp.eq.s32.totalorder %s8946_s26, 1 }
   0x8   : > { %s11743_s30 = scalar_select %p155_p1, %s11662_s23, %s157_s28  }
   0x9   : > { %p11745_p5 = por %p168_p2, %p167_p0  ;;  %p11749_p6 = por %p174_p4, %p173_p3 }
   0xa   : > { %p8949_p7 = scmp.ge.s32.totalorder %s11666_s24, 1  ;;  %p215_p8 = scmp.lt.s32.totalorder %s11666_s24, 3 }
   0xc   : > { %p216_p9 = pnand %p8949_p7, %p215_p8 }
   0xe   : > { %219 = sbr.rel (%p216_p9) target bundleno = 1807 (0x70f), region = 44 }
  0x15   : > { %vm270_vm0 = vcmask 1041408   ;;  %v8951_v0 = vld [vmem:[%s14130_s2 + $0x2] sm:$0x3]  ;;  %p245_p10 = scmp.lt.s32.totalorder %s11728_s25, 1  ;;  %vm251_vm1 = vcmask 27648   ;;  %v11668_v2 = vmov 0  }
  0x16   : > { %11329 = vmatprep.subr.msk.bf16.mxu0 %vm270_vm0, %v8951_v0  ;;  %v1096_v1 = vsel %vm270_vm0, %v8951_v0, 0  ;;  %252 = vst.msk [vmem:[#allocation2] sm:$0xf] %vm251_vm1, %v11668_v2  ;;  %253 = vst.msk [vmem:[#allocation2 + $0x4] sm:$0xf] %vm251_vm1, %v11668_v2  ;;  %vm254_vm2 = vcmask 25600   ;;  %11383 = vset.pattern.permute.xlu0 %v11668_v2 }
  0x17   : > { %vm255_vm3 = vsmask.f32 1280  ;;  %v257_v3 = vld [vmem:[#allocation2 + $0x8] sm:$0x3]  ;;  %266 = vst.msk [vmem:[#allocation2 + $0x9c] sm:$0xf] %vm251_vm1, %v11668_v2  ;;  %9928 = vmatpush3.bf16.msra.mxu0 %v1096_v1  ;;  %11384 = vset.pattern.permute.xlu1 %v11668_v2 }
  0x18   : > { %267 = vst.msk [vmem:[#allocation2 + $0xa0] sm:$0xf] %vm251_vm1, %v11668_v2  ;;  %268 = vst [vmem:[#allocation3] sm:$0xf] %v11668_v2  ;;  %s246_s11 = scalar_select %p245_p10, %s11728_s25, 1  ;;  %vm260_vm5 = vcmask 27649  }
  0x19   : > { %269 = vst [vmem:[#allocation3 + $0x4] sm:$0xf] %v11668_v2  ;;  %280 = vst [vmem:[#allocation3 + $0x9c] sm:$0xf] %v11668_v2  ;;  %v793_v6 = vld [vmem:[%s14130_s2] sm:$0x3] }
  0x1a   : > { %281 = vst [vmem:[#allocation3 + $0xa0] sm:$0xf] %v11668_v2  ;;  %vm11769_vm4 = vmand %vm254_vm2, %vm255_vm3  ;;  %s11339_s14 = smul.u32 144, %s246_s11  ;;  %vm261_vm6 = vsmask.f32 7942  ;;  %11330 = vmatprep.subr.msk.bf16.mxu0 %vm270_vm0, %v793_v6  ;;  %v11805_v38 = vsel %vm270_vm0, %v793_v6, 0 }
  0x1b   : > { %v258_v5 = vsel %vm11769_vm4, 0, %v257_v3  ;;  %vm318_vm7 = vsmask.f32 5392  ;;  %vm11791_vm8 = vmand %vm260_vm5, %vm261_vm6  ;;  %vm890_vm10 = vsmask.f32 7424  ;;  %vm1039_vm11 = vcmask 31744  }
  0x1c   : > { %259 = vst [vmem:[#allocation2 + $0x8] sm:$0x3] %v258_v5  ;;  %s11782_s17 = scalar_lea.vmem %s14128_s0, %s11339_s14  ;;  %vm11799_vm9 = vmor %vm255_vm3, %vm318_vm7  ;;  %vm1497_vm12 = vcmask 1046528   ;;  %vm2250_vm13 = vsmask.f32 6400  ;;  %vm2697_vm14 = vcmask 1045504  }
  0x1d   : > { %v282_v7 = vld [vmem:[%s11782_s17] sm:$0xf]  ;;  %v283_v8 = vld [vmem:[%s11782_s17 + $0x4] sm:$0xf]  ;;  %v284_v9 = vld [vmem:[%s11782_s17 + $0x8] sm:$0xf] }
  0x1e   : > { %v321_v10 = vshrl.u32 %v282_v7, 16  ;;  %v324_v11 = vshll.u32 %v282_v7, 16  ;;  %v330_v12 = vshrl.u32 %v283_v8, 16  ;;  %v333_v13 = vshll.u32 %v283_v8, 16  ;;  %v757_v14 = vld [vmem:[#allocation2] sm:$0xf]  ;;  %vm12765_vm2 = vmand %vm270_vm0, %vm255_vm3 }
  0x1f   : > { %v758_v15 = vld [vmem:[#allocation2 + $0x4] sm:$0xf]  ;;  %v285_v16 = vld [vmem:[%s11782_s17 + $0xc] sm:$0xf]  ;;  %v340_v17 = vshrl.u32 %v284_v9, 16  ;;  %v343_v18 = vshll.u32 %v284_v9, 16 }
  0x20   : > { %v323_v19 = vrot.slane %v321_v10, 6  ;;  %v326_v20 = vrot.slane %v324_v11, 7  ;;  %v332_v21 = vrot.slane %v330_v12, 6  ;;  %v335_v22 = vrot.slane %v333_v13, 7  ;;  %v286_v23 = vld [vmem:[%s11782_s17 + $0x10] sm:$0xf] }
  0x21   : > { %v11795_v26 = vcombine.low %v757_v14, %v758_v15  ;;  %v342_v27 = vrot.slane %v340_v17, 6  ;;  %v345_v28 = vrot.slane %v343_v18, 7  ;;  %v350_v29 = vshrl.u32 %v285_v16, 16  ;;  %v287_v39 = vld [vmem:[%s11782_s17 + $0x14] sm:$0xf]  ;;  %s242_s12 = sand.u32 1, %s11658_s22  }
  0x22   : > { %v327_v30 = vor.u32 %v326_v20, %v323_v19  ;;  %v336_v31 = vor.u32 %v335_v22, %v332_v21  ;;  %v353_v32 = vshll.u32 %v285_v16, 16  ;;  %v360_v33 = vshrl.u32 %v286_v23, 16  ;;  %v288_v44 = vld [vmem:[%s11782_s17 + $0x18] sm:$0xf]  ;;  %v289_v53 = vld [vmem:[%s11782_s17 + $0x1c] sm:$0xf] }
  0x23   : > { %v716_v25 = vld [vmem:[#allocation2 + $0x8] sm:$0xe]  ;;  %v894_v35 = vshll.u32 %v11795_v26, 16  ;;  %v346_v36 = vor.u32 %v345_v28, %v342_v27  ;;  %v352_v37 = vrot.slane %v350_v29, 6  ;;  %v892_v45 = vshrl.u32 %v11795_v26, 16  ;;  %s11338_s13 = smul.u32 288, %s242_s12 }
  0x24   : > { %v328_v40 = vrot.slane %v327_v30, 4  ;;  %v338_v41 = vrot.slane %v336_v31, 4  ;;  %v717_v42 = vsel %vm11791_vm8, %v327_v30, %v716_v25  ;;  %v355_v43 = vrot.slane %v353_v32, 7  ;;  %v290_v58 = vld [vmem:[%s11782_s17 + $0x20] sm:$0xf]  ;;  %s14087_s26 = scalar_lea.sflag [#allocation5], %s242_s12 }
  0x25   : > { %718 = vst [vmem:[#allocation2 + $0x8] sm:$0xe] %v717_v42  ;;  %v348_v46 = vrot.slane %v346_v36, 4  ;;  %v362_v47 = vrot.slane %v360_v33, 6  ;;  %v363_v48 = vshll.u32 %v286_v23, 16  ;;  %v370_v52 = vshrl.u32 %v287_v39, 16 }
  0x26   : > { %v337_v49 = vsel %vm11799_vm9, %v328_v40, %v336_v31  ;;  %v347_v50 = vsel %vm11799_vm9, %v338_v41, %v346_v36  ;;  %v356_v51 = vor.u32 %v355_v43, %v352_v37  ;;  %v896_v54 = vrot.slane %v894_v35, 1  ;;  %v291_v6 = vld [vmem:[%s11782_s17 + $0x24] sm:$0xf]  ;;  %v292_v13 = vld [vmem:[%s11782_s17 + $0x28] sm:$0xf]  ;;  %s14006_s16 = scalar_lea.vmem [#allocation4], %s11338_s13 }
  0x27   : > { %719 = vst.msk [vmem:[#allocation2 + $0xc] sm:$0xf] %vm251_vm1, %v337_v49  ;;  %720 = vst.msk [vmem:[#allocation2 + $0x10] sm:$0xf] %vm251_vm1, %v347_v50  ;;  %v365_v55 = vrot.slane %v363_v48, 7  ;;  %v373_v56 = vshll.u32 %v287_v39, 16 }
  0x28   : > { %v380_v57 = vshrl.u32 %v288_v44, 16  ;;  %v357_v59 = vsel %vm11799_vm9, %v348_v46, %v356_v51  ;;  %v358_v60 = vrot.slane %v356_v51, 4  ;;  %v372_v61 = vrot.slane %v370_v52, 6  ;;  %v293_v32 = vld [vmem:[%s11782_s17 + $0x2c] sm:$0xf]  ;;  %s8884_s18 = sshll.u32 %s14006_s16, 4  ;;  %s14081_s18 = int_to_ptr.vmem [resolvable:$true] %s8884_s18 }
  0x29   : > { %v383_v62 = vshll.u32 %v288_v44, 16  ;;  %721 = vst.msk [vmem:[#allocation2 + $0x14] sm:$0xf] %vm251_vm1, %v357_v59  ;;  %v366_v63 = vor.u32 %v365_v55, %v362_v47  ;;  %v375_v0 = vrot.slane %v373_v56, 7  ;;  %v390_v2 = vshrl.u32 %v289_v53, 16  ;;  %s11604_s28 = scalar_lea.vmem %s14081_s18, 4608 }
  0x2a   : > { %v382_v1 = vrot.slane %v380_v57, 6  ;;  %v393_v5 = vshll.u32 %v289_v53, 16  ;;  %v400_v7 = vshrl.u32 %v290_v58, 16  ;;  %v403_v8 = vshll.u32 %v290_v58, 16  ;;  %v295_v50 = vld [vmem:[%s11782_s17 + $0x34] sm:$0xf]  ;;  %p11605_p11 = scmp.ne.s32.totalorder %s14081_s18, %s11604_s28 }
  0x2b   : > { %v385_v3 = vrot.slane %v383_v62, 7  ;;  %v367_v9 = vsel %vm11799_vm9, %v358_v60, %v366_v63  ;;  %v368_v10 = vrot.slane %v366_v63, 4  ;;  %v376_v11 = vor.u32 %v375_v0, %v372_v61  ;;  %s11669_s29 = smov [#allocation4]  }
  0x2c   : > { %v392_v12 = vrot.slane %v390_v2, 6  ;;  %722 = vst.msk [vmem:[#allocation2 + $0x18] sm:$0xf] %vm251_vm1, %v367_v9  ;;  %v395_v15 = vrot.slane %v393_v5, 7  ;;  %v402_v16 = vrot.slane %v400_v7, 6  ;;  %v405_v17 = vrot.slane %v403_v8, 7  ;;  %p11606_p12 = pnand %p11605_p11, %p11745_p5 }
  0x2d   : > { %v386_v14 = vor.u32 %v385_v3, %v382_v1  ;;  %v377_v18 = vsel %vm11799_vm9, %v368_v10, %v376_v11  ;;  %v378_v19 = vrot.slane %v376_v11, 4  ;;  %v410_v20 = vshrl.u32 %v291_v6, 16  ;;  %v296_v5 = vld [vmem:[%s11782_s17 + $0x38] sm:$0xf]  ;;  %s11608_s9 = sshll.u32 %s11669_s29, 4  ;;  %s11609_s9 = int_to_ptr.vmem [resolvable:$false] %s11608_s9 }
  0x2e   : > { %v413_v21 = vshll.u32 %v291_v6, 16  ;;  %v11830_v22 = vld [vmem:[#allocation2 + $0x8] sm:$0xff]   ;;  %v897_v23 = vor.u32 %v896_v54, %v892_v45  ;;  %723 = vst.msk [vmem:[#allocation2 + $0x1c] sm:$0xf] %vm251_vm1, %v377_v18  ;;  %v396_v27 = vor.u32 %v395_v15, %v392_v12  ;;  %v406_v28 = vor.u32 %v405_v17, %v402_v16  ;;  %v294_v45 = vld [vmem:[%s11782_s17 + $0x30] sm:$0xf]  ;;  %p11607_p13 = pneg %p11606_p12  ;;  %p11611_p0 = scmp.lt.s32.totalorder %s14081_s18, %s11609_s9 }
  0x2f   : > { %v388_v25 = vrot.slane %v386_v14, 4  ;;  %v387_v29 = vsel %vm11799_vm9, %v378_v19, %v386_v14  ;;  %v412_v30 = vrot.slane %v410_v20, 6  ;;  %v420_v33 = vshrl.u32 %v292_v13, 16  ;;  %v11863_v6 = vld [vmem:[%s14130_s2 + $0x4] sm:$0x3]  ;;  %s11610_s10 = scalar_lea.vmem %s11609_s9, 9216 }
  0x30   : > { %v415_v31 = vrot.slane %v413_v21, 7  ;;  %v899_v35 = vshll.u32 %v11830_v22, 16  ;;  %v903_v36 = vshrl.u32 %v11830_v22, 16  ;;  %v11838_v37 = vld [vmem:[#allocation2 + $0x10] sm:$0xff]   ;;  %724 = vst.msk [vmem:[#allocation2 + $0x20] sm:$0xf] %vm251_vm1, %v387_v29  ;;  %p11612_p1 = scmp.lt.s32.totalorder %s11610_s10, %s11604_s28 }
  0x31   : > { %v397_v39 = vsel %vm11799_vm9, %v388_v25, %v396_v27  ;;  %v398_v40 = vrot.slane %v396_v27, 4  ;;  %v408_v41 = vrot.slane %v406_v28, 4  ;;  %v422_v43 = vrot.slane %v420_v33, 6  ;;  %v297_v18 = vld [vmem:[%s11782_s17 + $0x3c] sm:$0xf] }
  0x32   : > { %725 = vst.msk [vmem:[#allocation2 + $0x24] sm:$0xf] %vm251_vm1, %v397_v39  ;;  %v416_v42 = vor.u32 %v415_v31, %v412_v30  ;;  %v423_v44 = vshll.u32 %v292_v13, 16  ;;  %v901_v46 = vrot.slane %v899_v35, 1  ;;  %v907_v47 = vshll.u32 %v11838_v37, 16  ;;  %p11613_p2 = por %p11612_p1, %p11611_p0 }
  0x33   : > { %v911_v48 = vshrl.u32 %v11838_v37, 16  ;;  %v407_v49 = vsel %vm11799_vm9, %v398_v40, %v406_v28  ;;  %v430_v54 = vshrl.u32 %v293_v32, 16  ;;  %v433_v58 = vshll.u32 %v293_v32, 16  ;;  %v298_v39 = vld [vmem:[%s11782_s17 + $0x40] sm:$0xf] }
  0x34   : > { %v417_v51 = vsel %vm11799_vm9, %v408_v41, %v416_v42  ;;  %726 = vst.msk [vmem:[#allocation2 + $0x28] sm:$0xf] %vm251_vm1, %v407_v49  ;;  %v418_v52 = vrot.slane %v416_v42, 4  ;;  %v425_v53 = vrot.slane %v423_v44, 7  ;;  %v902_v55 = vsel %vm890_vm10, %v897_v23, %v901_v46  ;;  %v300_v49 = vld [vmem:[%s11782_s17 + $0x48] sm:$0xf]  ;;  %p11614_p3 = pnand %p11613_p2, %p11607_p13 }
  0x35   : > { %v905_v56 = vor.u32 %v903_v36, %v901_v46  ;;  %v909_v57 = vrot.slane %v907_v47, 1  ;;  %727 = vst.msk [vmem:[#allocation2 + $0x2c] sm:$0xf] %vm251_vm1, %v417_v51  ;;  %9929 = vmatprep.mubr.msk.bf16.mxu0 %vm1039_vm11, %v902_v55  ;;  %v11856_v59 = vld [vmem:[#allocation2 + $0x18] sm:$0xff]   ;;  %v432_v61 = vrot.slane %v430_v54, 6  ;;  %v440_v62 = vshrl.u32 %v294_v45, 16 }
  0x36   : > { %v426_v60 = vor.u32 %v425_v53, %v422_v43  ;;  %v443_v63 = vshll.u32 %v294_v45, 16  ;;  %v435_v2 = vrot.slane %v433_v58, 7  ;;  %v450_v3 = vshrl.u32 %v295_v50, 16  ;;  %v301_v58 = vld [vmem:[%s11782_s17 + $0x4c] sm:$0xf] }
  0x37   : > { %v910_v0 = vsel %vm890_vm10, %v905_v56, %v909_v57  ;;  %v913_v1 = vor.u32 %v911_v48, %v909_v57  ;;  %v915_v7 = vshll.u32 %v11856_v59, 16  ;;  %v919_v8 = vshrl.u32 %v11856_v59, 16  ;;  %v299_v48 = vld [vmem:[%s11782_s17 + $0x44] sm:$0xf] }
  0x38   : > { %9930 = vmatmul.mubr.msk.bf16.vlgmr.msra.gmra.mrb[0].mxu0 %vm1039_vm11, %v910_v0  ;;  %v427_v9 = vsel %vm11799_vm9, %v418_v52, %v426_v60  ;;  %v428_v10 = vrot.slane %v426_v60, 4  ;;  %v436_v12 = vor.u32 %v435_v2, %v432_v61  ;;  %v442_v13 = vrot.slane %v440_v62, 6 }
  0x39   : > { %9966 = vmatpush3.bf16.msra.mxu0 %v11805_v38  ;;  %v11871_v11 = vld [vmem:[#allocation2 + $0x20] sm:$0xff]   ;;  %728 = vst.msk [vmem:[#allocation2 + $0x30] sm:$0xf] %vm251_vm1, %v427_v9  ;;  %v445_v14 = vrot.slane %v443_v63, 7  ;;  %v452_v15 = vrot.slane %v450_v3, 6  ;;  %v917_v16 = vrot.slane %v915_v7, 1 }
  0x3a   : > { %v453_v17 = vshll.u32 %v295_v50, 16  ;;  %v460_v19 = vshrl.u32 %v296_v5, 16  ;;  %v463_v20 = vshll.u32 %v296_v5, 16  ;;  %11331 = vmatprep.subr.msk.bf16.mxu0 %vm270_vm0, %v11863_v6  ;;  %v923_v21 = vshll.u32 %v11871_v11, 16  ;;  %v302_v7 = vld [vmem:[%s11782_s17 + $0x50] sm:$0xf] }
  0x3b   : > { %v927_v38 = vshrl.u32 %v11871_v11, 16  ;;  %v437_v23 = vsel %vm11799_vm9, %v428_v10, %v436_v12  ;;  %v438_v25 = vrot.slane %v436_v12, 4  ;;  %v918_v27 = vsel %vm890_vm10, %v913_v1, %v917_v16 }
  0x3c   : > { %v921_v28 = vor.u32 %v919_v8, %v917_v16  ;;  %v11882_v29 = vld [vmem:[#allocation2 + $0x28] sm:$0xff]   ;;  %729 = vst.msk [vmem:[#allocation2 + $0x34] sm:$0xf] %vm251_vm1, %v437_v23  ;;  %v446_v30 = vor.u32 %v445_v14, %v442_v13  ;;  %v455_v31 = vrot.slane %v453_v17, 7  ;;  %9933 = vmatprep.mubr.msk.bf16.mxu0 %vm1039_vm11, %v918_v27  ;;  %v925_v32 = vrot.slane %v923_v21, 1 }
  0x3d   : > { %v462_v33 = vrot.slane %v460_v19, 6  ;;  %v465_v35 = vrot.slane %v463_v20, 7  ;;  %v470_v36 = vshrl.u32 %v297_v18, 16  ;;  %v931_v40 = vshll.u32 %v11882_v29, 16  ;;  %v303_v27 = vld [vmem:[%s11782_s17 + $0x54] sm:$0xf] }
  0x3e   : > { %v935_v41 = vshrl.u32 %v11882_v29, 16  ;;  %v447_v42 = vsel %vm11799_vm9, %v438_v25, %v446_v30  ;;  %v448_v43 = vrot.slane %v446_v30, 4  ;;  %v926_v44 = vsel %vm890_vm10, %v921_v28, %v925_v32 }
  0x3f   : > { %v929_v45 = vor.u32 %v927_v38, %v925_v32  ;;  %v456_v46 = vor.u32 %v455_v31, %v452_v15  ;;  %730 = vst.msk [vmem:[#allocation2 + $0x38] sm:$0xf] %vm251_vm1, %v447_v42  ;;  %v466_v47 = vor.u32 %v465_v35, %v462_v33  ;;  %v933_v50 = vrot.slane %v931_v40, 1 }
  0x40   : > { %9934 = vmatmul.mubr.msk.bf16.gmra.mrb[4].mxu0 %vm1039_vm11, %v926_v44  ;;  %v472_v51 = vrot.slane %v470_v36, 6  ;;  %v473_v52 = vshll.u32 %v297_v18, 16  ;;  %v480_v53 = vshrl.u32 %v298_v39, 16  ;;  %v483_v57 = vshll.u32 %v298_v39, 16 }
  0x41   : > { %v457_v54 = vsel %vm11799_vm9, %v448_v43, %v456_v46  ;;  %v458_v55 = vrot.slane %v456_v46, 4  ;;  %v468_v56 = vrot.slane %v466_v47, 4  ;;  %v934_v60 = vsel %vm890_vm10, %v929_v45, %v933_v50  ;;  %v304_v45 = vld [vmem:[%s11782_s17 + $0x58] sm:$0xf] }
  0x42   : > { %v937_v61 = vor.u32 %v935_v41, %v933_v50  ;;  %731 = vst.msk [vmem:[#allocation2 + $0x3c] sm:$0xf] %vm251_vm1, %v457_v54  ;;  %v475_v62 = vrot.slane %v473_v52, 7  ;;  %v482_v63 = vrot.slane %v480_v53, 6  ;;  %9937 = vmatprep.mubr.msk.bf16.mxu0 %vm1039_vm11, %v934_v60  ;;  %v485_v2 = vrot.slane %v483_v57, 7 }
  0x43   : > { %v11902_v0 = vld [vmem:[#allocation2 + $0x30] sm:$0xff]   ;;  %v467_v1 = vsel %vm11799_vm9, %v458_v55, %v466_v47  ;;  %v490_v3 = vshrl.u32 %v299_v48, 16  ;;  %v493_v5 = vshll.u32 %v299_v48, 16  ;;  %v500_v9 = vshrl.u32 %v300_v49, 16  ;;  %v305_v54 = vld [vmem:[%s11782_s17 + $0x5c] sm:$0xf] }
  0x44   : > { %v476_v8 = vor.u32 %v475_v62, %v472_v51  ;;  %732 = vst.msk [vmem:[#allocation2 + $0x40] sm:$0xf] %vm251_vm1, %v467_v1  ;;  %v503_v10 = vshll.u32 %v300_v49, 16  ;;  %v510_v12 = vshrl.u32 %v301_v58, 16  ;;  %v939_v13 = vshll.u32 %v11902_v0, 16 }
  0x45   : > { %v943_v14 = vshrl.u32 %v11902_v0, 16  ;;  %v486_v15 = vor.u32 %v485_v2, %v482_v63  ;;  %v492_v16 = vrot.slane %v490_v3, 6  ;;  %v495_v19 = vrot.slane %v493_v5, 7  ;;  %v306_v55 = vld [vmem:[%s11782_s17 + $0x60] sm:$0xf] }
  0x46   : > { %v477_v17 = vsel %vm11799_vm9, %v468_v56, %v476_v8  ;;  %v478_v18 = vrot.slane %v476_v8, 4  ;;  %v502_v20 = vrot.slane %v500_v9, 6  ;;  %v941_v21 = vrot.slane %v939_v13, 1 }
  0x47   : > { %733 = vst.msk [vmem:[#allocation2 + $0x44] sm:$0xf] %vm251_vm1, %v477_v17  ;;  %v488_v38 = vrot.slane %v486_v15, 4  ;;  %v505_v23 = vrot.slane %v503_v10, 7  ;;  %v512_v25 = vrot.slane %v510_v12, 6  ;;  %v496_v30 = vor.u32 %v495_v19, %v492_v16 }
  0x48   : > { %v487_v28 = vsel %vm11799_vm9, %v478_v18, %v486_v15  ;;  %v513_v31 = vshll.u32 %v301_v58, 16  ;;  %v520_v32 = vshrl.u32 %v302_v7, 16  ;;  %v942_v33 = vsel %vm890_vm10, %v937_v61, %v941_v21  ;;  %v307_v17 = vld [vmem:[%s11782_s17 + $0x64] sm:$0xf] }
  0x49   : > { %v11917_v35 = vld [vmem:[#allocation2 + $0x38] sm:$0xff]   ;;  %v945_v36 = vor.u32 %v943_v14, %v941_v21  ;;  %734 = vst.msk [vmem:[#allocation2 + $0x48] sm:$0xf] %vm251_vm1, %v487_v28  ;;  %v506_v39 = vor.u32 %v505_v23, %v502_v20  ;;  %v523_v40 = vshll.u32 %v302_v7, 16  ;;  %9938 = vmatmul.mubr.msk.bf16.gmra.mrb[8].mxu0 %vm1039_vm11, %v942_v33  ;;  %v497_v41 = vsel %vm11799_vm9, %v488_v38, %v496_v30 }
  0x4a   : > { %v498_v42 = vrot.slane %v496_v30, 4  ;;  %v515_v43 = vrot.slane %v513_v31, 7  ;;  %v522_v44 = vrot.slane %v520_v32, 6  ;;  %v947_v46 = vshll.u32 %v11917_v35, 16  ;;  %735 = vst.msk [vmem:[#allocation2 + $0x4c] sm:$0xf] %vm251_vm1, %v497_v41 }
  0x4b   : > { %v951_v47 = vshrl.u32 %v11917_v35, 16  ;;  %v508_v48 = vrot.slane %v506_v39, 4  ;;  %v525_v49 = vrot.slane %v523_v40, 7  ;;  %v530_v52 = vshrl.u32 %v303_v27, 16 }
  0x4c   : > { %v507_v50 = vsel %vm11799_vm9, %v498_v42, %v506_v39  ;;  %v516_v51 = vor.u32 %v515_v43, %v512_v25  ;;  %v533_v53 = vshll.u32 %v303_v27, 16  ;;  %v949_v56 = vrot.slane %v947_v46, 1  ;;  %v308_v25 = vld [vmem:[%s11782_s17 + $0x68] sm:$0xf] }
  0x4d   : > { %736 = vst.msk [vmem:[#allocation2 + $0x50] sm:$0xf] %vm251_vm1, %v507_v50  ;;  %v526_v57 = vor.u32 %v525_v49, %v522_v44  ;;  %v540_v58 = vshrl.u32 %v304_v45, 16  ;;  %v543_v60 = vshll.u32 %v304_v45, 16  ;;  %v532_v1 = vrot.slane %v530_v52, 6 }
  0x4e   : > { %v11932_v61 = vld [vmem:[#allocation2 + $0x40] sm:$0xff]   ;;  %v517_v62 = vsel %vm11799_vm9, %v508_v48, %v516_v51  ;;  %v518_v63 = vrot.slane %v516_v51, 4  ;;  %v535_v2 = vrot.slane %v533_v53, 7  ;;  %v950_v3 = vsel %vm890_vm10, %v945_v36, %v949_v56  ;;  %v309_v48 = vld [vmem:[%s11782_s17 + $0x6c] sm:$0xf] }
  0x4f   : > { %v953_v5 = vor.u32 %v951_v47, %v949_v56  ;;  %737 = vst.msk [vmem:[#allocation2 + $0x54] sm:$0xf] %vm251_vm1, %v517_v62  ;;  %v528_v7 = vrot.slane %v526_v57, 4  ;;  %v542_v8 = vrot.slane %v540_v58, 6  ;;  %9941 = vmatprep.mubr.msk.bf16.mxu0 %vm1039_vm11, %v950_v3  ;;  %v955_v9 = vshll.u32 %v11932_v61, 16 }
  0x50   : > { %v959_v10 = vshrl.u32 %v11932_v61, 16  ;;  %v527_v12 = vsel %vm11799_vm9, %v518_v63, %v526_v57  ;;  %v536_v13 = vor.u32 %v535_v2, %v532_v1  ;;  %v545_v14 = vrot.slane %v543_v60, 7  ;;  %v310_v49 = vld [vmem:[%s11782_s17 + $0x70] sm:$0xf] }
  0x51   : > { %738 = vst.msk [vmem:[#allocation2 + $0x58] sm:$0xf] %vm251_vm1, %v527_v12  ;;  %v550_v15 = vshrl.u32 %v305_v54, 16  ;;  %v553_v16 = vshll.u32 %v305_v54, 16  ;;  %v560_v18 = vshrl.u32 %v306_v55, 16  ;;  %v957_v19 = vrot.slane %v955_v9, 1 }
  0x52   : > { %v11945_v20 = vld [vmem:[#allocation2 + $0x48] sm:$0xff]   ;;  %v537_v21 = vsel %vm11799_vm9, %v528_v7, %v536_v13  ;;  %v538_v38 = vrot.slane %v536_v13, 4  ;;  %v563_v23 = vshll.u32 %v306_v55, 16  ;;  %v546_v27 = vor.u32 %v545_v14, %v542_v8  ;;  %v311_v7 = vld [vmem:[%s11782_s17 + $0x74] sm:$0xf] }
  0x53   : > { %739 = vst.msk [vmem:[#allocation2 + $0x5c] sm:$0xf] %vm251_vm1, %v537_v21  ;;  %v552_v28 = vrot.slane %v550_v15, 6  ;;  %v555_v30 = vrot.slane %v553_v16, 7  ;;  %v562_v31 = vrot.slane %v560_v18, 6  ;;  %v958_v32 = vsel %vm890_vm10, %v953_v5, %v957_v19 }
  0x54   : > { %v961_v33 = vor.u32 %v959_v10, %v957_v19  ;;  %v963_v36 = vshll.u32 %v11945_v20, 16  ;;  %v967_v39 = vshrl.u32 %v11945_v20, 16  ;;  %9942 = vmatmul.mubr.msk.bf16.gmra.mrb[12].mxu0 %vm1039_vm11, %v958_v32  ;;  %v547_v40 = vsel %vm11799_vm9, %v538_v38, %v546_v27  ;;  %v312_v8 = vld [vmem:[%s11782_s17 + $0x78] sm:$0xf] }
  0x55   : > { %v548_v41 = vrot.slane %v546_v27, 4  ;;  %v556_v42 = vor.u32 %v555_v30, %v552_v28  ;;  %v565_v43 = vrot.slane %v563_v23, 7  ;;  %740 = vst.msk [vmem:[#allocation2 + $0x60] sm:$0xf] %vm251_vm1, %v547_v40  ;;  %v570_v46 = vshrl.u32 %v307_v17, 16 }
  0x56   : > { %v965_v44 = vrot.slane %v963_v36, 1  ;;  %v11957_v45 = vld [vmem:[#allocation2 + $0x50] sm:$0xff]   ;;  %v573_v47 = vshll.u32 %v307_v17, 16  ;;  %v580_v53 = vshrl.u32 %v308_v25, 16  ;;  %v583_v5 = vshll.u32 %v308_v25, 16 }
  0x57   : > { %v557_v50 = vsel %vm11799_vm9, %v548_v41, %v556_v42  ;;  %v558_v51 = vrot.slane %v556_v42, 4  ;;  %v566_v52 = vor.u32 %v565_v43, %v562_v31  ;;  %v971_v56 = vshll.u32 %v11957_v45, 16  ;;  %v313_v36 = vld [vmem:[%s11782_s17 + $0x7c] sm:$0xf] }
  0x58   : > { %v966_v54 = vsel %vm890_vm10, %v961_v33, %v965_v44  ;;  %v969_v55 = vor.u32 %v967_v39, %v965_v44  ;;  %v975_v57 = vshrl.u32 %v11957_v45, 16  ;;  %741 = vst.msk [vmem:[#allocation2 + $0x64] sm:$0xf] %vm251_vm1, %v557_v50  ;;  %v572_v62 = vrot.slane %v570_v46, 6 }
  0x59   : > { %9945 = vmatprep.mubr.msk.bf16.mxu0 %vm1039_vm11, %v966_v54  ;;  %v567_v58 = vsel %vm11799_vm9, %v558_v51, %v566_v52  ;;  %v568_v60 = vrot.slane %v566_v52, 4  ;;  %v575_v63 = vrot.slane %v573_v47, 7  ;;  %v973_v1 = vrot.slane %v971_v56, 1 }
  0x5a   : > { %v11971_v2 = vld [vmem:[#allocation2 + $0x58] sm:$0xff]   ;;  %742 = vst.msk [vmem:[#allocation2 + $0x68] sm:$0xf] %vm251_vm1, %v567_v58  ;;  %v582_v3 = vrot.slane %v580_v53, 6  ;;  %v590_v10 = vshrl.u32 %v309_v48, 16  ;;  %v593_v12 = vshll.u32 %v309_v48, 16 }
  0x5b   : > { %v576_v9 = vor.u32 %v575_v63, %v572_v62  ;;  %v600_v13 = vshrl.u32 %v310_v49, 16  ;;  %v974_v14 = vsel %vm890_vm10, %v969_v55, %v973_v1  ;;  %v977_v15 = vor.u32 %v975_v57, %v973_v1  ;;  %v315_v58 = vld [vmem:[%s11782_s17 + $0x84] sm:$0xf] }
  0x5c   : > { %v979_v16 = vshll.u32 %v11971_v2, 16  ;;  %v983_v17 = vshrl.u32 %v11971_v2, 16  ;;  %9946 = vmatmul.mubr.msk.bf16.gmra.mrb[16].mxu0 %vm1039_vm11, %v974_v14  ;;  %v585_v21 = vrot.slane %v583_v5, 7  ;;  %v592_v38 = vrot.slane %v590_v10, 6 }
  0x5d   : > { %v577_v18 = vsel %vm11799_vm9, %v568_v60, %v576_v9  ;;  %v578_v19 = vrot.slane %v576_v9, 4  ;;  %v595_v25 = vrot.slane %v593_v12, 7  ;;  %v602_v27 = vrot.slane %v600_v13, 6  ;;  %v316_v12 = vld [vmem:[%s11782_s17 + $0x88] sm:$0xf] }
  0x5e   : > { %v981_v23 = vrot.slane %v979_v16, 1  ;;  %743 = vst.msk [vmem:[#allocation2 + $0x6c] sm:$0xf] %vm251_vm1, %v577_v18  ;;  %v603_v28 = vshll.u32 %v310_v49, 16  ;;  %v586_v31 = vor.u32 %v585_v21, %v582_v3  ;;  %v610_v32 = vshrl.u32 %v311_v7, 16 }
  0x5f   : > { %v11983_v30 = vld [vmem:[#allocation2 + $0x60] sm:$0xff]   ;;  %v613_v33 = vshll.u32 %v311_v7, 16  ;;  %v620_v39 = vshrl.u32 %v312_v8, 16  ;;  %v596_v42 = vor.u32 %v595_v25, %v592_v38  ;;  %v623_v57 = vshll.u32 %v312_v8, 16 }
  0x60   : > { %v982_v40 = vsel %vm890_vm10, %v977_v15, %v981_v23  ;;  %v985_v41 = vor.u32 %v983_v17, %v981_v23  ;;  %v605_v43 = vrot.slane %v603_v28, 7  ;;  %v987_v44 = vshll.u32 %v11983_v30, 16  ;;  %v314_v49 = vld [vmem:[%s11782_s17 + $0x80] sm:$0xf] }
  0x61   : > { %9949 = vmatprep.mubr.msk.bf16.mxu0 %vm1039_vm11, %v982_v40  ;;  %v991_v46 = vshrl.u32 %v11983_v30, 16  ;;  %v587_v47 = vsel %vm11799_vm9, %v578_v19, %v586_v31  ;;  %v588_v48 = vrot.slane %v586_v31, 4  ;;  %v598_v50 = vrot.slane %v596_v42, 4 }
  0x62   : > { %744 = vst.msk [vmem:[#allocation2 + $0x70] sm:$0xf] %vm251_vm1, %v587_v47  ;;  %v606_v51 = vor.u32 %v605_v43, %v602_v27  ;;  %v612_v52 = vrot.slane %v610_v32, 6  ;;  %v615_v53 = vrot.slane %v613_v33, 7  ;;  %v989_v54 = vrot.slane %v987_v44, 1 }
  0x63   : > { %v597_v55 = vsel %vm11799_vm9, %v588_v48, %v596_v42  ;;  %v622_v56 = vrot.slane %v620_v39, 6  ;;  %v630_v1 = vshrl.u32 %v313_v36, 16  ;;  %v625_v9 = vrot.slane %v623_v57, 7 }
  0x64   : > { %745 = vst.msk [vmem:[#allocation2 + $0x74] sm:$0xf] %vm251_vm1, %v597_v55  ;;  %v607_v60 = vsel %vm11799_vm9, %v598_v50, %v606_v51  ;;  %v608_v62 = vrot.slane %v606_v51, 4  ;;  %v616_v63 = vor.u32 %v615_v53, %v612_v52  ;;  %v990_v3 = vsel %vm890_vm10, %v985_v41, %v989_v54 }
  0x65   : > { %v12001_v5 = vld [vmem:[#allocation2 + $0x68] sm:$0xff]   ;;  %v993_v7 = vor.u32 %v991_v46, %v989_v54  ;;  %746 = vst.msk [vmem:[#allocation2 + $0x78] sm:$0xf] %vm251_vm1, %v607_v60  ;;  %v633_v10 = vshll.u32 %v313_v36, 16  ;;  %9950 = vmatmul.mubr.msk.bf16.gmra.mrb[20].mxu0 %vm1039_vm11, %v990_v3  ;;  %v632_v14 = vrot.slane %v630_v1, 6  ;;  %v640_v15 = vshrl.u32 %v314_v49, 16 }
  0x66   : > { %v617_v8 = vsel %vm11799_vm9, %v608_v62, %v616_v63  ;;  %v618_v13 = vrot.slane %v616_v63, 4  ;;  %v995_v16 = vshll.u32 %v12001_v5, 16  ;;  %v999_v17 = vshrl.u32 %v12001_v5, 16 }
  0x67   : > { %747 = vst.msk [vmem:[#allocation2 + $0x7c] sm:$0xf] %vm251_vm1, %v617_v8  ;;  %v626_v18 = vor.u32 %v625_v9, %v622_v56  ;;  %v635_v19 = vrot.slane %v633_v10, 7  ;;  %v642_v21 = vrot.slane %v640_v15, 6  ;;  %v643_v38 = vshll.u32 %v314_v49, 16 }
  0x68   : > { %v650_v23 = vshrl.u32 %v315_v58, 16  ;;  %v653_v25 = vshll.u32 %v315_v58, 16  ;;  %v997_v27 = vrot.slane %v995_v16, 1  ;;  %v660_v40 = vshrl.u32 %v316_v12, 16 }
  0x69   : > { %v627_v28 = vsel %vm11799_vm9, %v618_v13, %v626_v18  ;;  %v628_v31 = vrot.slane %v626_v18, 4  ;;  %v636_v32 = vor.u32 %v635_v19, %v632_v14  ;;  %v645_v33 = vrot.slane %v643_v38, 7 }
  0x6a   : > { %748 = vst.msk [vmem:[#allocation2 + $0x80] sm:$0xf] %vm251_vm1, %v627_v28  ;;  %v652_v36 = vrot.slane %v650_v23, 6  ;;  %v655_v39 = vrot.slane %v653_v25, 7  ;;  %v998_v41 = vsel %vm890_vm10, %v993_v7, %v997_v27  ;;  %v662_v48 = vrot.slane %v660_v40, 6 }
  0x6b   : > { %v12015_v42 = vld [vmem:[#allocation2 + $0x70] sm:$0xff]   ;;  %v637_v43 = vsel %vm11799_vm9, %v628_v31, %v636_v32  ;;  %v638_v44 = vrot.slane %v636_v32, 4  ;;  %9953 = vmatprep.mubr.msk.bf16.mxu0 %vm1039_vm11, %v998_v41  ;;  %v646_v46 = vor.u32 %v645_v33, %v642_v21  ;;  %v663_v49 = vshll.u32 %v316_v12, 16 }
  0x6c   : > { %749 = vst.msk [vmem:[#allocation2 + $0x84] sm:$0xf] %vm251_vm1, %v637_v43  ;;  %v656_v47 = vor.u32 %v655_v39, %v652_v36  ;;  %v1001_v50 = vor.u32 %v999_v17, %v997_v27  ;;  %v1003_v51 = vshll.u32 %v12015_v42, 16  ;;  %v1007_v52 = vshrl.u32 %v12015_v42, 16  ;;  %v9027_v39 = vld [vmem:[%s14130_s2 + $0x6] sm:$0x3] }
  0x6d   : > { %v647_v54 = vsel %vm11799_vm9, %v638_v44, %v646_v46  ;;  %v648_v55 = vrot.slane %v646_v46, 4  ;;  %v665_v57 = vrot.slane %v663_v49, 7  ;;  %v1590_v36 = vsel %vm270_vm0, %v11863_v6, 0  ;;  %v11581_v49 = vld [vmem:[#allocation2 + $0x10] sm:$0xff]  }
  0x6e   : > { %v12023_v53 = vld [vmem:[#allocation2 + $0x78] sm:$0xff]   ;;  %v658_v56 = vrot.slane %v656_v47, 4  ;;  %v1005_v58 = vrot.slane %v1003_v51, 1  ;;  %750 = vst.msk [vmem:[#allocation2 + $0x88] sm:$0xf] %vm251_vm1, %v647_v54 }
  0x6f   : > { %v1011_v60 = vshll.u32 %v12023_v53, 16  ;;  %v1015_v62 = vshrl.u32 %v12023_v53, 16  ;;  %v657_v63 = vsel %vm11799_vm9, %v648_v55, %v656_v47  ;;  %v12032_v1 = vor.u32 %v665_v57, %v662_v48  ;;  %v11582_v51 = vld [vmem:[#allocation2 + $0x18] sm:$0xff]  }
  0x70   : > { %v1006_v3 = vsel %vm890_vm10, %v1001_v50, %v1005_v58  ;;  %v1009_v7 = vor.u32 %v1007_v52, %v1005_v58  ;;  %751 = vst.msk [vmem:[#allocation2 + $0x8c] sm:$0xf] %vm251_vm1, %v657_v63  ;;  %v1501_v50 = vrot.slane %v11581_v49, 1  ;;  %v1503_v52 = vrot.slane %v11582_v51, 1  ;;  %v11583_v63 = vld [vmem:[#allocation2 + $0x20] sm:$0xff]   ;;  %v12203_v51 = vld [vmem:[#allocation2 + $0x38] sm:$0xff]  }
  0x71   : > { %9954 = vmatmul.mubr.msk.bf16.gmra.mrb[24].mxu0 %vm1039_vm11, %v1006_v3  ;;  %v1013_v9 = vrot.slane %v1011_v60, 1  ;;  %v667_v10 = vsel %vm11799_vm9, %v658_v56, %v12032_v1  ;;  %v668_v46 = vrot.slane %v12032_v1, 4  ;;  %v2029_v58 = vsel %vm270_vm0, %v9027_v39, 0  ;;  %v11584_v1 = vld [vmem:[#allocation2 + $0x28] sm:$0xff]  }
  0x72   : > { %752 = vst.msk [vmem:[#allocation2 + $0x90] sm:$0xf] %vm251_vm1, %v667_v10  ;;  %v1504_v60 = vsel %vm1497_vm12, %v1501_v50, %v1503_v52  ;;  %v1505_v4 = vrot.slane %v11583_v63, 1  ;;  %v1507_v3 = vrot.slane %v11584_v1, 1  ;;  %v11585_v10 = vld [vmem:[#allocation2 + $0x30] sm:$0xff]  }
  0x73   : > { %v12040_v12 = vld [vmem:[#allocation2 + $0x80] sm:$0xff]   ;;  %v1014_v8 = vsel %vm890_vm10, %v1009_v7, %v1013_v9  ;;  %v1017_v13 = vor.u32 %v1015_v62, %v1013_v9  ;;  %v12119_v62 = vld [vmem:[%s14130_s2 + $0x8] sm:$0x3]  ;;  %vm3450_vm15 = vsmask.f32 5376 }
  0x74   : > { %9957 = vmatprep.mubr.msk.bf16.mxu0 %vm1039_vm11, %v1014_v8  ;;  %v1019_v14 = vshll.u32 %v12040_v12, 16  ;;  %v1023_v15 = vshrl.u32 %v12040_v12, 16  ;;  %v1506_v7 = vsel %vm1497_vm12, %v1503_v52, %v1505_v4  ;;  %v1508_v9 = vsel %vm1497_vm12, %v1505_v4, %v1507_v3 }
  0x75   : > { %v1509_v8 = vrot.slane %v11585_v10, 1 }
  0x76   : > { %v1021_v16 = vrot.slane %v1019_v14, 1 }
  0x77   : > { %v12047_v17 = vld [vmem:[#allocation2 + $0x88] sm:$0xff]  }
  0x78   : > { %v1022_v18 = vsel %vm890_vm10, %v1017_v13, %v1021_v16  ;;  %v1025_v19 = vor.u32 %v1023_v15, %v1021_v16  ;;  %v1027_v21 = vshll.u32 %v12047_v17, 16  ;;  %v1031_v23 = vshrl.u32 %v12047_v17, 16  ;;  %v11586_v13 = vld [vmem:[#allocation2 + $0x38] sm:$0xff]  }
  0x79   : > { %9958 = vmatmul.mubr.msk.bf16.gmra.mrb[28].mxu0 %vm1039_vm11, %v1022_v18  ;;  %v12052_v38 = vld [vmem:[#allocation2 + $0x90] ss:$0 sps:$4 sm:$0x11]   ;;  %v1511_v14 = vrot.slane %v11586_v13, 1  ;;  %v1510_v15 = vsel %vm1497_vm12, %v1507_v3, %v1509_v8  ;;  %v1513_v18 = vrot.slane %v11932_v61, 1  ;;  %v12223_v3 = vld [vmem:[#allocation2 + $0x58] sm:$0xff]  }
  0x7a   : > { %v1029_v25 = vrot.slane %v1027_v21, 1  ;;  %v1035_v27 = vshll.u32 %v12052_v38, 16  ;;  %v1956_v10 = vrot.slane %v12223_v3, 1 }
  0x7b   : > { %v1512_v16 = vsel %vm1497_vm12, %v1509_v8, %v1511_v14  ;;  %v1514_v21 = vsel %vm1497_vm12, %v1511_v14, %v1513_v18  ;;  %v12233_v14 = vld [vmem:[#allocation2 + $0x68] sm:$0xff]  }
  0x7c   : > { %v1030_v28 = vsel %vm890_vm10, %v1025_v19, %v1029_v25  ;;  %v1033_v31 = vor.u32 %v1031_v23, %v1029_v25  ;;  %v1037_v32 = vrot.slane %v1035_v27, 1  ;;  %v1515_v19 = vrot.slane %v11945_v20, 1 }
  0x7d   : > { %9961 = vmatprep.mubr.msk.bf16.mxu0 %vm1039_vm11, %v1030_v28  ;;  %v1517_v25 = vrot.slane %v11957_v45, 1  ;;  %v1519_v27 = vrot.slane %v11971_v2, 1 }
  0x7e   : > { %v1038_v33 = vsel %vm890_vm10, %v1033_v31, %v1037_v32  ;;  %v1516_v23 = vsel %vm1497_vm12, %v1513_v18, %v1515_v19  ;;  %v1960_v18 = vrot.slane %v12233_v14, 1 }
  0x7f   : > { %v1518_v28 = vsel %vm1497_vm12, %v1515_v19, %v1517_v25  ;;  %v1520_v31 = vsel %vm1497_vm12, %v1517_v25, %v1519_v27 }
  0x81   : > { %9962 = vmatmul.mubr.msk.bf16.gmra.mrb[32].mxu0 %vm1039_vm11, %v1038_v33 }
  0x82   : > { %9967 = vmatprep.mubr.msk.bf16.mxu0 %vm1039_vm11, %v11795_v26  ;;  %v1491_v26 = vld [vmem:[#allocation2] sm:$0xe] }
  0x89   : > { %9968 = vmatmul.mubr.msk.bf16.vlgmr.msra.gmra.mrb[0].mxu0 %vm1039_vm11, %v11830_v22  ;;  %v11579_v22 = vld [vmem:[#allocation2 + $0x4] sm:$0xf] }
  0x8a   : > { %10004 = vmatpush3.bf16.msra.mxu0 %v1590_v36  ;;  %9971 = vmatprep.mubr.msk.bf16.mxu0 %vm1039_vm11, %v11838_v37  ;;  %v9008_v37 = vcombine.low %v1491_v26, %v11579_v22  ;;  %v1805_v26 = vld [vmem:[#allocation2 + $0x8] sm:$0xe]  ;;  %v12159_v22 = vld [vmem:[#allocation2 + $0xc] sm:$0xf] }
  0x8b   : > { %11332 = vmatprep.subr.msk.bf16.mxu0 %vm270_vm0, %v9027_v39 }
  0x8c   : > { %v1498_v6 = vrot.slane %v9008_v37, 1 }
  0x91   : > { %9972 = vmatmul.mubr.msk.bf16.gmra.mrb[4].mxu0 %vm1039_vm11, %v11856_v59  ;;  %v263_v59 = vld [vmem:[#allocation2 + $0x98] sm:$0xe] }
  0x92   : > { %9975 = vmatprep.mubr.msk.bf16.mxu0 %vm1039_vm11, %v11871_v11  ;;  %v11580_v11 = vld [vmem:[#allocation2 + $0x8] sm:$0xff]  }
  0x99   : > { %9976 = vmatmul.mubr.msk.bf16.gmra.mrb[8].mxu0 %vm1039_vm11, %v11882_v29  ;;  %v1499_v29 = vrot.slane %v11580_v11, 1 }
  0x9a   : > { %9979 = vmatprep.mubr.msk.bf16.mxu0 %vm1039_vm11, %v11902_v0  ;;  %v317_v0 = vld [vmem:[%s11782_s17 + $0x8c] sm:$0xf]  ;;  %s11340_s17 = smul.u32 4608, %s11728_s25 }
  0x9b   : > { %v670_v40 = vshrl.u32 %v317_v0, 16  ;;  %v673_v41 = vshll.u32 %v317_v0, 16  ;;  %v1500_v47 = vsel %vm1497_vm12, %v1498_v6, %v1499_v29  ;;  %v1502_v57 = vsel %vm1497_vm12, %v1499_v29, %v1501_v50  ;;  %v12174_v29 = vld [vmem:[#allocation2 + $0x18] sm:$0xff]  }
  0x9c   : > { %s14078_s25 = scalar_lea.hbm %s14134_s6, %s11340_s17 }
  0x9d   : > { %v672_v43 = vrot.slane %v670_v40, 6  ;;  %v675_v44 = vrot.slane %v673_v41, 7  ;;  %v1940_v40 = vrot.slane %v12174_v29, 1 }
  0x9f   : > { %v676_v48 = vor.u32 %v675_v44, %v672_v43  ;;  %v12184_v43 = vld [vmem:[#allocation2 + $0x28] sm:$0xff]   ;;  %v2476_v44 = vsel %vm270_vm0, %v12119_v62, 0 }
  0xa0   : > { %v1944_v49 = vrot.slane %v12184_v43, 1 }
  0xa1   : > { %9980 = vmatmul.mubr.msk.bf16.gmra.mrb[12].mxu0 %vm1039_vm11, %v11917_v35  ;;  %v264_v35 = vsel %vm11791_vm8, 0, %v263_v59  ;;  %v678_v24 = vrot.slane %v676_v48, 4  ;;  %v677_v54 = vsel %vm11799_vm9, %v668_v46, %v676_v48  ;;  %v12166_v59 = vld [vmem:[#allocation2 + $0x10] sm:$0xff]   ;;  %v12194_v48 = vld [vmem:[%s14130_s2 + $0xa] sm:$0x3] }
  0xa2   : > { %9983 = vmatprep.mubr.msk.bf16.mxu0 %vm1039_vm11, %v11932_v61  ;;  %265 = vst [vmem:[#allocation2 + $0x98] sm:$0xe] %v264_v35  ;;  %753 = vst.msk [vmem:[#allocation2 + $0x94] sm:$0xf] %vm251_vm1, %v677_v54  ;;  %v1521_v61 = vrot.slane %v11983_v30, 1  ;;  %v1938_v6 = vrot.slane %v12166_v59, 1 }
  0xa3   : > { %v12177_v35 = vld [vmem:[#allocation2 + $0x20] sm:$0xff]   ;;  %vm3897_vm1 = vcmask 1044480  }
  0xa4   : > { %v1522_v32 = vsel %vm1497_vm12, %v1519_v27, %v1521_v61  ;;  %v1941_v41 = vsel %vm1497_vm12, %v1938_v6, %v1940_v40  ;;  %v12206_v54 = vld [vmem:[#allocation2 + $0x40] sm:$0xff]  }
  0xa5   : > { %v12246_v27 = vld [vmem:[#allocation2 + $0x80] sm:$0xff]  }
  0xa9   : > { %9984 = vmatmul.mubr.msk.bf16.gmra.mrb[16].mxu0 %vm1039_vm11, %v11945_v20  ;;  %v754_v55 = vld [vmem:[#allocation2 + $0x98] sm:$0x3]  ;;  %v1523_v20 = vrot.slane %v12001_v5, 1 }
  0xaa   : > { %9987 = vmatprep.mubr.msk.bf16.mxu0 %vm1039_vm11, %v11957_v45  ;;  %v755_v56 = vsel %vm11769_vm4, %v678_v24, %v754_v55  ;;  %v1525_v45 = vrot.slane %v12015_v42, 1  ;;  %v1948_v55 = vrot.slane %v12203_v51, 1 }
  0xab   : > { %756 = vst [vmem:[#allocation2 + $0x98] sm:$0x3] %v755_v56  ;;  %v1524_v33 = vsel %vm1497_vm12, %v1521_v61, %v1523_v20  ;;  %v1950_v56 = vrot.slane %v12206_v54, 1 }
  0xac   : > { %v1526_v36 = vsel %vm1497_vm12, %v1523_v20, %v1525_v45  ;;  %v12253_v20 = vld [vmem:[#allocation2 + $0x88] sm:$0xff]  }
  0xb1   : > { %9988 = vmatmul.mubr.msk.bf16.gmra.mrb[20].mxu0 %vm1039_vm11, %v11971_v2  ;;  %v1527_v2 = vrot.slane %v12023_v53, 1 }
  0xb2   : > { %9991 = vmatprep.mubr.msk.bf16.mxu0 %vm1039_vm11, %v11983_v30  ;;  %v1529_v30 = vrot.slane %v12040_v12, 1 }
  0xb3   : > { %v1528_v39 = vsel %vm1497_vm12, %v1525_v45, %v1527_v2  ;;  %v1968_v45 = vrot.slane %v12253_v20, 1 }
  0xb4   : > { %v1530_v37 = vsel %vm1497_vm12, %v1527_v2, %v1529_v30 }
  0xb9   : > { %9992 = vmatmul.mubr.msk.bf16.gmra.mrb[24].mxu0 %vm1039_vm11, %v12001_v5  ;;  %v1531_v5 = vrot.slane %v12047_v17, 1 }
  0xba   : > { %9995 = vmatprep.mubr.msk.bf16.mxu0 %vm1039_vm11, %v12015_v42 }
  0xbb   : > { %v1532_v42 = vsel %vm1497_vm12, %v1529_v30, %v1531_v5  ;;  %v2260_v30 = vshrl.u32 %v12166_v59, 16 }
  0xc1   : > { %9996 = vmatmul.mubr.msk.bf16.gmra.mrb[28].mxu0 %vm1039_vm11, %v12023_v53  ;;  %v12164_v53 = vcombine.low %v1805_v26, %v12159_v22 }
  0xc2   : > { %9999 = vmatprep.mubr.msk.bf16.mxu0 %vm1039_vm11, %v12040_v12  ;;  %v1533_v12 = vrot.slane %v12052_v38, 1  ;;  %v1942_v38 = vrot.slane %v12177_v35, 1 }
  0xc4   : > { %v1534_v11 = vsel %vm1497_vm12, %v1531_v5, %v1533_v12  ;;  %v1943_v46 = vsel %vm1497_vm12, %v1940_v40, %v1942_v38  ;;  %v1945_v24 = vsel %vm1497_vm12, %v1942_v38, %v1944_v49  ;;  %v2263_v5 = vshll.u32 %v12166_v59, 16 }
  0xc5   : > { %v2272_v40 = vshll.u32 %v12174_v29, 16 }
  0xc9   : > { %10000 = vmatmul.mubr.msk.bf16.gmra.mrb[32].mxu0 %vm1039_vm11, %v12047_v17  ;;  %v1937_v17 = vrot.slane %v12164_v53, 1 }
  0xca   : > { %10005 = vmatprep.mubr.msk.bf16.mxu0 %vm1039_vm11, %v1500_v47  ;;  %v12189_v47 = vld [vmem:[#allocation2 + $0x30] sm:$0xff]  }
  0xcb   : > { %v1939_v0 = vsel %vm1497_vm12, %v1937_v17, %v1938_v6  ;;  %v1946_v50 = vrot.slane %v12189_v47, 1  ;;  %v2262_v6 = vrot.slane %v2260_v30, 1 }
  0xcd   : > { %v1947_v52 = vsel %vm1497_vm12, %v1944_v49, %v1946_v50 }
  0xd1   : > { %10006 = vmatmul.mubr.msk.bf16.vlgmr.msra.gmra.mrb[0].mxu0 %vm1039_vm11, %v1502_v57  ;;  %v1949_v57 = vsel %vm1497_vm12, %v1946_v50, %v1948_v55 }
  0xd2   : > { %10042 = vmatpush3.bf16.msra.mxu0 %v2029_v58  ;;  %10009 = vmatprep.mubr.msk.bf16.mxu0 %vm1039_vm11, %v1504_v60  ;;  %v12213_v58 = vld [vmem:[#allocation2 + $0x48] sm:$0xff]   ;;  %v1951_v60 = vsel %vm1497_vm12, %v1948_v55, %v1950_v56 }
  0xd3   : > { %11333 = vmatprep.subr.msk.bf16.mxu0 %vm270_vm0, %v12119_v62  ;;  %v12216_v62 = vld [vmem:[#allocation2 + $0x50] sm:$0xff]   ;;  %v1952_v63 = vrot.slane %v12213_v58, 1 }
  0xd4   : > { %v1954_v4 = vrot.slane %v12216_v62, 1 }
  0xd5   : > { %v1953_v1 = vsel %vm1497_vm12, %v1950_v56, %v1952_v63 }
  0xd6   : > { %v1957_v13 = vsel %vm1497_vm12, %v1954_v4, %v1956_v10 }
  0xd9   : > { %10010 = vmatmul.mubr.msk.bf16.gmra.mrb[4].mxu0 %vm1039_vm11, %v1506_v7  ;;  %v1955_v7 = vsel %vm1497_vm12, %v1952_v63, %v1954_v4  ;;  %v2290_v63 = vshll.u32 %v12184_v43, 16 }
  0xda   : > { %10013 = vmatprep.mubr.msk.bf16.mxu0 %vm1039_vm11, %v1508_v9  ;;  %v12226_v9 = vld [vmem:[#allocation2 + $0x60] sm:$0xff]  }
  0xdb   : > { %v1958_v8 = vrot.slane %v12226_v9, 1 }
  0xe1   : > { %10014 = vmatmul.mubr.msk.bf16.gmra.mrb[8].mxu0 %vm1039_vm11, %v1510_v15  ;;  %v1959_v15 = vsel %vm1497_vm12, %v1956_v10, %v1958_v8 }
  0xe2   : > { %10017 = vmatprep.mubr.msk.bf16.mxu0 %vm1039_vm11, %v1512_v16  ;;  %v12236_v16 = vld [vmem:[#allocation2 + $0x70] sm:$0xff]  }
  0xe3   : > { %v1962_v19 = vrot.slane %v12236_v16, 1 }
  0xe5   : > { %v1963_v25 = vsel %vm1497_vm12, %v1960_v18, %v1962_v19 }
  0xe9   : > { %10018 = vmatmul.mubr.msk.bf16.gmra.mrb[12].mxu0 %vm1039_vm11, %v1514_v21  ;;  %v1961_v21 = vsel %vm1497_vm12, %v1958_v8, %v1960_v18 }
  0xea   : > { %10021 = vmatprep.mubr.msk.bf16.mxu0 %vm1039_vm11, %v1516_v23  ;;  %v12243_v23 = vld [vmem:[#allocation2 + $0x78] sm:$0xff]  }
  0xf1   : > { %10022 = vmatmul.mubr.msk.bf16.gmra.mrb[16].mxu0 %vm1039_vm11, %v1518_v28  ;;  %v1964_v28 = vrot.slane %v12243_v23, 1 }
  0xf2   : > { %10025 = vmatprep.mubr.msk.bf16.mxu0 %vm1039_vm11, %v1520_v31  ;;  %v1966_v31 = vrot.slane %v12246_v27, 1 }
  0xf3   : > { %v1965_v61 = vsel %vm1497_vm12, %v1962_v19, %v1964_v28 }
  0xf4   : > { %v1969_v26 = vsel %vm1497_vm12, %v1966_v31, %v1968_v45 }
  0xf9   : > { %10026 = vmatmul.mubr.msk.bf16.gmra.mrb[20].mxu0 %vm1039_vm11, %v1522_v32  ;;  %v12255_v32 = vld [vmem:[#allocation2 + $0x90] sm:$0xff]  }
  0xfa   : > { %10029 = vmatprep.mubr.msk.bf16.mxu0 %vm1039_vm11, %v1524_v33  ;;  %v1967_v33 = vsel %vm1497_vm12, %v1964_v28, %v1966_v31  ;;  %v1970_v2 = vrot.slane %v12255_v32, 1  ;;  %v2305_v31 = vshrl.u32 %v12203_v51, 16 }
 0x101   : > { %10030 = vmatmul.mubr.msk.bf16.gmra.mrb[24].mxu0 %vm1039_vm11, %v1526_v36  ;;  %v2252_v36 = vshrl.u32 %v12164_v53, 16 }
 0x102   : > { %10033 = vmatprep.mubr.msk.bf16.mxu0 %vm1039_vm11, %v1528_v39  ;;  %v2255_v39 = vshll.u32 %v12164_v53, 16  ;;  %v2269_v53 = vshrl.u32 %v12174_v29, 16 }
 0x103   : > { %v2254_v12 = vrot.slane %v2252_v36, 1  ;;  %v2307_v36 = vrot.slane %v2305_v31, 1 }
 0x104   : > { %v2257_v17 = vrot.slane %v2255_v39, 2  ;;  %v2271_v50 = vrot.slane %v2269_v53, 1 }
 0x106   : > { %v2258_v38 = vor.u32 %v2257_v17, %v2254_v12  ;;  %v2326_v12 = vshll.u32 %v12213_v58, 16 }
 0x109   : > { %10034 = vmatmul.mubr.msk.bf16.gmra.mrb[28].mxu0 %vm1039_vm11, %v1530_v37  ;;  %v1971_v37 = vsel %vm1497_vm12, %v1968_v45, %v1970_v2  ;;  %v2317_v45 = vshll.u32 %v12206_v54, 16 }
 0x10a   : > { %10037 = vmatprep.mubr.msk.bf16.mxu0 %vm1039_vm11, %v1532_v42  ;;  %v11422_v42 = vld [vmem:[#allocation2 + $0x98] ss:$0 sps:$4 sm:$0x11]  }
 0x111   : > { %10038 = vmatmul.mubr.msk.bf16.gmra.mrb[32].mxu0 %vm1039_vm11, %v1534_v11  ;;  %v2265_v11 = vrot.slane %v2263_v5, 2 }
 0x112   : > { %10043 = vmatprep.mubr.msk.bf16.mxu0 %vm1039_vm11, %v1939_v0  ;;  %v1972_v0 = vrot.slane %v11422_v42, 1  ;;  %v2323_v42 = vshrl.u32 %v12213_v58, 16 }
 0x114   : > { %v1973_v49 = vsel %vm1497_vm12, %v1970_v2, %v1972_v0  ;;  %v2325_v53 = vrot.slane %v2323_v42, 1 }
 0x119   : > { %10044 = vmatmul.mubr.msk.bf16.vlgmr.msra.gmra.mrb[0].mxu0 %vm1039_vm11, %v1941_v41  ;;  %v2266_v41 = vor.u32 %v2265_v11, %v2262_v6  ;;  %v2332_v6 = vshrl.u32 %v12216_v62, 16  ;;  %v2335_v11 = vshll.u32 %v12216_v62, 16 }
 0x11a   : > { %10080 = vmatpush3.bf16.msra.mxu0 %v2476_v44  ;;  %10047 = vmatprep.mubr.msk.bf16.mxu0 %vm1039_vm11, %v1943_v46  ;;  %v2278_v44 = vshrl.u32 %v12177_v35, 16  ;;  %v2281_v46 = vshll.u32 %v12177_v35, 16 }
 0x11b   : > { %11334 = vmatprep.subr.msk.bf16.mxu0 %vm270_vm0, %v12194_v48 }
 0x11c   : > { %v2280_v55 = vrot.slane %v2278_v44, 1  ;;  %v2283_v56 = vrot.slane %v2281_v46, 2  ;;  %v2337_v44 = vrot.slane %v2335_v11, 2  ;;  %v2395_v11 = vshrl.u32 %v12253_v20, 16 }
 0x11e   : > { %v2284_v4 = vor.u32 %v2283_v56, %v2280_v55  ;;  %v2353_v55 = vshll.u32 %v12226_v9, 16 }
 0x121   : > { %10048 = vmatmul.mubr.msk.bf16.gmra.mrb[4].mxu0 %vm1039_vm11, %v1945_v24  ;;  %v2274_v24 = vrot.slane %v2272_v40, 2  ;;  %v2328_v40 = vrot.slane %v2326_v12, 2 }
 0x122   : > { %10051 = vmatprep.mubr.msk.bf16.mxu0 %vm1039_vm11, %v1947_v52  ;;  %v2267_v52 = vsel %vm2250_vm13, %v2258_v38, %v2266_v41 }
 0x123   : > { %v2329_v46 = vor.u32 %v2328_v40, %v2325_v53  ;;  %v2404_v40 = vshrl.u32 %v12255_v32, 16 }
 0x129   : > { %10052 = vmatmul.mubr.msk.bf16.gmra.mrb[8].mxu0 %vm1039_vm11, %v1949_v57  ;;  %v2275_v57 = vor.u32 %v2274_v24, %v2271_v50  ;;  %v2344_v50 = vshll.u32 %v12223_v3, 16 }
 0x12a   : > { %10055 = vmatprep.mubr.msk.bf16.mxu0 %vm1039_vm11, %v1951_v60  ;;  %v2287_v60 = vshrl.u32 %v12184_v43, 16 }
 0x12b   : > { %v2276_v10 = vsel %vm2250_vm13, %v2266_v41, %v2275_v57  ;;  %v2285_v18 = vsel %vm2250_vm13, %v2275_v57, %v2284_v4  ;;  %v2334_v41 = vrot.slane %v2332_v6, 1 }
 0x12c   : > { %v2289_v8 = vrot.slane %v2287_v60, 1  ;;  %v2346_v60 = vrot.slane %v2344_v50, 2 }
 0x12d   : > { %v2338_v24 = vor.u32 %v2337_v44, %v2334_v41  ;;  %v2397_v44 = vrot.slane %v2395_v11, 1  ;;  %v3005_v11 = vld [vmem:[#allocation2 + $0x10] sm:$0xc] }
 0x131   : > { %10056 = vmatmul.mubr.msk.bf16.gmra.mrb[12].mxu0 %vm1039_vm11, %v1953_v1  ;;  %v2296_v1 = vshrl.u32 %v12189_v47, 16 }
 0x132   : > { %10059 = vmatprep.mubr.msk.bf16.mxu0 %vm1039_vm11, %v1955_v7  ;;  %v2299_v7 = vshll.u32 %v12189_v47, 16 }
 0x133   : > { %v2298_v19 = vrot.slane %v2296_v1, 1  ;;  %v2355_v1 = vrot.slane %v2353_v55, 2 }
 0x139   : > { %10060 = vmatmul.mubr.msk.bf16.gmra.mrb[16].mxu0 %vm1039_vm11, %v1957_v13  ;;  %v2292_v13 = vrot.slane %v2290_v63, 2  ;;  %v2339_v63 = vsel %vm2250_vm13, %v2329_v46, %v2338_v24 }
 0x13a   : > { %10063 = vmatprep.mubr.msk.bf16.mxu0 %vm1039_vm11, %v1959_v15  ;;  %v2790_v15 = vsel %vm270_vm0, %v12194_v48, 0 }
 0x13b   : > { %v2293_v28 = vor.u32 %v2292_v13, %v2289_v8  ;;  %v2362_v8 = vshll.u32 %v12233_v14, 16 }
 0x13d   : > { %v2294_v2 = vsel %vm2250_vm13, %v2284_v4, %v2293_v28 }
 0x141   : > { %10064 = vmatmul.mubr.msk.bf16.gmra.mrb[20].mxu0 %vm1039_vm11, %v1961_v21  ;;  %v2301_v21 = vrot.slane %v2299_v7, 2 }
 0x142   : > { %10067 = vmatprep.mubr.msk.bf16.mxu0 %vm1039_vm11, %v1963_v25  ;;  %v12289_v25 = vld [vmem:[%s14130_s2 + $0xc] sm:$0x3] }
 0x143   : > { %v2302_v48 = vor.u32 %v2301_v21, %v2298_v19 }
 0x145   : > { %v2303_v30 = vsel %vm2250_vm13, %v2293_v28, %v2302_v48  ;;  %v2364_v28 = vrot.slane %v2362_v8, 2 }
 0x149   : > { %10068 = vmatmul.mubr.msk.bf16.gmra.mrb[24].mxu0 %vm1039_vm11, %v1965_v61  ;;  %v2308_v61 = vshll.u32 %v12203_v51, 16 }
 0x14a   : > { %10071 = vmatprep.mubr.msk.bf16.mxu0 %vm1039_vm11, %v1967_v33  ;;  %v2314_v33 = vshrl.u32 %v12206_v54, 16 }
 0x14b   : > { %v2310_v39 = vrot.slane %v2308_v61, 2 }
 0x14c   : > { %v2316_v5 = vrot.slane %v2314_v33, 1 }
 0x151   : > { %10072 = vmatmul.mubr.msk.bf16.gmra.mrb[28].mxu0 %vm1039_vm11, %v1969_v26  ;;  %v2319_v26 = vrot.slane %v2317_v45, 2  ;;  %v2377_v45 = vshrl.u32 %v12243_v23, 16 }
 0x152   : > { %10075 = vmatprep.mubr.msk.bf16.mxu0 %vm1039_vm11, %v1971_v37  ;;  %v2311_v37 = vor.u32 %v2310_v39, %v2307_v36  ;;  %v2386_v39 = vshrl.u32 %v12246_v27, 16 }
 0x153   : > { %v2320_v17 = vor.u32 %v2319_v26, %v2316_v5  ;;  %v2379_v26 = vrot.slane %v2377_v45, 1  ;;  %v2709_v45 = vrot.slane %v12203_v51, 2  ;;  %v2717_v51 = vrot.slane %v12223_v3, 2 }
 0x154   : > { %v2312_v0 = vsel %vm2250_vm13, %v2302_v48, %v2311_v37  ;;  %v2388_v12 = vrot.slane %v2386_v39, 1  ;;  %v2715_v39 = vrot.slane %v12216_v62, 2  ;;  %v2723_v62 = vrot.slane %v12236_v16, 2 }
 0x155   : > { %v2321_v38 = vsel %vm2250_vm13, %v2311_v37, %v2320_v17  ;;  %v2330_v56 = vsel %vm2250_vm13, %v2320_v17, %v2329_v46 }
 0x159   : > { %10076 = vmatmul.mubr.msk.bf16.gmra.mrb[32].mxu0 %vm1039_vm11, %v1973_v49  ;;  %v2341_v49 = vshrl.u32 %v12223_v3, 16  ;;  %v2725_v3 = vrot.slane %v12243_v23, 2 }
 0x15a   : > { %10081 = vmatprep.mubr.msk.bf16.mxu0 %vm1039_vm11, %v2267_v52  ;;  %v2350_v52 = vshrl.u32 %v12226_v9, 16 }
 0x15b   : > { %v2343_v57 = vrot.slane %v2341_v49, 1  ;;  %v12340_v49 = vld [vmem:[#allocation2 + $0x98] ss:$0 sps:$4 sm:$0x33]  }
 0x15c   : > { %v2352_v4 = vrot.slane %v2350_v52, 1 }
 0x15d   : > { %v2347_v7 = vor.u32 %v2346_v60, %v2343_v57  ;;  %v2416_v57 = vshll.u32 %v12340_v49, 16 }
 0x15e   : > { %v2356_v13 = vor.u32 %v2355_v1, %v2352_v4 }
 0x15f   : > { %v2348_v19 = vsel %vm2250_vm13, %v2338_v24, %v2347_v7  ;;  %v2406_v24 = vrot.slane %v2404_v40, 1  ;;  %v12417_v40 = vld [vmem:[#allocation2 + $0x18] sm:$0xff]  }
 0x160   : > { %v2357_v31 = vsel %vm2250_vm13, %v2347_v7, %v2356_v13  ;;  %v2418_v7 = vrot.slane %v2416_v57, 2 }
 0x161   : > { %10082 = vmatmul.mubr.msk.bf16.vlgmr.msra.gmra.mrb[0].mxu0 %vm1039_vm11, %v2276_v10  ;;  %v2359_v10 = vshrl.u32 %v12233_v14, 16 }
 0x162   : > { %10118 = vmatpush3.bf16.msra.mxu0 %v2790_v15  ;;  %10085 = vmatprep.mubr.msk.bf16.mxu0 %vm1039_vm11, %v2285_v18  ;;  %v2368_v15 = vshrl.u32 %v12236_v16, 16  ;;  %v2371_v18 = vshll.u32 %v12236_v16, 16  ;;  %v2731_v16 = vrot.slane %v12255_v32, 2 }
 0x163   : > { %11335 = vmatprep.subr.msk.bf16.mxu0 %vm270_vm0, %v12289_v25  ;;  %v2361_v21 = vrot.slane %v2359_v10, 1 }
 0x164   : > { %v2370_v61 = vrot.slane %v2368_v15, 1  ;;  %v2373_v48 = vrot.slane %v2371_v18, 2  ;;  %v2699_v18 = vrot.slane %v12166_v59, 2 }
 0x165   : > { %v2365_v33 = vor.u32 %v2364_v28, %v2361_v21  ;;  %v2701_v28 = vrot.slane %v12174_v29, 2  ;;  %v2705_v29 = vrot.slane %v12184_v43, 2 }
 0x166   : > { %v2374_v36 = vor.u32 %v2373_v48, %v2370_v61  ;;  %v3229_v61 = vsel %vm270_vm0, %v12289_v25, 0  ;;  %v12366_v48 = vld [vmem:[%s14130_s2 + $0xe] sm:$0x3] }
 0x167   : > { %v2366_v5 = vsel %vm2250_vm13, %v2356_v13, %v2365_v33 }
 0x168   : > { %v2375_v42 = vsel %vm2250_vm13, %v2365_v33, %v2374_v36 }
 0x169   : > { %10086 = vmatmul.mubr.msk.bf16.gmra.mrb[4].mxu0 %vm1039_vm11, %v2294_v2  ;;  %v2380_v2 = vshll.u32 %v12243_v23, 16 }
 0x16a   : > { %10089 = vmatprep.mubr.msk.bf16.mxu0 %vm1039_vm11, %v2303_v30  ;;  %v2389_v30 = vshll.u32 %v12246_v27, 16 }
 0x16b   : > { %v2382_v37 = vrot.slane %v2380_v2, 2  ;;  %v2711_v2 = vrot.slane %v12206_v54, 2  ;;  %v2719_v54 = vrot.slane %v12226_v9, 2  ;;  %v2727_v9 = vrot.slane %v12246_v27, 2 }
 0x16c   : > { %v2391_v17 = vrot.slane %v2389_v30, 2 }
 0x16d   : > { %v2383_v6 = vor.u32 %v2382_v37, %v2379_v26  ;;  %v2712_v43 = vsel %vm2697_vm14, %v2709_v45, %v2711_v2  ;;  %v2718_v26 = vsel %vm2697_vm14, %v2715_v39, %v2717_v51  ;;  %v2720_v37 = vsel %vm2697_vm14, %v2717_v51, %v2719_v54 }
 0x16e   : > { %v2392_v53 = vor.u32 %v2391_v17, %v2388_v12  ;;  %v2726_v17 = vsel %vm2697_vm14, %v2723_v62, %v2725_v3 }
 0x16f   : > { %v2384_v41 = vsel %vm2250_vm13, %v2374_v36, %v2383_v6 }
 0x170   : > { %v2393_v50 = vsel %vm2250_vm13, %v2383_v6, %v2392_v53  ;;  %v2728_v6 = vsel %vm2697_vm14, %v2725_v3, %v2727_v9  ;;  %v4289_v3 = vld [vmem:[%s14129_s1 + $0x28] sm:$0xff] }
 0x171   : > { %10090 = vmatmul.mubr.msk.bf16.gmra.mrb[8].mxu0 %vm1039_vm11, %v2312_v0  ;;  %v2398_v0 = vshll.u32 %v12253_v20, 16 }
 0x172   : > { %10093 = vmatprep.mubr.msk.bf16.mxu0 %vm1039_vm11, %v2321_v38  ;;  %v2407_v38 = vshll.u32 %v12255_v32, 16 }
 0x173   : > { %v2400_v46 = vrot.slane %v2398_v0, 2  ;;  %v12410_v0 = vld [vmem:[#allocation2 + $0x14] sm:$0xf] }
 0x174   : > { %v2409_v52 = vrot.slane %v2407_v38, 2  ;;  %v12415_v27 = vcombine.low %v3005_v11, %v12410_v0  ;;  %v3138_v38 = vrot.slane %v12417_v40, 2  ;;  %v4291_v11 = vld [vmem:[%s14129_s1 + $0x38] sm:$0xff] }
 0x175   : > { %v2401_v55 = vor.u32 %v2400_v46, %v2397_v44  ;;  %v12425_v44 = vld [vmem:[#allocation2 + $0x20] sm:$0xff]  }
 0x176   : > { %v2410_v60 = vor.u32 %v2409_v52, %v2406_v24  ;;  %v3137_v32 = vrot.slane %v12415_v27, 2  ;;  %v3140_v24 = vrot.slane %v12425_v44, 2 }
 0x177   : > { %v2402_v4 = vsel %vm2250_vm13, %v2392_v53, %v2401_v55 }
 0x178   : > { %v2411_v10 = vsel %vm2250_vm13, %v2401_v55, %v2410_v60  ;;  %v3139_v46 = vsel %vm2697_vm14, %v3137_v32, %v3138_v38  ;;  %v3141_v52 = vsel %vm2697_vm14, %v3138_v38, %v3140_v24  ;;  %v12435_v55 = vld [vmem:[#allocation2 + $0x30] sm:$0xff]   ;;  %v3452_v32 = vshrl.u32 %v12415_v27, 16 }
 0x179   : > { %10094 = vmatmul.mubr.msk.bf16.gmra.mrb[12].mxu0 %vm1039_vm11, %v2330_v56  ;;  %v2413_v56 = vshrl.u32 %v12340_v49, 16  ;;  %v3455_v38 = vshll.u32 %v12415_v27, 16 }
 0x17a   : > { %10097 = vmatprep.mubr.msk.bf16.mxu0 %vm1039_vm11, %v2339_v63  ;;  %v2691_v63 = vld [vmem:[#allocation2 + $0x8] sm:$0xc]  ;;  %v3454_v27 = vrot.slane %v3452_v32, 2 }
 0x17b   : > { %v2415_v1 = vrot.slane %v2413_v56, 1  ;;  %v9086_v8 = vcombine.low %v2691_v63, %v12159_v22  ;;  %v2703_v22 = vrot.slane %v12177_v35, 2  ;;  %v2707_v35 = vrot.slane %v12189_v47, 2  ;;  %v12445_v63 = vld [vmem:[%s14130_s2 + $0x10] sm:$0x3] }
 0x17c   : > { %v2713_v47 = vrot.slane %v12213_v58, 2  ;;  %v2721_v58 = vrot.slane %v12233_v14, 2  ;;  %v2729_v14 = vrot.slane %v12253_v20, 2  ;;  %v2733_v20 = vrot.slane %v12340_v49, 2 }
 0x17d   : > { %v2419_v13 = vor.u32 %v2418_v7, %v2415_v1  ;;  %v2698_v15 = vrot.slane %v9086_v8, 2  ;;  %v2704_v59 = vsel %vm2697_vm14, %v2701_v28, %v2703_v22  ;;  %v2706_v25 = vsel %vm2697_vm14, %v2703_v22, %v2705_v29  ;;  %v12467_v22 = vld [vmem:[#allocation2 + $0x58] sm:$0xff]  }
 0x17e   : > { %v2708_v33 = vsel %vm2697_vm14, %v2705_v29, %v2707_v35  ;;  %v2710_v36 = vsel %vm2697_vm14, %v2707_v35, %v2709_v45  ;;  %v2714_v30 = vsel %vm2697_vm14, %v2711_v2, %v2713_v47  ;;  %v2724_v12 = vsel %vm2697_vm14, %v2721_v58, %v2723_v62  ;;  %v12477_v35 = vld [vmem:[#allocation2 + $0x68] sm:$0xff]   ;;  %v12484_v2 = vld [vmem:[#allocation2 + $0x70] sm:$0xff]   ;;  %v4288_v62 = vld [vmem:[%s14129_s1 + $0x20] sm:$0xff] }
 0x17f   : > { %v2700_v21 = vsel %vm2697_vm14, %v2698_v15, %v2699_v18  ;;  %v2730_v53 = vsel %vm2697_vm14, %v2727_v9, %v2729_v14  ;;  %v2732_v23 = vsel %vm2697_vm14, %v2729_v14, %v2731_v16  ;;  %v3676_v56 = vsel %vm270_vm0, %v12366_v48, 0  ;;  %v4290_v9 = vld [vmem:[%s14129_s1 + $0x30] sm:$0xff]  ;;  %v12524_v14 = vld [vmem:[#allocation2 + $0x98] sm:$0xff]  }
 0x181   : > { %10098 = vmatmul.mubr.msk.bf16.gmra.mrb[16].mxu0 %vm1039_vm11, %v2348_v19  ;;  %v2420_v19 = vsel %vm2250_vm13, %v2410_v60, %v2419_v13  ;;  %v12440_v60 = vld [vmem:[#allocation2 + $0x38] sm:$0xff]   ;;  %v12457_v13 = vld [vmem:[#allocation2 + $0x48] sm:$0xff]  }
 0x182   : > { %10101 = vmatprep.mubr.msk.bf16.mxu0 %vm1039_vm11, %v2357_v31  ;;  %v2702_v31 = vsel %vm2697_vm14, %v2699_v18, %v2701_v28  ;;  %v3146_v1 = vrot.slane %v12440_v60, 2  ;;  %v3150_v18 = vrot.slane %v12457_v13, 2 }
 0x189   : > { %10102 = vmatmul.mubr.msk.bf16.gmra.mrb[20].mxu0 %vm1039_vm11, %v2366_v5  ;;  %v2716_v5 = vsel %vm2697_vm14, %v2713_v47, %v2715_v39  ;;  %v4285_v47 = vld [vmem:[%s14129_s1 + $0x8] sm:$0xff]  ;;  %v4287_v39 = vld [vmem:[%s14129_s1 + $0x18] sm:$0xff] }
 0x18a   : > { %10105 = vmatprep.mubr.msk.bf16.mxu0 %vm1039_vm11, %v2375_v42  ;;  %v2722_v42 = vsel %vm2697_vm14, %v2719_v54, %v2721_v58  ;;  %4327 = vperm.xlu0 %11383, %v4285_v47   ;;  %v12500_v54 = vld [vmem:[#allocation2 + $0x80] sm:$0xff]   ;;  %v4286_v58 = vld [vmem:[%s14129_s1 + $0x10] sm:$0xff] }
 0x18b   : > { %4337 = vperm.xlu1 %11384, %v4287_v39  }
 0x18e   : > { %4332 = vperm.xlu0 %11383, %v4286_v58  }
 0x18f   : > { %4342 = vperm.xlu1 %11384, %v4288_v62   ;;  %v3487_v62 = vshrl.u32 %v12435_v55, 16 }
 0x191   : > { %10106 = vmatmul.mubr.msk.bf16.gmra.mrb[24].mxu0 %vm1039_vm11, %v2384_v41  ;;  %v2734_v41 = vsel %vm2697_vm14, %v2731_v16, %v2733_v20  ;;  %v3170_v20 = vrot.slane %v12524_v14, 2 }
 0x192   : > { %10109 = vmatprep.mubr.msk.bf16.mxu0 %vm1039_vm11, %v2393_v50  ;;  %v12428_v50 = vld [vmem:[#allocation2 + $0x28] sm:$0xff]   ;;  %4347 = vperm.xlu0 %11383, %v4289_v3   ;;  %v3496_v3 = vshrl.u32 %v12440_v60, 16 }
 0x193   : > { %v3142_v49 = vrot.slane %v12428_v50, 2  ;;  %4352 = vperm.xlu1 %11384, %v4290_v9   ;;  %v3499_v9 = vshll.u32 %v12440_v60, 16 }
 0x195   : > { %v3143_v57 = vsel %vm2697_vm14, %v3140_v24, %v3142_v49  ;;  %v4293_v24 = vld [vmem:[%s14129_s1 + $0x48] sm:$0xff] }
 0x196   : > { %4357 = vperm.xlu0 %11383, %v4291_v11  }
 0x199   : > { %10110 = vmatmul.mubr.msk.bf16.gmra.mrb[28].mxu0 %vm1039_vm11, %v2402_v4  ;;  %v3144_v4 = vrot.slane %v12435_v55, 2 }
 0x19a   : > { %10113 = vmatprep.mubr.msk.bf16.mxu0 %vm1039_vm11, %v2411_v10  ;;  %v12454_v10 = vld [vmem:[#allocation2 + $0x40] sm:$0xff]   ;;  %4367 = vperm.xlu0 %11383, %v4293_v24  }
 0x19b   : > { %v3145_v7 = vsel %vm2697_vm14, %v3142_v49, %v3144_v4  ;;  %v3147_v8 = vsel %vm2697_vm14, %v3144_v4, %v3146_v1  ;;  %v3148_v15 = vrot.slane %v12454_v10, 2  ;;  %v4294_v49 = vld [vmem:[%s14129_s1 + $0x50] sm:$0xff]  ;;  %v3457_v4 = vrot.slane %v3455_v38, 3  ;;  %v4304_v24 = vld [vmem:[%s14129_s1 + $0xa0] sm:$0xff] }
 0x19c   : > { %v3498_v38 = vrot.slane %v3496_v3, 2 }
 0x19d   : > { %v3151_v28 = vsel %vm2697_vm14, %v3148_v15, %v3150_v18 }
 0x1a1   : > { %10114 = vmatmul.mubr.msk.bf16.gmra.mrb[32].mxu0 %vm1039_vm11, %v2420_v19  ;;  %v3149_v19 = vsel %vm2697_vm14, %v3146_v1, %v3148_v15  ;;  %v4296_v15 = vld [vmem:[%s14129_s1 + $0x60] sm:$0xff] }
 0x1a2   : > { %10119 = vmatprep.mubr.msk.bf16.mxu0 %vm1039_vm11, %v2700_v21  ;;  %v12464_v21 = vld [vmem:[#allocation2 + $0x50] sm:$0xff]  }
 0x1a9   : > { %10120 = vmatmul.mubr.msk.bf16.vlgmr.msra.gmra.mrb[0].mxu0 %vm1039_vm11, %v2702_v31  ;;  %v3152_v31 = vrot.slane %v12464_v21, 2 }
 0x1aa   : > { %10156 = vmatpush3.bf16.msra.mxu0 %v3229_v61  ;;  %10123 = vmatprep.mubr.msk.bf16.mxu0 %vm1039_vm11, %v2704_v59  ;;  %v3154_v61 = vrot.slane %v12467_v22, 2 }
 0x1ab   : > { %11336 = vmatprep.subr.msk.bf16.mxu0 %vm270_vm0, %v12366_v48  ;;  %v3153_v59 = vsel %vm2697_vm14, %v3150_v18, %v3152_v31  ;;  %v12474_v48 = vld [vmem:[#allocation2 + $0x60] sm:$0xff]  }
 0x1ac   : > { %v3155_v29 = vsel %vm2697_vm14, %v3152_v31, %v3154_v61  ;;  %v3458_v31 = vor.u32 %v3457_v4, %v3454_v27  ;;  %v3517_v27 = vshll.u32 %v12457_v13, 16  ;;  %v4305_v4 = vld [vmem:[%s14129_s1 + $0xa8] sm:$0xff] }
 0x1b1   : > { %10124 = vmatmul.mubr.msk.bf16.gmra.mrb[4].mxu0 %vm1039_vm11, %v2706_v25  ;;  %v3156_v25 = vrot.slane %v12474_v48, 2 }
 0x1b2   : > { %10127 = vmatprep.mubr.msk.bf16.mxu0 %vm1039_vm11, %v2708_v33  ;;  %v3158_v33 = vrot.slane %v12477_v35, 2 }
 0x1b3   : > { %v3157_v45 = vsel %vm2697_vm14, %v3154_v61, %v3156_v25 }
 0x1b9   : > { %10128 = vmatmul.mubr.msk.bf16.gmra.mrb[8].mxu0 %vm1039_vm11, %v2710_v36  ;;  %v3159_v36 = vsel %vm2697_vm14, %v3156_v25, %v3158_v33  ;;  %v4297_v25 = vld [vmem:[%s14129_s1 + $0x68] sm:$0xff] }
 0x1ba   : > { %10131 = vmatprep.mubr.msk.bf16.mxu0 %vm1039_vm11, %v2712_v43  ;;  %v12487_v43 = vld [vmem:[#allocation2 + $0x78] sm:$0xff]  }
 0x1c1   : > { %10132 = vmatmul.mubr.msk.bf16.gmra.mrb[12].mxu0 %vm1039_vm11, %v2714_v30  ;;  %v3160_v30 = vrot.slane %v12484_v2, 2 }
 0x1c2   : > { %10135 = vmatprep.mubr.msk.bf16.mxu0 %vm1039_vm11, %v2716_v5  ;;  %v3162_v5 = vrot.slane %v12487_v43, 2 }
 0x1c3   : > { %v3161_v51 = vsel %vm2697_vm14, %v3158_v33, %v3160_v30  ;;  %v4298_v33 = vld [vmem:[%s14129_s1 + $0x70] sm:$0xff] }
 0x1c9   : > { %10136 = vmatmul.mubr.msk.bf16.gmra.mrb[16].mxu0 %vm1039_vm11, %v2718_v26  ;;  %v3163_v26 = vsel %vm2697_vm14, %v3160_v30, %v3162_v5 }
 0x1ca   : > { %10139 = vmatprep.mubr.msk.bf16.mxu0 %vm1039_vm11, %v2720_v37  ;;  %v12503_v37 = vld [vmem:[#allocation2 + $0x88] sm:$0xff]  }
 0x1d1   : > { %10140 = vmatmul.mubr.msk.bf16.gmra.mrb[20].mxu0 %vm1039_vm11, %v2722_v42  ;;  %v3164_v42 = vrot.slane %v12500_v54, 2 }
 0x1d2   : > { %10143 = vmatprep.mubr.msk.bf16.mxu0 %vm1039_vm11, %v2724_v12  ;;  %v3166_v12 = vrot.slane %v12503_v37, 2 }
 0x1d4   : > { %v3167_v16 = vsel %vm2697_vm14, %v3164_v42, %v3166_v12 }
 0x1d9   : > { %10144 = vmatmul.mubr.msk.bf16.gmra.mrb[24].mxu0 %vm1039_vm11, %v2726_v17  ;;  %v3165_v17 = vsel %vm2697_vm14, %v3162_v5, %v3164_v42  ;;  %v3490_v42 = vshll.u32 %v12435_v55, 16 }
 0x1da   : > { %10147 = vmatprep.mubr.msk.bf16.mxu0 %vm1039_vm11, %v2728_v6  ;;  %v12522_v6 = vld [vmem:[#allocation2 + $0x90] sm:$0xff]  }
 0x1e1   : > { %10148 = vmatmul.mubr.msk.bf16.gmra.mrb[28].mxu0 %vm1039_vm11, %v2730_v53  ;;  %v4292_v53 = vld [vmem:[%s14129_s1 + $0x40] sm:$0xff] }
 0x1e2   : > { %10151 = vmatprep.mubr.msk.bf16.mxu0 %vm1039_vm11, %v2732_v23  ;;  %v3168_v23 = vrot.slane %v12522_v6, 2  ;;  %4362 = vperm.xlu1 %11384, %v4292_v53   ;;  %v3489_v53 = vrot.slane %v3487_v62, 2 }
 0x1e6   : > { %4372 = vperm.xlu1 %11384, %v4294_v49  }
 0x1e9   : > { %10152 = vmatmul.mubr.msk.bf16.gmra.mrb[32].mxu0 %vm1039_vm11, %v2734_v41  ;;  %v3460_v41 = vshrl.u32 %v12417_v40, 16 }
 0x1ea   : > { %10157 = vmatprep.mubr.msk.bf16.mxu0 %vm1039_vm11, %v3139_v46  ;;  %v3463_v46 = vshll.u32 %v12417_v40, 16  ;;  %4382 = vperm.xlu1 %11384, %v4296_v15  }
 0x1eb   : > { %v3462_v1 = vrot.slane %v3460_v41, 2  ;;  %v3501_v41 = vrot.slane %v3499_v9, 3  ;;  %v3541_v9 = vshrl.u32 %v12474_v48, 16 }
 0x1ee   : > { %4392 = vperm.xlu1 %11384, %v4298_v33  }
 0x1f1   : > { %10158 = vmatmul.mubr.msk.bf16.vlgmr.msra.gmra.mrb[0].mxu0 %vm1039_vm11, %v3141_v52  ;;  %v3169_v52 = vsel %vm2697_vm14, %v3166_v12, %v3168_v23 }
 0x1f2   : > { %10194 = vmatpush3.bf16.msra.mxu0 %v3676_v56  ;;  %10161 = vmatprep.mubr.msk.bf16.mxu0 %vm1039_vm11, %v3143_v57  ;;  %v3171_v56 = vsel %vm2697_vm14, %v3168_v23, %v3170_v20  ;;  %v11442_v57 = vld [vmem:[#allocation2 + $0xa0] ss:$0 sps:$4 sm:$0x33]   ;;  %v3492_v23 = vrot.slane %v3490_v42, 3  ;;  %v4311_v42 = vld [vmem:[%s14129_s1 + $0xd8] sm:$0xff] }
 0x1f3   : > { %11337 = vmatprep.subr.msk.bf16.mxu0 %vm270_vm0, %v12445_v63  ;;  %v3172_v18 = vrot.slane %v11442_v57, 2  ;;  %v3514_v57 = vshrl.u32 %v12457_v13, 16 }
 0x1f4   : > { %v3493_v49 = vor.u32 %v3492_v23, %v3489_v53  ;;  %v3553_v53 = vshll.u32 %v12477_v35, 16  ;;  %v4313_v23 = vld [vmem:[%s14129_s1 + $0xe8] sm:$0xff] }
 0x1f9   : > { %10162 = vmatmul.mubr.msk.bf16.gmra.mrb[4].mxu0 %vm1039_vm11, %v3145_v7  ;;  %v3465_v7 = vrot.slane %v3463_v46, 3  ;;  %v4303_v46 = vld [vmem:[%s14129_s1 + $0x98] sm:$0xff] }
 0x1fa   : > { %10165 = vmatprep.mubr.msk.bf16.mxu0 %vm1039_vm11, %v3147_v8  ;;  %v4295_v8 = vld [vmem:[%s14129_s1 + $0x58] sm:$0xff] }
 0x1fb   : > { %4377 = vperm.xlu0 %11383, %v4295_v8   ;;  %v3466_v61 = vor.u32 %v3465_v7, %v3462_v1  ;;  %v4306_v1 = vld [vmem:[%s14129_s1 + $0xb0] sm:$0xff] }
 0x1fd   : > { %v3467_v39 = vsel %vm3450_vm15, %v3458_v31, %v3466_v61  ;;  %v4307_v31 = vld [vmem:[%s14129_s1 + $0xb8] sm:$0xff] }
 0x1ff   : > { %4387 = vperm.xlu0 %11383, %v4297_v25   ;;  %v3526_v25 = vshll.u32 %v12464_v21, 16 }
 0x201   : > { %10166 = vmatmul.mubr.msk.bf16.gmra.mrb[8].mxu0 %vm1039_vm11, %v3149_v19  ;;  %v3469_v19 = vshrl.u32 %v12425_v44, 16 }
 0x202   : > { %10169 = vmatprep.mubr.msk.bf16.mxu0 %vm1039_vm11, %v3151_v28  ;;  %v3472_v28 = vshll.u32 %v12425_v44, 16 }
 0x204   : > { %v3474_v47 = vrot.slane %v3472_v28, 3  ;;  %v3519_v28 = vrot.slane %v3517_v27, 3  ;;  %v3562_v27 = vshll.u32 %v12484_v2, 16 }
 0x209   : > { %10170 = vmatmul.mubr.msk.bf16.gmra.mrb[12].mxu0 %vm1039_vm11, %v3153_v59  ;;  %v3478_v59 = vshrl.u32 %v12428_v50, 16 }
 0x20a   : > { %10173 = vmatprep.mubr.msk.bf16.mxu0 %vm1039_vm11, %v3155_v29  ;;  %v3481_v29 = vshll.u32 %v12428_v50, 16 }
 0x20b   : > { %v3480_v30 = vrot.slane %v3478_v59, 2 }
 0x20c   : > { %v3483_v5 = vrot.slane %v3481_v29, 3  ;;  %v3523_v29 = vshrl.u32 %v12464_v21, 16 }
 0x20e   : > { %v3484_v12 = vor.u32 %v3483_v5, %v3480_v30  ;;  %v3525_v5 = vrot.slane %v3523_v29, 2  ;;  %v4284_v29 = vld [vmem:[%s14129_s1] sm:$0xff] }
 0x210   : > { %v3494_v7 = vsel %vm3450_vm15, %v3484_v12, %v3493_v49 }
 0x211   : > { %10174 = vmatmul.mubr.msk.bf16.gmra.mrb[16].mxu0 %vm1039_vm11, %v3157_v45  ;;  %v3173_v45 = vsel %vm2697_vm14, %v3170_v20, %v3172_v18  ;;  %v3990_v20 = vsel %vm270_vm0, %v12445_v63, 0  ;;  %v3505_v63 = vshrl.u32 %v12454_v10, 16  ;;  %vm275_vm0 = vcmask 1043457  }
 0x212   : > { %10177 = vmatprep.mubr.msk.bf16.mxu0 %vm1039_vm11, %v3159_v36  ;;  %v3471_v36 = vrot.slane %v3469_v19, 2  ;;  %v3516_v19 = vrot.slane %v3514_v57, 2  ;;  %v3559_v57 = vshrl.u32 %v12484_v2, 16  ;;  %vm12781_vm3 = vmand %vm275_vm0, %vm261_vm6 }
 0x213   : > { %v3507_v8 = vrot.slane %v3505_v63, 2  ;;  %v4315_v63 = vld [vmem:[%s14129_s1 + $0xf8] sm:$0xff] }
 0x214   : > { %v3475_v58 = vor.u32 %v3474_v47, %v3471_v36  ;;  %v3520_v33 = vor.u32 %v3519_v28, %v3516_v19  ;;  %v3535_v36 = vshll.u32 %v12467_v22, 16  ;;  %v4309_v47 = vld [vmem:[%s14129_s1 + $0xc8] sm:$0xff]  ;;  %v3561_v19 = vrot.slane %v3559_v57, 2 }
 0x215   : > { %v3564_v28 = vrot.slane %v3562_v27, 3 }
 0x216   : > { %v3476_v11 = vsel %vm3450_vm15, %v3466_v61, %v3475_v58  ;;  %v3485_v32 = vsel %vm3450_vm15, %v3475_v58, %v3484_v12  ;;  %v4308_v61 = vld [vmem:[%s14129_s1 + $0xc0] sm:$0xff]  ;;  %v3537_v62 = vrot.slane %v3535_v36, 3  ;;  %v3580_v36 = vshll.u32 %v12500_v54, 16 }
 0x217   : > { %v4312_v12 = vld [vmem:[%s14129_s1 + $0xe0] sm:$0xff] }
 0x219   : > { %10178 = vmatmul.mubr.msk.bf16.gmra.mrb[20].mxu0 %vm1039_vm11, %v3161_v51  ;;  %v4299_v51 = vld [vmem:[%s14129_s1 + $0x78] sm:$0xff] }
 0x21a   : > { %10181 = vmatprep.mubr.msk.bf16.mxu0 %vm1039_vm11, %v3163_v26  ;;  %v4300_v26 = vld [vmem:[%s14129_s1 + $0x80] sm:$0xff]  ;;  %4397 = vperm.xlu0 %11383, %v4299_v51   ;;  %v3528_v51 = vrot.slane %v3526_v25, 3  ;;  %v4319_v25 = vld [vmem:[%s14129_s1 + $0x118] sm:$0xff] }
 0x21b   : > { %4402 = vperm.xlu1 %11384, %v4300_v26  }
 0x21c   : > { %v3529_v3 = vor.u32 %v3528_v51, %v3525_v5 }
 0x221   : > { %10182 = vmatmul.mubr.msk.bf16.gmra.mrb[24].mxu0 %vm1039_vm11, %v3165_v17  ;;  %v4301_v17 = vld [vmem:[%s14129_s1 + $0x88] sm:$0xff] }
 0x222   : > { %10185 = vmatprep.mubr.msk.bf16.mxu0 %vm1039_vm11, %v3167_v16  ;;  %v4302_v16 = vld [vmem:[%s14129_s1 + $0x90] sm:$0xff]  ;;  %4407 = vperm.xlu0 %11383, %v4301_v17   ;;  %v3544_v17 = vshll.u32 %v12474_v48, 16 }
 0x223   : > { %4412 = vperm.xlu1 %11384, %v4302_v16  }
 0x226   : > { %4417 = vperm.xlu0 %11383, %v4303_v46  }
 0x227   : > { %4422 = vperm.xlu1 %11384, %v4304_v24  }
 0x229   : > { %10186 = vmatmul.mubr.msk.bf16.gmra.mrb[28].mxu0 %vm1039_vm11, %v3169_v52  ;;  %v3508_v52 = vshll.u32 %v12454_v10, 16 }
 0x22a   : > { %10189 = vmatprep.mubr.msk.bf16.mxu0 %vm1039_vm11, %v3171_v56  ;;  %v3502_v56 = vor.u32 %v3501_v41, %v3498_v38  ;;  %4427 = vperm.xlu0 %11383, %v4305_v4   ;;  %v3543_v38 = vrot.slane %v3541_v9, 2  ;;  %v3546_v41 = vrot.slane %v3544_v17, 3  ;;  %v3598_v9 = vshll.u32 %v12522_v6, 16 }
 0x22b   : > { %v3510_v15 = vrot.slane %v3508_v52, 3  ;;  %4432 = vperm.xlu1 %11384, %v4306_v1   ;;  %v4316_v52 = vld [vmem:[%s14129_s1 + $0x100] sm:$0xff]  ;;  %v3568_v1 = vshrl.u32 %v12487_v43, 16 }
 0x22c   : > { %v3503_v18 = vsel %vm3450_vm15, %v3493_v49, %v3502_v56  ;;  %v3555_v49 = vrot.slane %v3553_v53, 3 }
 0x22d   : > { %v3511_v59 = vor.u32 %v3510_v15, %v3507_v8  ;;  %v4317_v8 = vld [vmem:[%s14129_s1 + $0x108] sm:$0xff]  ;;  %v4318_v15 = vld [vmem:[%s14129_s1 + $0x110] sm:$0xff] }
 0x22e   : > { %4437 = vperm.xlu0 %11383, %v4307_v31  }
 0x22f   : > { %4442 = vperm.xlu1 %11384, %v4308_v61   ;;  %v3512_v30 = vsel %vm3450_vm15, %v3502_v56, %v3511_v59  ;;  %v3521_v26 = vsel %vm3450_vm15, %v3511_v59, %v3520_v33  ;;  %v3547_v56 = vor.u32 %v3546_v41, %v3543_v38  ;;  %v3570_v61 = vrot.slane %v3568_v1, 2 }
 0x231   : > { %10190 = vmatmul.mubr.msk.bf16.gmra.mrb[32].mxu0 %vm1039_vm11, %v3173_v45  ;;  %v3532_v45 = vshrl.u32 %v12467_v22, 16 }
 0x232   : > { %10195 = vmatprep.mubr.msk.bf16.mxu0 %vm1039_vm11, %v3467_v39  ;;  %v4310_v39 = vld [vmem:[%s14129_s1 + $0xd0] sm:$0xff]  ;;  %4447 = vperm.xlu0 %11383, %v4309_v47  }
 0x233   : > { %v3534_v58 = vrot.slane %v3532_v45, 2  ;;  %4452 = vperm.xlu1 %11384, %v4310_v39   ;;  %v3577_v45 = vshrl.u32 %v12500_v54, 16  ;;  %v3586_v39 = vshrl.u32 %v12503_v37, 16 }
 0x235   : > { %v3538_v16 = vor.u32 %v3537_v62, %v3534_v58  ;;  %v3579_v51 = vrot.slane %v3577_v45, 2  ;;  %v3588_v62 = vrot.slane %v3586_v39, 2 }
 0x236   : > { %4457 = vperm.xlu0 %11383, %v4311_v42  }
 0x237   : > { %4462 = vperm.xlu1 %11384, %v4312_v12   ;;  %v3539_v46 = vsel %vm3450_vm15, %v3529_v3, %v3538_v16 }
 0x239   : > { %10196 = vmatmul.mubr.msk.bf16.vlgmr.msra.gmra.mrb[0].mxu0 %vm1039_vm11, %v3476_v11  ;;  %v3550_v11 = vshrl.u32 %v12477_v35, 16 }
 0x23a   : > { %10232 = vmatpush3.bf16.msra.mxu0 %v3990_v20  ;;  %10199 = vmatprep.mubr.msk.bf16.mxu0 %vm1039_vm11, %v3485_v32  ;;  %v4314_v20 = vld [vmem:[%s14129_s1 + $0xf0] sm:$0xff]  ;;  %v3530_v32 = vsel %vm3450_vm15, %v3520_v33, %v3529_v3  ;;  %v3565_v33 = vor.u32 %v3564_v28, %v3561_v19  ;;  %v3595_v3 = vshrl.u32 %v12522_v6, 16 }
 0x23b   : > { %v3552_v24 = vrot.slane %v3550_v11, 2  ;;  %4467 = vperm.xlu0 %11383, %v4313_v23   ;;  %4472 = vperm.xlu1 %11384, %v4314_v20   ;;  %v3607_v11 = vshll.u32 %v12524_v14, 16  ;;  %v3600_v20 = vrot.slane %v3598_v9, 3 }
 0x23c   : > { %v3597_v23 = vrot.slane %v3595_v3, 2  ;;  %v272_v3 = vld [vmem:[#allocation3 + $0x8] sm:$0x3] }
 0x23d   : > { %v3556_v4 = vor.u32 %v3555_v49, %v3552_v24  ;;  %v273_v9 = vsel %vm12765_vm2, 0, %v272_v3 }
 0x23e   : > { %v3601_v24 = vor.u32 %v3600_v20, %v3597_v23  ;;  %274 = vst [vmem:[#allocation3 + $0x8] sm:$0x3] %v273_v9  ;;  %v277_v23 = vld [vmem:[#allocation3 + $0x98] sm:$0xe] }
 0x23f   : > { %4477 = vperm.xlu0 %11383, %v4315_v63   ;;  %4482 = vperm.xlu1 %11384, %v4316_v52   ;;  %v3557_v31 = vsel %vm3450_vm15, %v3547_v56, %v3556_v4  ;;  %v3566_v5 = vsel %vm3450_vm15, %v3556_v4, %v3565_v33  ;;  %v278_v20 = vsel %vm12781_vm3, 0, %v277_v23 }
 0x240   : > { %279 = vst [vmem:[#allocation3 + $0x98] sm:$0xe] %v278_v20 }
 0x241   : > { %10200 = vmatmul.mubr.msk.bf16.gmra.mrb[4].mxu0 %vm1039_vm11, %v3494_v7  ;;  %v3571_v7 = vshll.u32 %v12487_v43, 16 }
 0x242   : > { %10203 = vmatprep.mubr.msk.bf16.mxu0 %vm1039_vm11, %v3503_v18  ;;  %v3548_v18 = vsel %vm3450_vm15, %v3538_v16, %v3547_v56  ;;  %v3604_v16 = vshrl.u32 %v12524_v14, 16  ;;  %v3891_v56 = vld [vmem:[#allocation2 + $0x10] sm:$0x8] }
 0x243   : > { %v3573_v59 = vrot.slane %v3571_v7, 3  ;;  %4487 = vperm.xlu0 %11383, %v4317_v8   ;;  %4492 = vperm.xlu1 %11384, %v4318_v15   ;;  %v9164_v7 = vcombine.low %v3891_v56, %v12410_v0  ;;  %v3903_v0 = vrot.slane %v12428_v50, 3  ;;  %v3911_v50 = vrot.slane %v12457_v13, 3 }
 0x244   : > { %v3606_v41 = vrot.slane %v3604_v16, 2  ;;  %v3919_v13 = vrot.slane %v12477_v35, 3  ;;  %v3927_v35 = vrot.slane %v12503_v37, 3  ;;  %v11447_v16 = vld [vmem:[%s14132_s4 + $0x50] sm:$0xff]  }
 0x245   : > { %v3574_v47 = vor.u32 %v3573_v59, %v3570_v61  ;;  %v3898_v15 = vrot.slane %v9164_v7, 3 }
 0x247   : > { %4322 = vperm.xlu0 %11383, %v4284_v29   ;;  %4497 = vperm.xlu1 %11384, %v4319_v25   ;;  %v3575_v58 = vsel %vm3450_vm15, %v3565_v33, %v3574_v47  ;;  %v3907_v29 = vrot.slane %v12440_v60, 3  ;;  %v3915_v60 = vrot.slane %v12467_v22, 3  ;;  %v3923_v22 = vrot.slane %v12487_v43, 3 }
 0x248   : > { %v3931_v43 = vrot.slane %v12524_v14, 3 }
 0x249   : > { %10204 = vmatmul.mubr.msk.bf16.gmra.mrb[8].mxu0 %vm1039_vm11, %v3512_v30  ;;  %v3589_v30 = vshll.u32 %v12503_v37, 16 }
 0x24a   : > { %10207 = vmatprep.mubr.msk.bf16.mxu0 %vm1039_vm11, %v3521_v26  ;;  %v3582_v26 = vrot.slane %v3580_v36, 3 }
 0x24b   : > { %v3591_v42 = vrot.slane %v3589_v30, 3 }
 0x24c   : > { %v3583_v12 = vor.u32 %v3582_v26, %v3579_v51 }
 0x24d   : > { %v3592_v17 = vor.u32 %v3591_v42, %v3588_v62 }
 0x24e   : > { %v3584_v53 = vsel %vm3450_vm15, %v3574_v47, %v3583_v12 }
 0x24f   : > { %v3593_v38 = vsel %vm3450_vm15, %v3583_v12, %v3592_v17  ;;  %v3602_v57 = vsel %vm3450_vm15, %v3592_v17, %v3601_v24  ;;  %v11446_v17 = vld [vmem:[%s14132_s4 + $0x48] sm:$0xff]  }
 0x251   : > { %10208 = vmatmul.mubr.msk.bf16.gmra.mrb[12].mxu0 %vm1039_vm11, %v3530_v32  ;;  %v12692_v32 = vld [vmem:[#allocation2 + $0xa0] ss:$0 sps:$4 sm:$0x77]  }
 0x252   : > { %10211 = vmatprep.mubr.msk.bf16.mxu0 %vm1039_vm11, %v3539_v46  ;;  %v3609_v46 = vrot.slane %v3607_v11, 3  ;;  %v3613_v49 = vshrl.u32 %v12692_v32, 16  ;;  %v3616_v63 = vshll.u32 %v12692_v32, 16  ;;  %v11448_v11 = vld [vmem:[%s14132_s4 + $0x58] sm:$0xff]  }
 0x254   : > { %v3610_v52 = vor.u32 %v3609_v46, %v3606_v41  ;;  %v3615_v27 = vrot.slane %v3613_v49, 2  ;;  %v3618_v4 = vrot.slane %v3616_v63, 3  ;;  %v11450_v41 = vld [vmem:[%s14132_s4 + $0x68] sm:$0xff]   ;;  %v11452_v63 = vld [vmem:[%s14132_s4 + $0x78] sm:$0xff]  }
 0x256   : > { %v3611_v1 = vsel %vm3450_vm15, %v3601_v24, %v3610_v52  ;;  %v3619_v8 = vor.u32 %v3618_v4, %v3615_v27  ;;  %v11451_v24 = vld [vmem:[%s14132_s4 + $0x70] sm:$0xff]  }
 0x258   : > { %v3620_v19 = vsel %vm3450_vm15, %v3610_v52, %v3619_v8  ;;  %v12818_v8 = vld [vmem:[%s14132_s4] sm:$0xff]  }
 0x259   : > { %10212 = vmatmul.mubr.msk.bf16.gmra.mrb[16].mxu0 %vm1039_vm11, %v3548_v18  ;;  %v3899_v18 = vrot.slane %v12417_v40, 3  ;;  %v3905_v40 = vrot.slane %v12435_v55, 3  ;;  %v3913_v55 = vrot.slane %v12464_v21, 3  ;;  %v3921_v21 = vrot.slane %v12484_v2, 3 }
 0x25a   : > { %10215 = vmatprep.mubr.msk.bf16.mxu0 %vm1039_vm11, %v3557_v31  ;;  %v3901_v31 = vrot.slane %v12425_v44, 3  ;;  %v3909_v44 = vrot.slane %v12454_v10, 3  ;;  %v3917_v10 = vrot.slane %v12474_v48, 3  ;;  %v3925_v48 = vrot.slane %v12500_v54, 3 }
 0x25b   : > { %v3900_v28 = vsel %vm3897_vm1, %v3898_v15, %v3899_v18  ;;  %v3906_v25 = vsel %vm3897_vm1, %v3903_v0, %v3905_v40  ;;  %v3908_v33 = vsel %vm3897_vm1, %v3905_v40, %v3907_v29  ;;  %v3914_v47 = vsel %vm3897_vm1, %v3911_v50, %v3913_v55 }
 0x25c   : > { %v3902_v61 = vsel %vm3897_vm1, %v3899_v18, %v3901_v31  ;;  %v3904_v59 = vsel %vm3897_vm1, %v3901_v31, %v3903_v0  ;;  %v3910_v45 = vsel %vm3897_vm1, %v3907_v29, %v3909_v44  ;;  %v3912_v36 = vsel %vm3897_vm1, %v3909_v44, %v3911_v50 }
 0x25d   : > { %v3916_v39 = vsel %vm3897_vm1, %v3913_v55, %v3915_v60  ;;  %v3918_v30 = vsel %vm3897_vm1, %v3915_v60, %v3917_v10  ;;  %v3922_v51 = vsel %vm3897_vm1, %v3919_v13, %v3921_v21  ;;  %v3924_v26 = vsel %vm3897_vm1, %v3921_v21, %v3923_v22 }
 0x25e   : > { %v3928_v62 = vsel %vm3897_vm1, %v3925_v48, %v3927_v35  ;;  %v3929_v2 = vrot.slane %v12522_v6, 3  ;;  %v3933_v54 = vrot.slane %v12692_v32, 3  ;;  %v11445_v6 = vld [vmem:[%s14132_s4 + $0x40] sm:$0xff]  }
 0x25f   : > { %10269 = vmatprep.subr.bf16.mxu0 %v11445_v6  ;;  %10737 = vmatprep.subr.bf16.mxu1 %v11445_v6  ;;  %v11449_v32 = vld [vmem:[%s14132_s4 + $0x60] sm:$0xff]  }
 0x260   : > { %v3930_v42 = vsel %vm3897_vm1, %v3927_v35, %v3929_v2  ;;  %v3932_v12 = vsel %vm3897_vm1, %v3929_v2, %v3931_v43  ;;  %v3934_v37 = vsel %vm3897_vm1, %v3931_v43, %v3933_v54  ;;  %10745 = vmatpush3.bf16.msra.mxu1 %v11445_v6 }
 0x261   : > { %10216 = vmatmul.mubr.msk.bf16.gmra.mrb[20].mxu0 %vm1039_vm11, %v3566_v5  ;;  %v3920_v5 = vsel %vm3897_vm1, %v3917_v10, %v3919_v13  ;;  %10738 = vmatprep.subr.bf16.mxu1 %v11446_v17 }
 0x262   : > { %10219 = vmatprep.mubr.msk.bf16.mxu0 %vm1039_vm11, %v3575_v58  ;;  %v3926_v58 = vsel %vm3897_vm1, %v3923_v22, %v3925_v48 }
 0x264   : > { %10746 = vmatpush3.bf16.msra.mxu1 %v11446_v17 }
 0x265   : > { %10739 = vmatprep.subr.bf16.mxu1 %v11447_v16 }
 0x268   : > { %10747 = vmatpush3.bf16.msra.mxu1 %v11447_v16 }
 0x269   : > { %10220 = vmatmul.mubr.msk.bf16.gmra.mrb[24].mxu0 %vm1039_vm11, %v3584_v53  ;;  %10740 = vmatprep.subr.bf16.mxu1 %v11448_v11 }
 0x26a   : > { %10223 = vmatprep.mubr.msk.bf16.mxu0 %vm1039_vm11, %v3593_v38  ;;  %v4328_v38 = vpop.permute.xlu0 %4327 }
 0x26c   : > { %10748 = vmatpush3.bf16.msra.mxu1 %v11448_v11 }
 0x26d   : > { %10741 = vmatprep.subr.bf16.mxu1 %v11449_v32 }
 0x26e   : > { %v4333_v46 = vpop.permute.xlu0 %4332 }
 0x270   : > { %10749 = vmatpush3.bf16.msra.mxu1 %v11449_v32 }
 0x271   : > { %10224 = vmatmul.mubr.msk.bf16.gmra.mrb[28].mxu0 %vm1039_vm11, %v3602_v57  ;;  %10742 = vmatprep.subr.bf16.mxu1 %v11450_v41 }
 0x272   : > { %10227 = vmatprep.mubr.msk.bf16.mxu0 %vm1039_vm11, %v3611_v1  ;;  %v12796_v49 = vpop.permute.xlu0 %4347 }
 0x274   : > { %10750 = vmatpush3.bf16.msra.mxu1 %v11450_v41 }
 0x275   : > { %10743 = vmatprep.subr.bf16.mxu1 %v11451_v24 }
 0x276   : > { %v12801_v52 = vpop.permute.xlu0 %4357 }
 0x278   : > { %10751 = vmatpush3.bf16.msra.mxu1 %v11451_v24 }
 0x279   : > { %10228 = vmatmul.mubr.msk.bf16.gmra.mrb[32].mxu0 %vm1039_vm11, %v3620_v19  ;;  %10744 = vmatprep.subr.bf16.mxu1 %v11452_v63 }
 0x27a   : > { %10233 = vmatprep.mubr.msk.bf16.mxu0 %vm1039_vm11, %v3900_v28  ;;  %v12803_v56 = vpop.permute.xlu0 %4367 }
 0x27c   : > { %10752 = vmatpush3.bf16.msra.mxu1 %v11452_v63 }
 0x27d   : > { %10321 = vmatprep.subr.bf16.mxu1 %v12818_v8 }
 0x27e   : > { %v12805_v57 = vpop.permute.xlu0 %4377 }
 0x281   : > { %10234 = vmatmul.mubr.msk.bf16.vlgmr.msra.gmra.mrb[0].mxu0 %vm1039_vm11, %v3902_v61  ;;  %v5081_v61 = vld [vmem:[#allocation3] sm:$0xf] }
 0x282   : > { %10237 = vmatprep.mubr.msk.bf16.mxu0 %vm1039_vm11, %v3904_v59  ;;  %10270 = vmatpush3.bf16.msra.mxu0 %v11445_v6  ;;  %v12807_v27 = vpop.permute.xlu0 %4387  ;;  %v5082_v59 = vld [vmem:[#allocation3 + $0x4] sm:$0xf] }
 0x283   : > { %10271 = vmatprep.subr.bf16.mxu0 %v11446_v17  ;;  %v12833_v40 = vcombine.low %v5081_v61, %v5082_v59 }
 0x285   : > { %v5247_v50 = vshll.u32 %v12833_v40, 16  ;;  %v5245_v22 = vshrl.u32 %v12833_v40, 16 }
 0x286   : > { %10272 = vmatpush3.bf16.msra.mxu0 %v11446_v17 }
 0x287   : > { %10273 = vmatprep.subr.bf16.mxu0 %v11447_v16 }
 0x289   : > { %10238 = vmatmul.mubr.msk.bf16.gmra.mrb[4].mxu0 %vm1039_vm11, %v3906_v25  ;;  %v4338_v25 = vpop.permute.xlu1 %4337 }
 0x28a   : > { %10241 = vmatprep.mubr.msk.bf16.mxu0 %vm1039_vm11, %v3908_v33  ;;  %10274 = vmatpush3.bf16.msra.mxu0 %v11447_v16  ;;  %v12840_v33 = vld [vmem:[%s14131_s3] ss:$0 sm:$0xff] }
 0x28b   : > { %10275 = vmatprep.subr.bf16.mxu0 %v11448_v11 }
 0x28e   : > { %10276 = vmatpush3.bf16.msra.mxu0 %v11448_v11 }
 0x28f   : > { %10277 = vmatprep.subr.bf16.mxu0 %v11449_v32 }
 0x291   : > { %10242 = vmatmul.mubr.msk.bf16.gmra.mrb[8].mxu0 %vm1039_vm11, %v3910_v45 }
 0x292   : > { %10245 = vmatprep.mubr.msk.bf16.mxu0 %vm1039_vm11, %v3912_v36  ;;  %10278 = vmatpush3.bf16.msra.mxu0 %v11449_v32 }
 0x293   : > { %10279 = vmatprep.subr.bf16.mxu0 %v11450_v41 }
 0x296   : > { %10280 = vmatpush3.bf16.msra.mxu0 %v11450_v41 }
 0x297   : > { %10281 = vmatprep.subr.bf16.mxu0 %v11451_v24 }
 0x299   : > { %10246 = vmatmul.mubr.msk.bf16.gmra.mrb[12].mxu0 %vm1039_vm11, %v3914_v47  ;;  %v12809_v4 = vpop.permute.xlu0 %4397 }
 0x29a   : > { %10249 = vmatprep.mubr.msk.bf16.mxu0 %vm1039_vm11, %v3916_v39  ;;  %10282 = vmatpush3.bf16.msra.mxu0 %v11451_v24 }
 0x29b   : > { %10283 = vmatprep.subr.bf16.mxu0 %v11452_v63 }
 0x29e   : > { %10284 = vmatpush3.bf16.msra.mxu0 %v11452_v63 }
 0x2a1   : > { %10250 = vmatmul.mubr.msk.bf16.gmra.mrb[16].mxu0 %vm1039_vm11, %v3918_v30  ;;  %v12811_v1 = vpop.permute.xlu0 %4407  ;;  %v4343_v30 = vpop.permute.xlu1 %4342 }
 0x2a2   : > { %10253 = vmatprep.mubr.msk.bf16.mxu0 %vm1039_vm11, %v3920_v5 }
 0x2a5   : > { %v12813_v7 = vpop.permute.xlu0 %4417  ;;  %v4353_v16 = vpop.permute.xlu1 %4352 }
 0x2a9   : > { %10254 = vmatmul.mubr.msk.bf16.gmra.mrb[20].mxu0 %vm1039_vm11, %v3922_v51  ;;  %v12821_v15 = vpop.permute.xlu0 %4427  ;;  %v5249_v51 = vrot.slane %v5247_v50, 1 }
 0x2aa   : > { %10257 = vmatprep.mubr.msk.bf16.mxu0 %vm1039_vm11, %v3924_v26 }
 0x2ab   : > { %v12848_v54 = vor.u32 %v5249_v51, %v5245_v22 }
 0x2ad   : > { %v12823_v18 = vpop.permute.xlu0 %4437 }
 0x2b1   : > { %10258 = vmatmul.mubr.msk.bf16.gmra.mrb[24].mxu0 %vm1039_vm11, %v3926_v58  ;;  %v12825_v19 = vpop.permute.xlu0 %4447 }
 0x2b2   : > { %10261 = vmatprep.mubr.msk.bf16.mxu0 %vm1039_vm11, %v3928_v62 }
 0x2b5   : > { %v12827_v28 = vpop.permute.xlu0 %4457 }
 0x2b9   : > { %10262 = vmatmul.mubr.msk.bf16.gmra.mrb[28].mxu0 %vm1039_vm11, %v3930_v42 }
 0x2ba   : > { %10265 = vmatprep.mubr.msk.bf16.mxu0 %vm1039_vm11, %v3932_v12  ;;  %v12829_v31 = vpop.permute.xlu0 %4467 }
 0x2be   : > { %v12831_v0 = vpop.permute.xlu0 %4477 }
 0x2c1   : > { %10266 = vmatmul.mubr.msk.bf16.gmra.mrb[32].mxu0 %vm1039_vm11, %v3934_v37 }
 0x2c2   : > { %v12835_v29 = vpop.permute.xlu0 %4487 }
 0x2c6   : > { %v4323_v13 = vpop.permute.xlu0 %4322 }
 0x354   : > { %v10235_v44 = vpop.f32.mrb[0].mxu0 }
 0x355   : > { %v4214_v45 = vadd.f32 %v10235_v44, %v12840_v33  ;;  %v4026_v36 = vpop.f32.mrb[1].mxu0 }
 0x356   : > { %v4212_v55 = vadd.f32 %v12840_v33, %v4026_v36  ;;  %v10236_v60 = vpop.f32.mrb[2].mxu0 }
 0x357   : > { %v4250_v47 = vmax.f32 %v4214_v45, 0.0  ;;  %v4215_v39 = vadd.f32 %v10236_v60, %v12840_v33  ;;  %v4029_v10 = vpop.f32.mrb[3].mxu0  ;;  %v5040_v60 = vld [vmem:[#allocation3 + $0x8] sm:$0xe] }
 0x358   : > { %v4248_v5 = vmax.f32 %v4212_v55, 0.0  ;;  %v4213_v21 = vadd.f32 %v12840_v33, %v4029_v10 }
 0x359   : > { %v4502_v26 = vmul.f32 %v4333_v46, %v4250_v47  ;;  %v4251_v48 = vmax.f32 %v4215_v39, 0.0 }
 0x35a   : > { %v4249_v35 = vmax.f32 %v4213_v21, 0.0  ;;  %v4500_v58 = vmul.f32 %v4323_v13, %v4248_v5 }
 0x35b   : > { %v9488_v62 = vpack.c.bf16 %v4502_v26, %v4502_v26  ;;  %v4503_v2 = vmul.f32 %v4338_v25, %v4251_v48  ;;  %v4363_v48 = vpop.permute.xlu1 %4362 }
 0x35c   : > { %v4501_v43 = vmul.f32 %v4328_v38, %v4249_v35  ;;  %v9486_v42 = vpack.c.bf16 %v4500_v58, %v4500_v58  ;;  %v10239_v12 = vpop.f32.mrb[4].mxu0 }
 0x35d   : > { %v4664_v37 = vshrl.u32 %v9488_v62, 16  ;;  %v4667_v6 = vshll.u32 %v9488_v62, 16  ;;  %v9489_v3 = vpack.c.bf16 %v4503_v2, %v4503_v2  ;;  %v4218_v9 = vadd.f32 %v10239_v12, %v12840_v33  ;;  %v4042_v17 = vpop.f32.mrb[5].mxu0 }
 0x35e   : > { %v9487_v11 = vpack.c.bf16 %v4501_v43, %v4501_v43  ;;  %v4645_v23 = vshrl.u32 %v9486_v42, 16  ;;  %v4648_v20 = vshll.u32 %v9486_v42, 16  ;;  %v4216_v32 = vadd.f32 %v12840_v33, %v4042_v17  ;;  %v10240_v41 = vpop.f32.mrb[6].mxu0 }
 0x35f   : > { %v4666_v46 = vrot.slane %v4664_v37, 6  ;;  %v4669_v24 = vrot.slane %v4667_v6, 7  ;;  %v4674_v38 = vshrl.u32 %v9489_v3, 16  ;;  %v4677_v63 = vshll.u32 %v9489_v3, 16  ;;  %v4045_v61 = vpop.f32.mrb[7].mxu0 }
 0x360   : > { %v4654_v59 = vshrl.u32 %v9487_v11, 16  ;;  %v4657_v25 = vshll.u32 %v9487_v11, 16  ;;  %v4647_v44 = vrot.slane %v4645_v23, 6  ;;  %v4650_v50 = vrot.slane %v4648_v20, 7 }
 0x361   : > { %v4670_v45 = vor.u32 %v4669_v24, %v4666_v46  ;;  %v4676_v36 = vrot.slane %v4674_v38, 6  ;;  %v4679_v55 = vrot.slane %v4677_v63, 7  ;;  %v4254_v47 = vmax.f32 %v4218_v9, 0.0 }
 0x362   : > { %v4656_v39 = vrot.slane %v4654_v59, 6  ;;  %v4659_v10 = vrot.slane %v4657_v25, 7  ;;  %v4651_v13 = vor.u32 %v4650_v50, %v4647_v44  ;;  %v4252_v5 = vmax.f32 %v4216_v32, 0.0  ;;  %v4373_v50 = vpop.permute.xlu1 %4372 }
 0x363   : > { %v4672_v21 = vrot.slane %v4670_v45, 4  ;;  %v4680_v22 = vor.u32 %v4679_v55, %v4676_v36  ;;  %v4506_v51 = vmul.f32 %v4353_v16, %v4254_v47  ;;  %v4219_v26 = vadd.f32 %v10240_v41, %v12840_v33 }
 0x364   : > { %v4660_v35 = vor.u32 %v4659_v10, %v4656_v39  ;;  %v4652_v58 = vrot.slane %v4651_v13, 4  ;;  %v5041_v62 = vsel %vm12781_vm3, %v4651_v13, %v5040_v60  ;;  %v4504_v2 = vmul.f32 %v4343_v30, %v4252_v5  ;;  %v10243_v43 = vpop.f32.mrb[8].mxu0 }
 0x365   : > { %v4681_v42 = vsel %vm11799_vm9, %v4672_v21, %v4680_v22  ;;  %v4682_v12 = vrot.slane %v4680_v22, 4  ;;  %5042 = vst [vmem:[#allocation3 + $0x8] sm:$0xe] %v5041_v62  ;;  %v9492_v37 = vpack.c.bf16 %v4506_v51, %v4506_v51  ;;  %v4255_v6 = vmax.f32 %v4219_v26, 0.0  ;;  %v4058_v3 = vpop.f32.mrb[9].mxu0 }
 0x366   : > { %5045 = vst [vmem:[#allocation3 + $0x14] sm:$0xf] %v4681_v42  ;;  %v4662_v9 = vrot.slane %v4660_v35, 4  ;;  %v4661_v17 = vsel %vm11799_vm9, %v4652_v58, %v4660_v35  ;;  %v9490_v16 = vpack.c.bf16 %v4504_v2, %v4504_v2  ;;  %v4217_v11 = vadd.f32 %v12840_v33, %v4045_v61  ;;  %v10244_v53 = vpop.f32.mrb[10].mxu0 }
 0x367   : > { %5043 = vst [vmem:[#allocation3 + $0xc] sm:$0xf] %v4661_v17  ;;  %v4704_v30 = vshrl.u32 %v9492_v37, 16  ;;  %v4707_v23 = vshll.u32 %v9492_v37, 16  ;;  %v4507_v20 = vmul.f32 %v12801_v52, %v4255_v6  ;;  %v4222_v32 = vadd.f32 %v10243_v43, %v12840_v33  ;;  %v4061_v41 = vpop.f32.mrb[11].mxu0 }
 0x368   : > { %v4671_v46 = vsel %vm11799_vm9, %v4662_v9, %v4670_v45  ;;  %v4684_v24 = vshrl.u32 %v9490_v16, 16  ;;  %v4687_v38 = vshll.u32 %v9490_v16, 16  ;;  %v4253_v63 = vmax.f32 %v4217_v11, 0.0 }
 0x369   : > { %5044 = vst [vmem:[#allocation3 + $0x10] sm:$0xf] %v4671_v46  ;;  %v4706_v59 = vrot.slane %v4704_v30, 6  ;;  %v4709_v25 = vrot.slane %v4707_v23, 7  ;;  %v9493_v44 = vpack.c.bf16 %v4507_v20, %v4507_v20  ;;  %v4258_v61 = vmax.f32 %v4222_v32, 0.0 }
 0x36a   : > { %v4686_v36 = vrot.slane %v4684_v24, 6  ;;  %v4689_v55 = vrot.slane %v4687_v38, 7  ;;  %v4505_v60 = vmul.f32 %v12796_v49, %v4253_v63  ;;  %v4220_v52 = vadd.f32 %v12840_v33, %v4058_v3 }
 0x36b   : > { %v4710_v47 = vor.u32 %v4709_v25, %v4706_v59  ;;  %v4714_v39 = vshrl.u32 %v9493_v44, 16  ;;  %v4717_v10 = vshll.u32 %v9493_v44, 16  ;;  %v4510_v13 = vmul.f32 %v4373_v50, %v4258_v61 }
 0x36c   : > { %v4690_v45 = vor.u32 %v4689_v55, %v4686_v36  ;;  %v9491_v5 = vpack.c.bf16 %v4505_v60, %v4505_v60  ;;  %v4256_v21 = vmax.f32 %v4220_v52, 0.0  ;;  %v4223_v22 = vadd.f32 %v10244_v53, %v12840_v33  ;;  %v10247_v51 = vpop.f32.mrb[12].mxu0  ;;  %v4383_v53 = vpop.permute.xlu1 %4382 }
 0x36d   : > { %v4712_v26 = vrot.slane %v4710_v47, 4  ;;  %v4716_v35 = vrot.slane %v4714_v39, 6  ;;  %v4719_v58 = vrot.slane %v4717_v10, 7  ;;  %v9496_v62 = vpack.c.bf16 %v4510_v13, %v4510_v13  ;;  %v4074_v2 = vpop.f32.mrb[13].mxu0 }
 0x36e   : > { %v4691_v49 = vsel %vm11799_vm9, %v4682_v12, %v4690_v45  ;;  %v4692_v43 = vrot.slane %v4690_v45, 4  ;;  %v4694_v42 = vshrl.u32 %v9491_v5, 16  ;;  %v4697_v37 = vshll.u32 %v9491_v5, 16  ;;  %v10248_v6 = vpop.f32.mrb[14].mxu0 }
 0x36f   : > { %5046 = vst [vmem:[#allocation3 + $0x18] sm:$0xf] %v4691_v49  ;;  %v4720_v3 = vor.u32 %v4719_v58, %v4716_v35  ;;  %v4744_v9 = vshrl.u32 %v9496_v62, 16  ;;  %v4747_v17 = vshll.u32 %v9496_v62, 16  ;;  %v4508_v16 = vmul.f32 %v4363_v48, %v4256_v21  ;;  %v4077_v11 = vpop.f32.mrb[15].mxu0 }
 0x370   : > { %v4696_v30 = vrot.slane %v4694_v42, 6  ;;  %v4699_v23 = vrot.slane %v4697_v37, 7  ;;  %v4259_v20 = vmax.f32 %v4223_v22, 0.0  ;;  %v4221_v32 = vadd.f32 %v12840_v33, %v4061_v41  ;;  %v4393_v21 = vpop.permute.xlu1 %4392 }
 0x371   : > { %v4721_v46 = vsel %vm11799_vm9, %v4712_v26, %v4720_v3  ;;  %v4722_v12 = vrot.slane %v4720_v3, 4  ;;  %v4746_v24 = vrot.slane %v4744_v9, 6  ;;  %v4749_v38 = vrot.slane %v4747_v17, 7 }
 0x372   : > { %5049 = vst [vmem:[#allocation3 + $0x24] sm:$0xf] %v4721_v46  ;;  %v4700_v63 = vor.u32 %v4699_v23, %v4696_v30  ;;  %v9494_v59 = vpack.c.bf16 %v4508_v16, %v4508_v16  ;;  %v4511_v25 = vmul.f32 %v12805_v57, %v4259_v20  ;;  %v4257_v44 = vmax.f32 %v4221_v32, 0.0 }
 0x373   : > { %v12873_v48 = vor.u32 %v4749_v38, %v4746_v24  ;;  %v4226_v61 = vadd.f32 %v10247_v51, %v12840_v33  ;;  %v4224_v50 = vadd.f32 %v12840_v33, %v4074_v2  ;;  %v4227_v41 = vadd.f32 %v10248_v6, %v12840_v33 }
 0x374   : > { %v4701_v36 = vsel %vm11799_vm9, %v4692_v43, %v4700_v63  ;;  %v4702_v55 = vrot.slane %v4700_v63, 4  ;;  %v4724_v60 = vshrl.u32 %v9494_v59, 16  ;;  %v4727_v52 = vshll.u32 %v9494_v59, 16  ;;  %v10251_v39 = vpop.f32.mrb[16].mxu0 }
 0x375   : > { %5047 = vst [vmem:[#allocation3 + $0x1c] sm:$0xf] %v4701_v36  ;;  %v4752_v10 = vrot.slane %v12873_v48, 4  ;;  %v9497_v57 = vpack.c.bf16 %v4511_v25, %v4511_v25  ;;  %v4509_v13 = vmul.f32 %v12803_v56, %v4257_v44  ;;  %v4262_v45 = vmax.f32 %v4226_v61, 0.0  ;;  %v4090_v5 = vpop.f32.mrb[17].mxu0 }
 0x376   : > { %v4711_v22 = vsel %vm11799_vm9, %v4702_v55, %v4710_v47  ;;  %v4726_v51 = vrot.slane %v4724_v60, 6  ;;  %v4729_v26 = vrot.slane %v4727_v52, 7  ;;  %v4260_v35 = vmax.f32 %v4224_v50, 0.0  ;;  %v12884_v58 = vpop.f32.mrb[18].mxu0  ;;  %v4403_v55 = vpop.permute.xlu1 %4402 }
 0x377   : > { %5048 = vst [vmem:[#allocation3 + $0x20] sm:$0xf] %v4711_v22  ;;  %v4754_v62 = vshrl.u32 %v9497_v57, 16  ;;  %v4757_v2 = vshll.u32 %v9497_v57, 16  ;;  %v9495_v49 = vpack.c.bf16 %v4509_v13, %v4509_v13  ;;  %v4514_v43 = vmul.f32 %v4393_v21, %v4262_v45  ;;  %v12886_v42 = vpop.f32.mrb[19].mxu0 }
 0x378   : > { %v4730_v37 = vor.u32 %v4729_v26, %v4726_v51  ;;  %v4512_v56 = vmul.f32 %v4383_v53, %v4260_v35  ;;  %v4263_v6 = vmax.f32 %v4227_v41, 0.0  ;;  %v4225_v3 = vadd.f32 %v12840_v33, %v4077_v11 }
 0x379   : > { %v4756_v9 = vrot.slane %v4754_v62, 6  ;;  %v4759_v17 = vrot.slane %v4757_v2, 7  ;;  %v4734_v47 = vshrl.u32 %v9495_v49, 16  ;;  %v4737_v16 = vshll.u32 %v9495_v49, 16  ;;  %v11454_v49 = vld [vmem:[#allocation3 + $0x8] sm:$0xff]  }
 0x37a   : > { %v4731_v30 = vsel %vm11799_vm9, %v4722_v12, %v4730_v37  ;;  %v4732_v23 = vrot.slane %v4730_v37, 4  ;;  %v9500_v20 = vpack.c.bf16 %v4514_v43, %v4514_v43  ;;  %v9498_v32 = vpack.c.bf16 %v4512_v56, %v4512_v56 }
 0x37b   : > { %5050 = vst [vmem:[#allocation3 + $0x28] sm:$0xf] %v4731_v30  ;;  %v4760_v46 = vor.u32 %v4759_v17, %v4756_v9  ;;  %v4736_v24 = vrot.slane %v4734_v47, 6  ;;  %v4739_v38 = vrot.slane %v4737_v16, 7  ;;  %v4515_v63 = vmul.f32 %v12809_v4, %v4263_v6 }
 0x37c   : > { %v4784_v53 = vshrl.u32 %v9500_v20, 16  ;;  %v4787_v59 = vshll.u32 %v9500_v20, 16  ;;  %v4764_v25 = vshrl.u32 %v9498_v32, 16  ;;  %v4767_v11 = vshll.u32 %v9498_v32, 16  ;;  %v12892_v44 = vpop.f32.mrb[20].mxu0 }
 0x37d   : > { %v4761_v61 = vsel %vm11799_vm9, %v4752_v10, %v4760_v46  ;;  %v4762_v50 = vrot.slane %v4760_v46, 4  ;;  %v4740_v12 = vor.u32 %v4739_v38, %v4736_v24  ;;  %v9501_v41 = vpack.c.bf16 %v4515_v63, %v4515_v63  ;;  %v12896_v36 = vpop.f32.mrb[21].mxu0 }
 0x37e   : > { %5053 = vst [vmem:[#allocation3 + $0x34] sm:$0xf] %v4761_v61  ;;  %v4786_v60 = vrot.slane %v4784_v53, 6  ;;  %v4789_v52 = vrot.slane %v4787_v59, 7  ;;  %v4766_v57 = vrot.slane %v4764_v25, 6  ;;  %v4769_v4 = vrot.slane %v4767_v11, 7 }
 0x37f   : > { %v12898_v13 = vpop.f32.mrb[22].mxu0  ;;  %v4741_v45 = vsel %vm11799_vm9, %v4732_v23, %v4740_v12  ;;  %v4742_v21 = vrot.slane %v4740_v12, 4  ;;  %v4794_v22 = vshrl.u32 %v9501_v41, 16  ;;  %v4797_v51 = vshll.u32 %v9501_v41, 16  ;;  %v12919_v23 = vld [vmem:[#allocation3 + $0x10] sm:$0xff]  }
 0x380   : > { %v12902_v10 = vpop.f32.mrb[23].mxu0  ;;  %5051 = vst [vmem:[#allocation3 + $0x2c] sm:$0xf] %v4741_v45  ;;  %v12904_v26 = vor.u32 %v4789_v52, %v4786_v60  ;;  %v4770_v35 = vor.u32 %v4769_v4, %v4766_v57  ;;  %v4261_v62 = vmax.f32 %v4225_v3, 0.0  ;;  %v4230_v2 = vadd.f32 %v10251_v39, %v12840_v33 }
 0x381   : > { %v4751_v43 = vsel %vm11799_vm9, %v4742_v21, %v12873_v48  ;;  %v4796_v37 = vrot.slane %v4794_v22, 6  ;;  %v4799_v56 = vrot.slane %v4797_v51, 7  ;;  %v4228_v6 = vadd.f32 %v12840_v33, %v4090_v5  ;;  %v4413_v5 = vpop.permute.xlu1 %4412 }
 0x382   : > { %5052 = vst [vmem:[#allocation3 + $0x30] sm:$0xf] %v4751_v43  ;;  %v4792_v9 = vrot.slane %v12904_v26, 4  ;;  %v4771_v17 = vsel %vm11799_vm9, %v4762_v50, %v4770_v35  ;;  %v4772_v47 = vrot.slane %v4770_v35, 4  ;;  %v4513_v3 = vmul.f32 %v12807_v27, %v4261_v62 }
 0x383   : > { %5054 = vst [vmem:[#allocation3 + $0x38] sm:$0xf] %v4771_v17  ;;  %v12915_v39 = vor.u32 %v4799_v56, %v4796_v37  ;;  %v4266_v16 = vmax.f32 %v4230_v2, 0.0  ;;  %v4264_v30 = vmax.f32 %v4228_v6, 0.0  ;;  %v4231_v48 = vadd.f32 %v12884_v58, %v12840_v33 }
 0x384   : > { %v9499_v20 = vpack.c.bf16 %v4513_v3, %v4513_v3  ;;  %v5252_v32 = vshll.u32 %v11454_v49, 16  ;;  %v5256_v46 = vshrl.u32 %v11454_v49, 16  ;;  %v4229_v24 = vadd.f32 %v12840_v33, %v12886_v42  ;;  %v12923_v38 = vpop.f32.mrb[24].mxu0 }
 0x385   : > { %v4801_v27 = vsel %vm11799_vm9, %v4792_v9, %v12915_v39  ;;  %v4802_v63 = vrot.slane %v12915_v39, 4  ;;  %v4518_v53 = vmul.f32 %v4413_v5, %v4266_v16  ;;  %v4516_v59 = vmul.f32 %v4403_v55, %v4264_v30  ;;  %v12929_v58 = vpop.f32.mrb[25].mxu0  ;;  %v4423_v56 = vpop.permute.xlu1 %4422 }
 0x386   : > { %5057 = vst [vmem:[#allocation3 + $0x44] sm:$0xf] %v4801_v27  ;;  %v4774_v25 = vshrl.u32 %v9499_v20, 16  ;;  %v4777_v11 = vshll.u32 %v9499_v20, 16  ;;  %v4267_v61 = vmax.f32 %v4231_v48, 0.0  ;;  %v5254_v50 = vrot.slane %v5252_v32, 1 }
 0x387   : > { %v12931_v12 = vpop.f32.mrb[26].mxu0  ;;  %v9504_v42 = vpack.c.bf16 %v4518_v53, %v4518_v53  ;;  %v9502_v41 = vpack.c.bf16 %v4516_v59, %v4516_v59  ;;  %v4265_v60 = vmax.f32 %v4229_v24, 0.0  ;;  %v5260_v52 = vshll.u32 %v12919_v23, 16  ;;  %v11456_v53 = vld [vmem:[#allocation3 + $0x18] sm:$0xff]  }
 0x388   : > { %v12934_v57 = vpop.f32.mrb[27].mxu0  ;;  %v4776_v4 = vrot.slane %v4774_v25, 6  ;;  %v4779_v45 = vrot.slane %v4777_v11, 7  ;;  %v4519_v55 = vmul.f32 %v12813_v7, %v4267_v61  ;;  %v5255_v21 = vsel %vm890_vm10, %v12848_v54, %v5254_v50 }
 0x389   : > { %v4824_v22 = vshrl.u32 %v9504_v42, 16  ;;  %v4827_v51 = vshll.u32 %v9504_v42, 16  ;;  %v4804_v35 = vshrl.u32 %v9502_v41, 16  ;;  %v4807_v62 = vshll.u32 %v9502_v41, 16  ;;  %10285 = vmatprep.mubr.bf16.mxu0 %v5255_v21 }
 0x38a   : > { %v4780_v2 = vor.u32 %v4779_v45, %v4776_v4  ;;  %v9505_v49 = vpack.c.bf16 %v4519_v55, %v4519_v55  ;;  %v5258_v43 = vor.u32 %v5256_v46, %v5254_v50  ;;  %v4517_v37 = vmul.f32 %v12811_v1, %v4265_v60  ;;  %v4433_v4 = vpop.permute.xlu1 %4432 }
 0x38b   : > { %v4826_v6 = vrot.slane %v4824_v22, 6  ;;  %v4829_v9 = vrot.slane %v4827_v51, 7  ;;  %v4806_v17 = vrot.slane %v4804_v35, 6  ;;  %v4809_v3 = vrot.slane %v4807_v62, 7 }
 0x38c   : > { %v4781_v7 = vsel %vm11799_vm9, %v4772_v47, %v4780_v2  ;;  %v4782_v39 = vrot.slane %v4780_v2, 4  ;;  %v4834_v54 = vshrl.u32 %v9505_v49, 16  ;;  %v4837_v16 = vshll.u32 %v9505_v49, 16  ;;  %v12942_v30 = vpop.f32.mrb[28].mxu0 }
 0x38d   : > { %5055 = vst [vmem:[#allocation3 + $0x3c] sm:$0xf] %v4781_v7  ;;  %v4830_v48 = vor.u32 %v4829_v9, %v4826_v6  ;;  %v4810_v5 = vor.u32 %v4809_v3, %v4806_v17  ;;  %v9503_v20 = vpack.c.bf16 %v4517_v37, %v4517_v37  ;;  %v5262_v32 = vrot.slane %v5260_v52, 1  ;;  %v12944_v46 = vpop.f32.mrb[29].mxu0 }
 0x38e   : > { %v4791_v1 = vsel %vm11799_vm9, %v4782_v39, %v12904_v26  ;;  %v4836_v24 = vrot.slane %v4834_v54, 6  ;;  %v4839_v27 = vrot.slane %v4837_v16, 7  ;;  %v4234_v47 = vadd.f32 %v12892_v44, %v12840_v33  ;;  %v12951_v59 = vpop.f32.mrb[30].mxu0  ;;  %v12960_v44 = vld [vmem:[#allocation3 + $0x20] sm:$0xff]  }
 0x38f   : > { %5056 = vst [vmem:[#allocation3 + $0x40] sm:$0xf] %v4791_v1  ;;  %v4832_v25 = vrot.slane %v4830_v48, 4  ;;  %v4811_v11 = vsel %vm11799_vm9, %v4802_v63, %v4810_v5  ;;  %v4812_v61 = vrot.slane %v4810_v5, 4  ;;  %v4814_v50 = vshrl.u32 %v9503_v20, 16  ;;  %v12955_v42 = vpop.f32.mrb[31].mxu0  ;;  %v4443_v1 = vpop.permute.xlu1 %4442 }
 0x390   : > { %5058 = vst [vmem:[#allocation3 + $0x48] sm:$0xf] %v4811_v11  ;;  %v12957_v41 = vor.u32 %v4839_v27, %v4836_v24  ;;  %v4817_v26 = vshll.u32 %v9503_v20, 16  ;;  %v5263_v60 = vsel %vm890_vm10, %v5258_v43, %v5262_v32  ;;  %v4270_v52 = vmax.f32 %v4234_v47, 0.0 }
 0x391   : > { %v4816_v45 = vrot.slane %v4814_v50, 6  ;;  %10286 = vmatmul.mubr.bf16.vlgmr.msra.gmra.mrb[36].mxu0 %v5263_v60  ;;  %v4232_v55 = vadd.f32 %v12840_v33, %v12896_v36  ;;  %v4235_v63 = vadd.f32 %v12898_v13, %v12840_v33  ;;  %v5264_v21 = vshrl.u32 %v12919_v23, 16 }
 0x392   : > { %v4841_v22 = vsel %vm11799_vm9, %v4832_v25, %v12957_v41  ;;  %v4842_v51 = vrot.slane %v12957_v41, 4  ;;  %v4819_v35 = vrot.slane %v4817_v26, 7  ;;  %v4522_v62 = vmul.f32 %v4433_v4, %v4270_v52 }
 0x393   : > { %5061 = vst [vmem:[#allocation3 + $0x54] sm:$0xf] %v4841_v22  ;;  %v4268_v2 = vmax.f32 %v4232_v55, 0.0  ;;  %v4271_v49 = vmax.f32 %v4235_v63, 0.0  ;;  %v5266_v43 = vor.u32 %v5264_v21, %v5262_v32  ;;  %v5268_v37 = vshll.u32 %v11456_v53, 16 }
 0x394   : > { %v4820_v6 = vor.u32 %v4819_v35, %v4816_v45  ;;  %v9508_v36 = vpack.c.bf16 %v4522_v62, %v4522_v62  ;;  %v4233_v13 = vadd.f32 %v12840_v33, %v12902_v10  ;;  %v5272_v9 = vshrl.u32 %v11456_v53, 16  ;;  %v12973_v23 = vpop.f32.mrb[32].mxu0 }
 0x395   : > { %v4520_v17 = vmul.f32 %v4423_v56, %v4268_v2  ;;  %v4523_v3 = vmul.f32 %v12823_v18, %v4271_v49  ;;  %v5270_v7 = vrot.slane %v5268_v37, 1  ;;  %v5276_v39 = vshll.u32 %v12960_v44, 16  ;;  %v12977_v54 = vpop.f32.mrb[33].mxu0 }
 0x396   : > { %v4821_v16 = vsel %vm11799_vm9, %v4812_v61, %v4820_v6  ;;  %v4822_v5 = vrot.slane %v4820_v6, 4  ;;  %v4864_v20 = vshrl.u32 %v9508_v36, 16  ;;  %v4867_v32 = vshll.u32 %v9508_v36, 16  ;;  %v12982_v47 = vpop.f32.mrb[34].mxu0  ;;  %v4453_v6 = vpop.permute.xlu1 %4452 }
 0x397   : > { %5059 = vst [vmem:[#allocation3 + $0x4c] sm:$0xf] %v4821_v16  ;;  %v9506_v10 = vpack.c.bf16 %v4520_v17, %v4520_v17  ;;  %v9509_v24 = vpack.c.bf16 %v4523_v3, %v4523_v3  ;;  %v5271_v27 = vsel %vm890_vm10, %v5266_v43, %v5270_v7  ;;  %v4269_v56 = vmax.f32 %v4233_v13, 0.0  ;;  %v12986_v61 = vpop.f32.mrb[35].mxu0 }
 0x398   : > { %v4831_v18 = vsel %vm11799_vm9, %v4822_v5, %v4830_v48  ;;  %v4866_v53 = vrot.slane %v4864_v20, 6  ;;  %v4869_v25 = vrot.slane %v4867_v32, 7  ;;  %10289 = vmatprep.mubr.bf16.mxu1 %v5271_v27  ;;  %v5274_v11 = vor.u32 %v5272_v9, %v5270_v7  ;;  %v11460_v48 = vld [vmem:[%s14132_s4 + $0x8] sm:$0xff]  }
 0x399   : > { %5060 = vst [vmem:[#allocation3 + $0x50] sm:$0xf] %v4831_v18  ;;  %v4844_v50 = vshrl.u32 %v9506_v10, 16  ;;  %v4847_v26 = vshll.u32 %v9506_v10, 16  ;;  %v4874_v60 = vshrl.u32 %v9509_v24, 16  ;;  %v4877_v52 = vshll.u32 %v9509_v24, 16 }
 0x39a   : > { %v12988_v4 = vor.u32 %v4869_v25, %v4866_v53  ;;  %v4521_v45 = vmul.f32 %v12821_v15, %v4269_v56  ;;  %v5278_v55 = vrot.slane %v5276_v39, 1  ;;  %v4238_v63 = vadd.f32 %v12923_v38, %v12840_v33  ;;  %v13004_v9 = vld [vmem:[#allocation3 + $0x28] sm:$0xff]  }
 0x39b   : > { %v4846_v21 = vrot.slane %v4844_v50, 6  ;;  %v4849_v22 = vrot.slane %v4847_v26, 7  ;;  %v4876_v35 = vrot.slane %v4874_v60, 6  ;;  %v4879_v62 = vrot.slane %v4877_v52, 7 }
 0x39c   : > { %v4872_v2 = vrot.slane %v12988_v4, 4  ;;  %v9507_v49 = vpack.c.bf16 %v4521_v45, %v4521_v45  ;;  %v5279_v43 = vsel %vm890_vm10, %v5274_v11, %v5278_v55  ;;  %v4274_v37 = vmax.f32 %v4238_v63, 0.0  ;;  %v13022_v11 = vld [vmem:[#allocation3 + $0x30] sm:$0xff]  }
 0x39d   : > { %v4850_v15 = vor.u32 %v4849_v22, %v4846_v21  ;;  %v12998_v36 = vor.u32 %v4879_v62, %v4876_v35  ;;  %10290 = vmatmul.mubr.bf16.vlgmr.msra.gmra.mrb[0].mxu1 %v5279_v43  ;;  %v4236_v38 = vadd.f32 %v12840_v33, %v12929_v58  ;;  %v4239_v13 = vadd.f32 %v12931_v12, %v12840_v33  ;;  %v11466_v45 = vld [vmem:[%s14132_s4 + $0x18] sm:$0xff]   ;;  %v13031_v21 = vpop.permute.xlu1 %4462 }
 0x39e   : > { %v4854_v17 = vshrl.u32 %v9507_v49, 16  ;;  %v4857_v3 = vshll.u32 %v9507_v49, 16  ;;  %10322 = vmatpush3.bf16.msra.mxu1 %v12818_v8  ;;  %v4526_v7 = vmul.f32 %v4453_v6, %v4274_v37  ;;  %v5280_v39 = vshrl.u32 %v12960_v44, 16  ;;  %v11463_v8 = vld [vmem:[%s14132_s4 + $0x10] sm:$0xff]   ;;  %v11469_v37 = vld [vmem:[%s14132_s4 + $0x20] sm:$0xff]  }
 0x39f   : > { %v4851_v16 = vsel %vm11799_vm9, %v4842_v51, %v4850_v15  ;;  %v4852_v5 = vrot.slane %v4850_v15, 4  ;;  %v4881_v58 = vsel %vm11799_vm9, %v4872_v2, %v12998_v36  ;;  %v4882_v12 = vrot.slane %v12998_v36, 4  ;;  %10323 = vmatprep.subr.bf16.mxu1 %v11460_v48 }
 0x3a0   : > { %5062 = vst [vmem:[#allocation3 + $0x58] sm:$0xf] %v4851_v16  ;;  %5065 = vst [vmem:[#allocation3 + $0x64] sm:$0xf] %v4881_v58  ;;  %v4856_v44 = vrot.slane %v4854_v17, 6  ;;  %v4859_v20 = vrot.slane %v4857_v3, 7  ;;  %v9512_v41 = vpack.c.bf16 %v4526_v7, %v4526_v7  ;;  %v5282_v51 = vor.u32 %v5280_v39, %v5278_v55 }
 0x3a1   : > { %v4272_v32 = vmax.f32 %v4236_v38, 0.0  ;;  %v4275_v10 = vmax.f32 %v4239_v13, 0.0  ;;  %v5284_v24 = vshll.u32 %v13004_v9, 16  ;;  %v4237_v27 = vadd.f32 %v12840_v33, %v12934_v57 }
 0x3a2   : > { %v4860_v56 = vor.u32 %v4859_v20, %v4856_v44  ;;  %v4904_v18 = vshrl.u32 %v9512_v41, 16  ;;  %v4907_v53 = vshll.u32 %v9512_v41, 16  ;;  %10324 = vmatpush3.bf16.msra.mxu1 %v11460_v48  ;;  %v5288_v52 = vshrl.u32 %v13004_v9, 16  ;;  %v4473_v41 = vpop.permute.xlu1 %4472 }
 0x3a3   : > { %v4524_v25 = vmul.f32 %v4443_v1, %v4272_v32  ;;  %v4527_v50 = vmul.f32 %v12827_v28, %v4275_v10  ;;  %v5286_v26 = vrot.slane %v5284_v24, 1  ;;  %v4273_v60 = vmax.f32 %v4237_v27, 0.0  ;;  %10325 = vmatprep.subr.bf16.mxu1 %v11463_v8  ;;  %v13054_v24 = vld [vmem:[#allocation3 + $0x38] sm:$0xff]   ;;  %v11472_v27 = vld [vmem:[%s14132_s4 + $0x28] sm:$0xff]  }
 0x3a4   : > { %v4861_v57 = vsel %vm11799_vm9, %v4852_v5, %v4860_v56  ;;  %v4862_v55 = vrot.slane %v4860_v56, 4  ;;  %v4906_v63 = vrot.slane %v4904_v18, 6  ;;  %v4909_v1 = vrot.slane %v4907_v53, 7 }
 0x3a5   : > { %5063 = vst [vmem:[#allocation3 + $0x5c] sm:$0xf] %v4861_v57  ;;  %v9510_v48 = vpack.c.bf16 %v4524_v25, %v4524_v25  ;;  %v9513_v28 = vpack.c.bf16 %v4527_v50, %v4527_v50  ;;  %v5287_v22 = vsel %vm890_vm10, %v5282_v51, %v5286_v26  ;;  %v4525_v35 = vmul.f32 %v12825_v19, %v4273_v60  ;;  %v13068_v57 = vld [vmem:[#allocation3 + $0x40] sm:$0xff]  }
 0x3a6   : > { %v4871_v62 = vsel %vm11799_vm9, %v4862_v55, %v12988_v4  ;;  %v13038_v2 = vor.u32 %v4909_v1, %v4906_v63  ;;  %10293 = vmatprep.mubr.bf16.mxu1 %v5287_v22  ;;  %v5290_v49 = vor.u32 %v5288_v52, %v5286_v26  ;;  %v5292_v43 = vshll.u32 %v13022_v11, 16  ;;  %10326 = vmatpush3.bf16.msra.mxu1 %v11463_v8 }
 0x3a7   : > { %5064 = vst [vmem:[#allocation3 + $0x60] sm:$0xf] %v4871_v62  ;;  %v4884_v6 = vshrl.u32 %v9510_v48, 16  ;;  %v4887_v15 = vshll.u32 %v9510_v48, 16  ;;  %v4914_v38 = vshrl.u32 %v9513_v28, 16  ;;  %v4917_v19 = vshll.u32 %v9513_v28, 16  ;;  %10327 = vmatprep.subr.bf16.mxu1 %v11466_v45 }
 0x3a8   : > { %v4912_v13 = vrot.slane %v13038_v2, 4  ;;  %v9511_v4 = vpack.c.bf16 %v4525_v35, %v4525_v35  ;;  %v5294_v17 = vrot.slane %v5292_v43, 1  ;;  %v4242_v3 = vadd.f32 %v12942_v30, %v12840_v33  ;;  %v11475_v48 = vld [vmem:[%s14132_s4 + $0x30] sm:$0xff]  }
 0x3a9   : > { %v4886_v7 = vrot.slane %v4884_v6, 6  ;;  %v4889_v39 = vrot.slane %v4887_v15, 7  ;;  %v4916_v16 = vrot.slane %v4914_v38, 6  ;;  %v4919_v5 = vrot.slane %v4917_v19, 7 }
 0x3aa   : > { %v4894_v58 = vshrl.u32 %v9511_v4, 16  ;;  %v4897_v8 = vshll.u32 %v9511_v4, 16  ;;  %v5295_v44 = vsel %vm890_vm10, %v5290_v49, %v5294_v17  ;;  %v4278_v20 = vmax.f32 %v4242_v3, 0.0  ;;  %10328 = vmatpush3.bf16.msra.mxu1 %v11466_v45  ;;  %v13084_v49 = vpop.permute.xlu1 %4482 }
 0x3ab   : > { %v4890_v32 = vor.u32 %v4889_v39, %v4886_v7  ;;  %v13048_v10 = vor.u32 %v4919_v5, %v4916_v16  ;;  %10294 = vmatmul.mubr.bf16.gmra.mrb[4].mxu1 %v5295_v44  ;;  %v4240_v51 = vadd.f32 %v12840_v33, %v12944_v46  ;;  %v4243_v30 = vadd.f32 %v12951_v59, %v12840_v33 }
 0x3ac   : > { %v4896_v56 = vrot.slane %v4894_v58, 6  ;;  %v4899_v18 = vrot.slane %v4897_v8, 7  ;;  %v4530_v53 = vmul.f32 %v4473_v41, %v4278_v20  ;;  %v5296_v25 = vshrl.u32 %v13022_v11, 16  ;;  %10329 = vmatprep.subr.bf16.mxu1 %v11469_v37 }
 0x3ad   : > { %v4891_v46 = vsel %vm11799_vm9, %v4882_v12, %v4890_v32  ;;  %v4892_v50 = vrot.slane %v4890_v32, 4  ;;  %v4921_v33 = vsel %vm11799_vm9, %v4912_v13, %v13048_v10  ;;  %v4922_v59 = vrot.slane %v13048_v10, 4  ;;  %v13074_v12 = vld [vmem:[%s14131_s3] ss:$0 sm:$0xff] }
 0x3ae   : > { %5066 = vst [vmem:[#allocation3 + $0x68] sm:$0xf] %v4891_v46  ;;  %5069 = vst [vmem:[#allocation3 + $0x74] sm:$0xf] %v4921_v33  ;;  %v4900_v26 = vor.u32 %v4899_v18, %v4896_v56  ;;  %v9516_v60 = vpack.c.bf16 %v4530_v53, %v4530_v53  ;;  %v4276_v52 = vmax.f32 %v4240_v51, 0.0  ;;  %v4279_v45 = vmax.f32 %v4243_v30, 0.0  ;;  %10330 = vmatpush3.bf16.msra.mxu1 %v11469_v37  ;;  %v4493_v30 = vpop.permute.xlu1 %4492 }
 0x3af   : > { %v5298_v36 = vor.u32 %v5296_v25, %v5294_v17  ;;  %v5300_v55 = vshll.u32 %v13054_v24, 16  ;;  %v4241_v63 = vadd.f32 %v13074_v12, %v12955_v42  ;;  %v5304_v1 = vshrl.u32 %v13054_v24, 16  ;;  %10331 = vmatprep.subr.bf16.mxu1 %v11472_v27 }
 0x3b0   : > { %v4901_v28 = vsel %vm11799_vm9, %v4892_v50, %v4900_v26  ;;  %v4902_v22 = vrot.slane %v4900_v26, 4  ;;  %v4944_v35 = vshrl.u32 %v9516_v60, 16  ;;  %v4947_v62 = vshll.u32 %v9516_v60, 16 }
 0x3b1   : > { %5067 = vst [vmem:[#allocation3 + $0x6c] sm:$0xf] %v4901_v28  ;;  %v4528_v43 = vmul.f32 %v13031_v21, %v4276_v52  ;;  %v4531_v42 = vmul.f32 %v12831_v0, %v4279_v45  ;;  %v5302_v37 = vrot.slane %v5300_v55, 1  ;;  %v4277_v6 = vmax.f32 %v4241_v63, 0.0  ;;  %v11478_v0 = vld [vmem:[%s14132_s4 + $0x38] sm:$0xff]   ;;  %v13114_v52 = vld [vmem:[#allocation3 + $0x48] sm:$0xff]  }
 0x3b2   : > { %v4911_v15 = vsel %vm11799_vm9, %v4902_v22, %v13038_v2  ;;  %v4946_v38 = vrot.slane %v4944_v35, 6  ;;  %v4949_v19 = vrot.slane %v4947_v62, 7  ;;  %v5308_v13 = vshll.u32 %v13068_v57, 16  ;;  %10332 = vmatpush3.bf16.msra.mxu1 %v11472_v27  ;;  %v13125_v22 = vld [vmem:[#allocation3 + $0x50] sm:$0xff]  }
 0x3b3   : > { %5068 = vst [vmem:[#allocation3 + $0x70] sm:$0xf] %v4911_v15  ;;  %v9514_v4 = vpack.c.bf16 %v4528_v43, %v4528_v43  ;;  %v9517_v17 = vpack.c.bf16 %v4531_v42, %v4531_v42  ;;  %v5303_v3 = vsel %vm890_vm10, %v5298_v36, %v5302_v37  ;;  %v4529_v21 = vmul.f32 %v12829_v31, %v4277_v6  ;;  %v13104_v31 = vld [vmem:[%s14132_s4 + $0x80] sm:$0xff]   ;;  %v4498_v15 = vpop.permute.xlu1 %4497 }
 0x3b4   : > { %10333 = vmatprep.subr.bf16.mxu1 %v11475_v48  ;;  %v13097_v7 = vor.u32 %v4949_v19, %v4946_v38  ;;  %10297 = vmatprep.mubr.bf16.mxu1 %v5303_v3  ;;  %v5306_v2 = vor.u32 %v5304_v1, %v5302_v37  ;;  %v5310_v39 = vrot.slane %v5308_v13, 1  ;;  %v4246_v16 = vadd.f32 %v13074_v12, %v12973_v23 }
 0x3b5   : > { %v4924_v5 = vshrl.u32 %v9514_v4, 16  ;;  %v4927_v58 = vshll.u32 %v9514_v4, 16  ;;  %v4954_v8 = vshrl.u32 %v9517_v17, 16  ;;  %v4957_v44 = vshll.u32 %v9517_v17, 16 }
 0x3b6   : > { %v4952_v20 = vrot.slane %v13097_v7, 4  ;;  %v9515_v41 = vpack.c.bf16 %v4529_v21, %v4529_v21  ;;  %v5311_v32 = vsel %vm890_vm10, %v5306_v2, %v5310_v39  ;;  %v4282_v51 = vmax.f32 %v4246_v16, 0.0  ;;  %10334 = vmatpush3.bf16.msra.mxu1 %v11475_v48 }
 0x3b7   : > { %v4926_v27 = vrot.slane %v4924_v5, 6  ;;  %v4929_v56 = vrot.slane %v4927_v58, 7  ;;  %v4956_v23 = vrot.slane %v4954_v8, 6  ;;  %v4959_v18 = vrot.slane %v4957_v44, 7  ;;  %10298 = vmatmul.mubr.bf16.gmra.mrb[8].mxu1 %v5311_v32  ;;  %10335 = vmatprep.subr.bf16.mxu1 %v11478_v0  ;;  %v13146_v32 = vld [vmem:[#allocation3 + $0x60] sm:$0xff]  }
 0x3b8   : > { %v4934_v53 = vshrl.u32 %v9515_v41, 16  ;;  %v4937_v25 = vshll.u32 %v9515_v41, 16  ;;  %v4534_v46 = vmul.f32 %v4493_v30, %v4282_v51  ;;  %v4244_v50 = vadd.f32 %v13074_v12, %v12977_v54 }
 0x3b9   : > { %v4930_v33 = vor.u32 %v4929_v56, %v4926_v27  ;;  %v13110_v26 = vor.u32 %v4959_v18, %v4956_v23  ;;  %v4247_v60 = vadd.f32 %v13074_v12, %v12982_v47  ;;  %v5312_v45 = vshrl.u32 %v13068_v57, 16 }
 0x3ba   : > { %v4936_v36 = vrot.slane %v4934_v53, 6  ;;  %v4939_v55 = vrot.slane %v4937_v25, 7  ;;  %v9520_v63 = vpack.c.bf16 %v4534_v46, %v4534_v46  ;;  %v4280_v1 = vmax.f32 %v4244_v50, 0.0  ;;  %10336 = vmatpush3.bf16.msra.mxu1 %v11478_v0 }
 0x3bb   : > { %v4931_v54 = vsel %vm11799_vm9, %v4922_v59, %v4930_v33  ;;  %v4932_v48 = vrot.slane %v4930_v33, 4  ;;  %v4961_v28 = vsel %vm11799_vm9, %v4952_v20, %v13110_v26  ;;  %v4962_v47 = vrot.slane %v13110_v26, 4  ;;  %10373 = vmatprep.subr.bf16.mxu1 %v13104_v31  ;;  %v13152_v26 = vld [vmem:[#allocation3 + $0x68] sm:$0xff]  }
 0x3bc   : > { %5070 = vst [vmem:[#allocation3 + $0x78] sm:$0xf] %v4931_v54  ;;  %5073 = vst [vmem:[#allocation3 + $0x84] sm:$0xf] %v4961_v28  ;;  %v4940_v35 = vor.u32 %v4939_v55, %v4936_v36  ;;  %v4984_v62 = vshrl.u32 %v9520_v63, 16  ;;  %v4987_v43 = vshll.u32 %v9520_v63, 16  ;;  %v4532_v10 = vmul.f32 %v13084_v49, %v4280_v1 }
 0x3bd   : > { %v4283_v42 = vmax.f32 %v4247_v60, 0.0  ;;  %v5314_v59 = vor.u32 %v5312_v45, %v5310_v39  ;;  %v5316_v37 = vshll.u32 %v13114_v52, 16  ;;  %v4245_v6 = vadd.f32 %v13074_v12, %v12986_v61  ;;  %v13141_v39 = vld [vmem:[#allocation3 + $0x58] sm:$0xff]   ;;  %v13154_v63 = vld [vmem:[#allocation3 + $0x70] sm:$0xff]  }
 0x3be   : > { %v4941_v38 = vsel %vm11799_vm9, %v4932_v48, %v4940_v35  ;;  %v4942_v19 = vrot.slane %v4940_v35, 4  ;;  %v4986_v13 = vrot.slane %v4984_v62, 6  ;;  %v4989_v4 = vrot.slane %v4987_v43, 7  ;;  %v5078_v35 = vld [vmem:[#allocation3 + $0x98] sm:$0x3] }
 0x3bf   : > { %5071 = vst [vmem:[#allocation3 + $0x7c] sm:$0xf] %v4941_v38  ;;  %v9518_v17 = vpack.c.bf16 %v4532_v10, %v4532_v10  ;;  %v4535_v3 = vmul.f32 %v4498_v15, %v4283_v42  ;;  %v5318_v21 = vrot.slane %v5316_v37, 1  ;;  %v4281_v0 = vmax.f32 %v4245_v6, 0.0 }
 0x3c0   : > { %v4951_v49 = vsel %vm11799_vm9, %v4942_v19, %v13097_v7  ;;  %v13137_v2 = vor.u32 %v4989_v4, %v4986_v13  ;;  %v5320_v61 = vshrl.u32 %v13114_v52, 16  ;;  %v5324_v12 = vshll.u32 %v13125_v22, 16 }
 0x3c1   : > { %5072 = vst [vmem:[#allocation3 + $0x80] sm:$0xf] %v4951_v49  ;;  %v4964_v16 = vshrl.u32 %v9518_v17, 16  ;;  %v4967_v5 = vshll.u32 %v9518_v17, 16  ;;  %v9521_v58 = vpack.c.bf16 %v4535_v3, %v4535_v3  ;;  %v5319_v8 = vsel %vm890_vm10, %v5314_v59, %v5318_v21 }
 0x3c2   : > { %v4992_v44 = vrot.slane %v13137_v2, 4  ;;  %10301 = vmatprep.mubr.bf16.mxu1 %v5319_v8  ;;  %v4533_v20 = vmul.f32 %v12835_v29, %v4281_v0  ;;  %v5322_v7 = vor.u32 %v5320_v61, %v5318_v21  ;;  %v5326_v41 = vrot.slane %v5324_v12, 1 }
 0x3c3   : > { %v4966_v51 = vrot.slane %v4964_v16, 6  ;;  %v4969_v30 = vrot.slane %v4967_v5, 7  ;;  %v4994_v27 = vshrl.u32 %v9521_v58, 16  ;;  %v4997_v56 = vshll.u32 %v9521_v58, 16 }
 0x3c4   : > { %v9519_v23 = vpack.c.bf16 %v4533_v20, %v4533_v20  ;;  %v5327_v18 = vsel %vm890_vm10, %v5322_v7, %v5326_v41  ;;  %v5328_v53 = vshrl.u32 %v13125_v22, 16  ;;  %v5332_v25 = vshll.u32 %v13141_v39, 16 }
 0x3c5   : > { %v4970_v46 = vor.u32 %v4969_v30, %v4966_v51  ;;  %v4996_v50 = vrot.slane %v4994_v27, 6  ;;  %v4999_v33 = vrot.slane %v4997_v56, 7  ;;  %10302 = vmatmul.mubr.bf16.gmra.mrb[12].mxu1 %v5327_v18  ;;  %v5336_v29 = vshrl.u32 %v13141_v39, 16 }
 0x3c6   : > { %v4974_v60 = vshrl.u32 %v9519_v23, 16  ;;  %v4977_v45 = vshll.u32 %v9519_v23, 16  ;;  %v5330_v36 = vor.u32 %v5328_v53, %v5326_v41  ;;  %v5334_v55 = vrot.slane %v5332_v25, 1  ;;  %v13162_v15 = vld [vmem:[#allocation3 + $0x78] sm:$0xff]  }
 0x3c7   : > { %v4971_v1 = vsel %vm11799_vm9, %v4962_v47, %v4970_v46  ;;  %v4972_v54 = vrot.slane %v4970_v46, 4  ;;  %v5000_v48 = vor.u32 %v4999_v33, %v4996_v50  ;;  %v5340_v28 = vshll.u32 %v13146_v32, 16 }
 0x3c8   : > { %5074 = vst [vmem:[#allocation3 + $0x88] sm:$0xf] %v4971_v1  ;;  %v4976_v62 = vrot.slane %v4974_v60, 6  ;;  %v4979_v43 = vrot.slane %v4977_v45, 7  ;;  %v5335_v10 = vsel %vm890_vm10, %v5330_v36, %v5334_v55  ;;  %v5338_v42 = vor.u32 %v5336_v29, %v5334_v55  ;;  %v13173_v12 = vld [vmem:[#allocation3 + $0x80] sm:$0xff]  }
 0x3c9   : > { %v5001_v59 = vsel %vm11799_vm9, %v4992_v44, %v5000_v48  ;;  %v5002_v37 = vrot.slane %v5000_v48, 4  ;;  %10305 = vmatprep.mubr.bf16.mxu1 %v5335_v10  ;;  %v5342_v6 = vrot.slane %v5340_v28, 1  ;;  %v5344_v38 = vshrl.u32 %v13146_v32, 16  ;;  %v13195_v45 = vld [vmem:[#allocation3 + $0xc] sm:$0xf]  ;;  %v13200_v48 = vld [vmem:[#allocation3 + $0x10] sm:$0xff]  }
 0x3ca   : > { %5077 = vst [vmem:[#allocation3 + $0x94] sm:$0xf] %v5001_v59  ;;  %v4980_v47 = vor.u32 %v4979_v43, %v4976_v62  ;;  %v5348_v19 = vshll.u32 %v13152_v26, 16  ;;  %v5356_v13 = vshll.u32 %v13154_v63, 16  ;;  %v5352_v3 = vshrl.u32 %v13152_v26, 16  ;;  %v13202_v28 = vld [vmem:[#allocation3 + $0x18] sm:$0xff]  }
 0x3cb   : > { %v5079_v4 = vsel %vm12765_vm2, %v5002_v37, %v5078_v35  ;;  %v5343_v17 = vsel %vm890_vm10, %v5338_v42, %v5342_v6  ;;  %v5346_v49 = vor.u32 %v5344_v38, %v5342_v6  ;;  %v5364_v5 = vshll.u32 %v13162_v15, 16  ;;  %v6215_v1 = vld [vmem:[#allocation3 + $0x8] sm:$0xe]  ;;  %v13205_v62 = vld [vmem:[#allocation3 + $0x20] sm:$0xff]   ;;  %v13210_v42 = vld [vmem:[#allocation3 + $0x30] sm:$0xff]  }
 0x3cc   : > { %5080 = vst [vmem:[#allocation3 + $0x98] sm:$0x3] %v5079_v4  ;;  %v4981_v21 = vsel %vm11799_vm9, %v4972_v54, %v4980_v47  ;;  %v4982_v0 = vrot.slane %v4980_v47, 4  ;;  %v5350_v61 = vrot.slane %v5348_v19, 1  ;;  %v5358_v16 = vrot.slane %v5356_v13, 1  ;;  %v13207_v43 = vld [vmem:[#allocation3 + $0x28] sm:$0xff]  }
 0x3cd   : > { %5075 = vst [vmem:[#allocation3 + $0x8c] sm:$0xf] %v4981_v21  ;;  %10306 = vmatmul.mubr.bf16.gmra.mrb[16].mxu1 %v5343_v17  ;;  %v5360_v44 = vshrl.u32 %v13154_v63, 16  ;;  %v5366_v20 = vrot.slane %v5364_v5, 1  ;;  %v5372_v7 = vshll.u32 %v13173_v12, 16  ;;  %v5368_v27 = vshrl.u32 %v13162_v15, 16 }
 0x3ce   : > { %v4991_v14 = vsel %vm11799_vm9, %v4982_v0, %v13137_v2  ;;  %v5351_v58 = vsel %vm890_vm10, %v5346_v49, %v5350_v61  ;;  %v5354_v8 = vor.u32 %v5352_v3, %v5350_v61  ;;  %v5376_v53 = vshrl.u32 %v13173_v12, 16  ;;  %v13218_v21 = vld [vmem:[#allocation3 + $0x38] sm:$0xff]   ;;  %v13223_v5 = vld [vmem:[#allocation3 + $0x40] sm:$0xff]  }
 0x3cf   : > { %5076 = vst [vmem:[#allocation3 + $0x90] sm:$0xf] %v4991_v14  ;;  %10309 = vmatprep.mubr.bf16.mxu1 %v5351_v58  ;;  %v5362_v41 = vor.u32 %v5360_v44, %v5358_v16  ;;  %v5374_v34 = vrot.slane %v5372_v7, 1  ;;  %v5370_v2 = vor.u32 %v5368_v27, %v5366_v20  ;;  %v13198_v54 = vcombine.low %v6215_v1, %v13195_v45  ;;  %v13227_v44 = vld [vmem:[#allocation3 + $0x48] sm:$0xff]  }
 0x3d0   : > { %v5359_v51 = vsel %vm890_vm10, %v5354_v8, %v5358_v16  ;;  %v6708_v37 = vshrl.u32 %v13200_v48, 16  ;;  %v6711_v6 = vshll.u32 %v13200_v48, 16  ;;  %v6717_v47 = vshrl.u32 %v13202_v28, 16 }
 0x3d1   : > { %v5367_v30 = vsel %vm890_vm10, %v5362_v41, %v5366_v20  ;;  %v5378_v46 = vor.u32 %v5376_v53, %v5374_v34  ;;  %v5375_v50 = vsel %vm890_vm10, %v5370_v2, %v5374_v34  ;;  %v6700_v10 = vshrl.u32 %v13198_v54, 16  ;;  %v13236_v53 = vld [vmem:[#allocation3 + $0x50] sm:$0xff]  }
 0x3d2   : > { %v6703_v59 = vshll.u32 %v13198_v54, 16  ;;  %v6720_v19 = vshll.u32 %v13202_v28, 16  ;;  %v6710_v4 = vrot.slane %v6708_v37, 1  ;;  %v6713_v17 = vrot.slane %v6711_v6, 2 }
 0x3d3   : > { %v6702_v38 = vrot.slane %v6700_v10, 1  ;;  %v6719_v3 = vrot.slane %v6717_v47, 1  ;;  %v6726_v49 = vshrl.u32 %v13205_v62, 16  ;;  %v6729_v61 = vshll.u32 %v13205_v62, 16  ;;  %v13251_v10 = vld [vmem:[#allocation3 + $0x10] sm:$0xff]  }
 0x3d4   : > { %v13185_v56 = vld [vmem:[#allocation3 + $0x88] sm:$0xff]   ;;  %v6705_v13 = vrot.slane %v6703_v59, 2  ;;  %v6722_v0 = vrot.slane %v6720_v19, 2  ;;  %v6735_v16 = vshrl.u32 %v13207_v43, 16  ;;  %v6738_v58 = vshll.u32 %v13207_v43, 16  ;;  %v13261_v19 = vld [vmem:[#allocation3 + $0x60] sm:$0xff]  }
 0x3d5   : > { %10310 = vmatmul.mubr.bf16.gmra.mrb[20].mxu1 %v5359_v51  ;;  %v5380_v23 = vshll.u32 %v13185_v56, 16  ;;  %v5384_v60 = vshrl.u32 %v13185_v56, 16  ;;  %v6744_v8 = vshrl.u32 %v13210_v42, 16  ;;  %v6728_v7 = vrot.slane %v6726_v49, 1 }
 0x3d6   : > { %10313 = vmatprep.mubr.bf16.mxu1 %v5367_v30  ;;  %v13188_v18 = vld [vmem:[#allocation3 + $0x90] ss:$0 sps:$4 sm:$0x11]   ;;  %v6706_v14 = vor.u32 %v6705_v13, %v6702_v38  ;;  %v6723_v20 = vor.u32 %v6722_v0, %v6719_v3  ;;  %v6731_v41 = vrot.slane %v6729_v61, 2  ;;  %v6737_v51 = vrot.slane %v6735_v16, 1  ;;  %v11481_v30 = vld [vmem:[%s14132_s4 + $0x88] sm:$0xff]  }
 0x3d7   : > { %v5382_v25 = vrot.slane %v5380_v23, 1  ;;  %v5388_v33 = vshll.u32 %v13188_v18, 16  ;;  %v6740_v34 = vrot.slane %v6738_v58, 2  ;;  %v6746_v2 = vrot.slane %v6744_v8, 1  ;;  %v11482_v38 = vld [vmem:[%s14132_s4 + $0x90] sm:$0xff]  }
 0x3d8   : > { %v6747_v23 = vshll.u32 %v13210_v42, 16  ;;  %v6762_v1 = vshrl.u32 %v13223_v5, 16  ;;  %v6771_v47 = vshrl.u32 %v13227_v44, 16  ;;  %v13266_v3 = vld [vmem:[#allocation3 + $0x68] sm:$0xff]   ;;  %v6774_v61 = vshll.u32 %v13227_v44, 16 }
 0x3d9   : > { %v5383_v29 = vsel %vm890_vm10, %v5378_v46, %v5382_v25  ;;  %v5386_v36 = vor.u32 %v5384_v60, %v5382_v25  ;;  %v5390_v55 = vrot.slane %v5388_v33, 1  ;;  %v6732_v46 = vor.u32 %v6731_v41, %v6728_v7  ;;  %v13246_v60 = vld [vmem:[#allocation3 + $0x58] sm:$0xff]  }
 0x3da   : > { %v6756_v33 = vshll.u32 %v13218_v21, 16  ;;  %v6773_v49 = vrot.slane %v6771_v47, 1  ;;  %v6780_v16 = vshrl.u32 %v13236_v53, 16  ;;  %v6783_v8 = vshll.u32 %v13236_v53, 16 }
 0x3db   : > { %v5391_v35 = vsel %vm890_vm10, %v5386_v36, %v5390_v55  ;;  %v6741_v36 = vor.u32 %v6740_v34, %v6737_v51  ;;  %v6749_v55 = vrot.slane %v6747_v23, 2  ;;  %v13255_v59 = vsel %vm2250_vm13, %v6723_v20, %v6732_v46 }
 0x3dc   : > { %14156 = vst [vmem:[#allocation9_spill] sm:$0xff] %v13255_v59  ;;  %v6758_v6 = vrot.slane %v6756_v33, 2  ;;  %v6776_v41 = vrot.slane %v6774_v61, 2  ;;  %v6782_v51 = vrot.slane %v6780_v16, 1  ;;  %v6792_v34 = vshll.u32 %v13246_v60, 16 }
 0x3dd   : > { %10314 = vmatmul.mubr.bf16.gmra.mrb[24].mxu1 %v5375_v50  ;;  %v6753_v50 = vshrl.u32 %v13218_v21, 16  ;;  %v6750_v13 = vor.u32 %v6749_v55, %v6746_v2  ;;  %v11483_v2 = vld [vmem:[%s14132_s4 + $0x98] sm:$0xff]   ;;  %v6798_v33 = vshrl.u32 %v13261_v19, 16 }
 0x3de   : > { %10317 = vmatprep.mubr.bf16.mxu1 %v5383_v29  ;;  %v13243_v29 = vld [vmem:[#allocation3 + $0x8] sm:$0xff]   ;;  %v6794_v55 = vrot.slane %v6792_v34, 2 }
 0x3df   : > { %v6755_v37 = vrot.slane %v6753_v50, 1 }
 0x3e1   : > { %v6759_v0 = vor.u32 %v6758_v6, %v6755_v37  ;;  %v13292_v37 = vld [vmem:[#allocation3 + $0x18] sm:$0xff]   ;;  %v13295_v6 = vld [vmem:[#allocation3 + $0x80] sm:$0xff]  }
 0x3e2   : > { %14161 = vst [vmem:[#allocation14_spill] sm:$0xff] %v13295_v6 }
 0x3e3   : > { %v13278_v7 = vsel %vm2250_vm13, %v6750_v13, %v6759_v0 }
 0x3e4   : > { %14159 = vst [vmem:[#allocation12_spill] sm:$0xff] %v13278_v7 }
 0x3e5   : > { %10318 = vmatmul.mubr.bf16.gmra.mrb[28].mxu1 %v5391_v35  ;;  %v6765_v35 = vshll.u32 %v13223_v5, 16 }
 0x3e6   : > { %10337 = vmatprep.mubr.bf16.mxu1 %v12833_v40  ;;  %v6714_v40 = vor.u32 %v6713_v17, %v6710_v4  ;;  %v6764_v4 = vrot.slane %v6762_v1, 1  ;;  %v6801_v1 = vshll.u32 %v13261_v19, 16 }
 0x3e7   : > { %v6767_v17 = vrot.slane %v6765_v35, 2  ;;  %v6807_v35 = vshrl.u32 %v13266_v3, 16 }
 0x3e8   : > { %v13233_v27 = vsel %vm2250_vm13, %v6706_v14, %v6714_v40  ;;  %v13239_v25 = vsel %vm2250_vm13, %v6714_v40, %v6723_v20  ;;  %v13270_v14 = vld [vmem:[#allocation3 + $0x70] sm:$0xff]   ;;  %v13273_v40 = vsel %vm2250_vm13, %v6741_v36, %v6750_v13  ;;  %v6789_v20 = vshrl.u32 %v13246_v60, 16 }
 0x3e9   : > { %14154 = vst [vmem:[#allocation7_spill] sm:$0xff] %v13233_v27  ;;  %14155 = vst [vmem:[#allocation8_spill] sm:$0xff] %v13239_v25  ;;  %v6768_v58 = vor.u32 %v6767_v17, %v6764_v4  ;;  %v6800_v13 = vrot.slane %v6798_v33, 1  ;;  %v6810_v4 = vshll.u32 %v13266_v3, 16  ;;  %v6816_v17 = vshrl.u32 %v13270_v14, 16  ;;  %v13314_v33 = vld [vmem:[#allocation3 + $0x90] sm:$0xff]  }
 0x3ea   : > { %14158 = vst [vmem:[#allocation11_spill] sm:$0xff] %v13273_v40  ;;  %v6791_v50 = vrot.slane %v6789_v20, 1  ;;  %v6809_v20 = vrot.slane %v6807_v35, 1  ;;  %14165 = vst [vmem:[#allocation18_spill] sm:$0xff] %v13314_v33  ;;  %v6855_v7 = vshll.u32 %v13314_v33, 16 }
 0x3eb   : > { %v13285_v23 = vsel %vm2250_vm13, %v6759_v0, %v6768_v58  ;;  %v13299_v0 = vld [vmem:[#allocation3 + $0x20] sm:$0xff]   ;;  %v6812_v34 = vrot.slane %v6810_v4, 2 }
 0x3ec   : > { %14160 = vst [vmem:[#allocation13_spill] sm:$0xff] %v13285_v23  ;;  %v6795_v16 = vor.u32 %v6794_v55, %v6791_v50  ;;  %v6834_v23 = vshrl.u32 %v13295_v6, 16 }
 0x3ed   : > { %10338 = vmatmul.mubr.bf16.vlgmr.msra.gmra.mrb[32].mxu1 %v13243_v29  ;;  %v6813_v35 = vor.u32 %v6812_v34, %v6809_v20 }
 0x3ee   : > { %10374 = vmatpush3.bf16.msra.mxu1 %v13104_v31  ;;  %10341 = vmatprep.mubr.bf16.mxu1 %v13251_v10  ;;  %v13264_v31 = vsel %vm2250_vm13, %v6732_v46, %v6741_v36  ;;  %v6785_v46 = vrot.slane %v6783_v8, 2  ;;  %v6777_v36 = vor.u32 %v6776_v41, %v6773_v49  ;;  %v13302_v49 = vld [vmem:[#allocation3 + $0x88] sm:$0xff]   ;;  %v6803_v8 = vrot.slane %v6801_v1, 2  ;;  %v11484_v41 = vld [vmem:[%s14132_s4 + $0xa0] sm:$0xff]  }
 0x3ef   : > { %10375 = vmatprep.subr.bf16.mxu1 %v11481_v30  ;;  %14157 = vst [vmem:[#allocation10_spill] sm:$0xff] %v13264_v31  ;;  %14162 = vst [vmem:[#allocation15_spill] sm:$0xff] %v13302_v49  ;;  %v6836_v34 = vrot.slane %v6834_v23, 1 }
 0x3f0   : > { %v6786_v47 = vor.u32 %v6785_v46, %v6782_v51  ;;  %v13305_v61 = vsel %vm2250_vm13, %v6768_v58, %v6777_v36  ;;  %v6818_v46 = vrot.slane %v6816_v17, 1  ;;  %v6804_v50 = vor.u32 %v6803_v8, %v6800_v13  ;;  %v11485_v13 = vld [vmem:[%s14132_s4 + $0xa8] sm:$0xff]  }
 0x3f1   : > { %14163 = vst [vmem:[#allocation16_spill] sm:$0xff] %v13305_v61 }
 0x3f2   : > { %10376 = vmatpush3.bf16.msra.mxu1 %v11481_v30  ;;  %v13288_v30 = vld [vmem:[#allocation3 + $0x78] sm:$0xff]   ;;  %v13311_v51 = vsel %vm2250_vm13, %v6777_v36, %v6786_v47  ;;  %v13317_v58 = vsel %vm2250_vm13, %v6786_v47, %v6795_v16  ;;  %v6837_v36 = vshll.u32 %v13295_v6, 16  ;;  %v13324_v4 = vsel %vm2250_vm13, %v6795_v16, %v6804_v50 }
 0x3f3   : > { %10377 = vmatprep.subr.bf16.mxu1 %v11482_v38  ;;  %14164 = vst [vmem:[#allocation17_spill] sm:$0xff] %v13311_v51  ;;  %14166 = vst [vmem:[#allocation19_spill] sm:$0xff] %v13317_v58  ;;  %v6825_v55 = vshrl.u32 %v13288_v30, 16  ;;  %v6828_v1 = vshll.u32 %v13288_v30, 16  ;;  %v6843_v47 = vshrl.u32 %v13302_v49, 16  ;;  %v13331_v8 = vsel %vm2250_vm13, %v6804_v50, %v6813_v35 }
 0x3f4   : > { %14167 = vst [vmem:[#allocation20_spill] sm:$0xff] %v13324_v4  ;;  %14168 = vst [vmem:[#allocation21_spill] sm:$0xff] %v13331_v8  ;;  %v6846_v16 = vshll.u32 %v13302_v49, 16 }
 0x3f5   : > { %10342 = vmatmul.mubr.bf16.gmra.mrb[0].mxu1 %v13292_v37  ;;  %v6827_v17 = vrot.slane %v6825_v55, 1  ;;  %v6830_v51 = vrot.slane %v6828_v1, 2  ;;  %v6852_v55 = vshrl.u32 %v13314_v33, 16 }
 0x3f6   : > { %10345 = vmatprep.mubr.bf16.mxu1 %v13299_v0  ;;  %10378 = vmatpush3.bf16.msra.mxu1 %v11482_v38  ;;  %v6819_v38 = vshll.u32 %v13270_v14, 16 }
 0x3f7   : > { %10379 = vmatprep.subr.bf16.mxu1 %v11483_v2  ;;  %v6831_v58 = vor.u32 %v6830_v51, %v6827_v17  ;;  %v6854_v51 = vrot.slane %v6852_v55, 1 }
 0x3f8   : > { %v6821_v61 = vrot.slane %v6819_v38, 2  ;;  %v6839_v38 = vrot.slane %v6837_v36, 2 }
 0x3fa   : > { %10380 = vmatpush3.bf16.msra.mxu1 %v11483_v2  ;;  %v6822_v20 = vor.u32 %v6821_v61, %v6818_v46  ;;  %v6845_v2 = vrot.slane %v6843_v47, 1  ;;  %v6840_v4 = vor.u32 %v6839_v38, %v6836_v34  ;;  %v6848_v61 = vrot.slane %v6846_v16, 2  ;;  %v7148_v46 = vld [vmem:[#allocation3 + $0x8] sm:$0xc] }
 0x3fb   : > { %10381 = vmatprep.subr.bf16.mxu1 %v11484_v41  ;;  %v9380_v36 = vcombine.low %v7148_v46, %v13195_v45  ;;  %v7174_v34 = vrot.slane %v13205_v62, 2  ;;  %v7176_v38 = vrot.slane %v13207_v43, 2  ;;  %v7178_v45 = vrot.slane %v13210_v42, 2 }
 0x3fc   : > { %v13337_v1 = vsel %vm2250_vm13, %v6813_v35, %v6822_v20  ;;  %v13342_v23 = vsel %vm2250_vm13, %v6822_v20, %v6831_v58  ;;  %v13348_v50 = vsel %vm2250_vm13, %v6831_v58, %v6840_v4  ;;  %v6857_v35 = vrot.slane %v6855_v7, 2  ;;  %v11487_v58 = vld [vmem:[%s14132_s4 + $0xb8] sm:$0xff]  }
 0x3fd   : > { %10346 = vmatmul.mubr.bf16.gmra.mrb[4].mxu1 %v13004_v9  ;;  %14169 = vst [vmem:[#allocation22_spill] sm:$0xff] %v13337_v1  ;;  %14170 = vst [vmem:[#allocation23_spill] sm:$0xff] %v13342_v23  ;;  %v11486_v9 = vld [vmem:[%s14132_s4 + $0xb0] sm:$0xff]   ;;  %v6849_v17 = vor.u32 %v6848_v61, %v6845_v2  ;;  %v7169_v20 = vrot.slane %v9380_v36, 2  ;;  %v7180_v46 = vrot.slane %v13218_v21, 2  ;;  %v7184_v36 = vrot.slane %v13227_v44, 2 }
 0x3fe   : > { %10349 = vmatprep.mubr.bf16.mxu1 %v13022_v11  ;;  %10382 = vmatpush3.bf16.msra.mxu1 %v11484_v41  ;;  %14171 = vst [vmem:[#allocation24_spill] sm:$0xff] %v13348_v50  ;;  %v7170_v11 = vrot.slane %v13200_v48, 2  ;;  %v7172_v41 = vrot.slane %v13202_v28, 2  ;;  %v13353_v47 = vor.u32 %v6857_v35, %v6854_v51  ;;  %v13380_v61 = vld [vmem:[#allocation3 + $0x98] ss:$0 sps:$4 sm:$0x33]   ;;  %v13383_v51 = vsel %vm2697_vm14, %v7176_v38, %v7178_v45 }
 0x3ff   : > { %10383 = vmatprep.subr.bf16.mxu1 %v11485_v13  ;;  %v13358_v16 = vsel %vm2250_vm13, %v6840_v4, %v6849_v17  ;;  %14179 = vst [vmem:[#allocation32_spill] sm:$0xff] %v13380_v61  ;;  %14180 = vst [vmem:[#allocation33_spill] sm:$0xff] %v13383_v51  ;;  %v7182_v35 = vrot.slane %v13223_v5, 2  ;;  %v13404_v51 = vld [vmem:[%s14132_s4 + $0xc0] sm:$0xff]   ;;  %v13479_v23 = vld [vmem:[#allocation3 + $0x48] sm:$0xff]  }
 0x400   : > { %14172 = vst [vmem:[#allocation25_spill] sm:$0xff] %v13353_v47  ;;  %14173 = vst [vmem:[#allocation26_spill] sm:$0xff] %v13358_v16  ;;  %v13361_v7 = vsel %vm2697_vm14, %v7170_v11, %v7172_v41  ;;  %v13369_v2 = vsel %vm2250_vm13, %v6849_v17, %v13353_v47  ;;  %v13372_v55 = vsel %vm2697_vm14, %v7169_v20, %v7170_v11  ;;  %v7186_v17 = vrot.slane %v13236_v53, 2 }
 0x401   : > { %14174 = vst [vmem:[#allocation27_spill] sm:$0xff] %v13361_v7  ;;  %14175 = vst [vmem:[#allocation28_spill] sm:$0xff] %v13369_v2  ;;  %v13375_v4 = vsel %vm2697_vm14, %v7172_v41, %v7174_v34  ;;  %v7188_v11 = vrot.slane %v13246_v60, 2  ;;  %v7190_v41 = vrot.slane %v13261_v19, 2  ;;  %v13394_v20 = vsel %vm2697_vm14, %v7178_v45, %v7180_v46 }
 0x402   : > { %10384 = vmatpush3.bf16.msra.mxu1 %v11485_v13  ;;  %14176 = vst [vmem:[#allocation29_spill] sm:$0xff] %v13372_v55  ;;  %14177 = vst [vmem:[#allocation30_spill] sm:$0xff] %v13375_v4  ;;  %v13378_v13 = vsel %vm2697_vm14, %v7174_v34, %v7176_v38  ;;  %v13397_v34 = vsel %vm2697_vm14, %v7180_v46, %v7182_v35  ;;  %v7192_v38 = vrot.slane %v13266_v3, 2 }
 0x403   : > { %10385 = vmatprep.subr.bf16.mxu1 %v11486_v9  ;;  %14178 = vst [vmem:[#allocation31_spill] sm:$0xff] %v13378_v13  ;;  %14181 = vst [vmem:[#allocation34_spill] sm:$0xff] %v13394_v20  ;;  %v13407_v13 = vsel %vm2697_vm14, %v7182_v35, %v7184_v36  ;;  %v13416_v45 = vsel %vm2697_vm14, %v7188_v11, %v7190_v41  ;;  %v7196_v20 = vrot.slane %v13288_v30, 2  ;;  %v7198_v35 = vrot.slane %v13295_v6, 2 }
 0x404   : > { %14182 = vst [vmem:[#allocation35_spill] sm:$0xff] %v13397_v34  ;;  %14183 = vst [vmem:[#allocation36_spill] sm:$0xff] %v13407_v13  ;;  %v13419_v46 = vsel %vm2697_vm14, %v7190_v41, %v7192_v38  ;;  %v7200_v13 = vrot.slane %v13302_v49, 2 }
 0x405   : > { %10350 = vmatmul.mubr.bf16.gmra.mrb[8].mxu1 %v13054_v24  ;;  %v7194_v24 = vrot.slane %v13270_v14, 2  ;;  %14186 = vst [vmem:[#allocation39_spill] sm:$0xff] %v13416_v45  ;;  %14187 = vst [vmem:[#allocation40_spill] sm:$0xff] %v13419_v46  ;;  %v13433_v41 = vsel %vm2697_vm14, %v7196_v20, %v7198_v35  ;;  %v7485_v45 = vld [vmem:[#allocation3 + $0x10] sm:$0xc] }
 0x406   : > { %10353 = vmatprep.mubr.bf16.mxu1 %v13068_v57  ;;  %10386 = vmatpush3.bf16.msra.mxu1 %v11486_v9  ;;  %v13410_v57 = vsel %vm2697_vm14, %v7184_v36, %v7186_v17  ;;  %v13413_v9 = vsel %vm2697_vm14, %v7186_v17, %v7188_v11  ;;  %v7202_v36 = vrot.slane %v13314_v33, 2  ;;  %v7204_v17 = vrot.slane %v13380_v61, 2  ;;  %14190 = vst [vmem:[#allocation43_spill] sm:$0xff] %v13433_v41 }
 0x407   : > { %10387 = vmatprep.subr.bf16.mxu1 %v11487_v58  ;;  %14184 = vst [vmem:[#allocation37_spill] sm:$0xff] %v13410_v57  ;;  %14185 = vst [vmem:[#allocation38_spill] sm:$0xff] %v13413_v9  ;;  %v13422_v34 = vsel %vm2697_vm14, %v7192_v38, %v7194_v24  ;;  %v13430_v11 = vsel %vm2697_vm14, %v7194_v24, %v7196_v20  ;;  %v13437_v38 = vsel %vm2697_vm14, %v7198_v35, %v7200_v13  ;;  %v13447_v24 = vld [vmem:[#allocation3 + $0x14] sm:$0xf]  ;;  %v11592_v20 = vld [vmem:[#allocation3 + $0x4] sm:$0xf] }
 0x408   : > { %14188 = vst [vmem:[#allocation41_spill] sm:$0xff] %v13422_v34  ;;  %14189 = vst [vmem:[#allocation42_spill] sm:$0xff] %v13430_v11  ;;  %v13440_v34 = vsel %vm2697_vm14, %v7200_v13, %v7202_v36  ;;  %v13443_v46 = vsel %vm2697_vm14, %v7202_v36, %v7204_v17  ;;  %v13450_v11 = vcombine.low %v7485_v45, %v13447_v24  ;;  %v13452_v35 = vld [vmem:[#allocation3 + $0x18] sm:$0xff]   ;;  %v13454_v13 = vld [vmem:[#allocation3 + $0x20] sm:$0xff]  }
 0x409   : > { %14191 = vst [vmem:[#allocation44_spill] sm:$0xff] %v13437_v38  ;;  %14192 = vst [vmem:[#allocation45_spill] sm:$0xff] %v13440_v34  ;;  %v13456_v34 = vld [vmem:[#allocation3 + $0x28] sm:$0xff]   ;;  %v7987_v38 = vshrl.u32 %v13454_v13, 16  ;;  %v13473_v9 = vld [vmem:[#allocation3 + $0x40] sm:$0xff]  }
 0x40a   : > { %10388 = vmatpush3.bf16.msra.mxu1 %v11487_v58  ;;  %14193 = vst [vmem:[#allocation46_spill] sm:$0xff] %v13443_v46  ;;  %v5878_v58 = vld [vmem:[#allocation3] sm:$0xe]  ;;  %14194 = vst [vmem:[#allocation47_spill] sm:$0xff] %v13450_v11  ;;  %v7970_v17 = vshrl.u32 %v13450_v11, 16  ;;  %v7978_v46 = vshrl.u32 %v13452_v35, 16 }
 0x40b   : > { %10425 = vmatprep.subr.bf16.mxu1 %v13404_v51  ;;  %v9287_v41 = vcombine.low %v5878_v58, %v11592_v20  ;;  %v13467_v58 = vld [vmem:[#allocation3 + $0x38] sm:$0xff]   ;;  %v7981_v20 = vshll.u32 %v13452_v35, 16  ;;  %v7996_v7 = vshrl.u32 %v13456_v34, 16  ;;  %v7989_v55 = vrot.slane %v7987_v38, 2 }
 0x40c   : > { %v7972_v57 = vrot.slane %v7970_v17, 2  ;;  %v7980_v4 = vrot.slane %v7978_v46, 2  ;;  %v7999_v47 = vshll.u32 %v13456_v34, 16  ;;  %v8014_v1 = vshrl.u32 %v13467_v58, 16 }
 0x40d   : > { %10354 = vmatmul.mubr.bf16.gmra.mrb[12].mxu1 %v13114_v52  ;;  %v13458_v36 = vrot.slane %v9287_v41, 1  ;;  %v13460_v52 = vld [vmem:[#allocation3 + $0x30] sm:$0xff]   ;;  %v7990_v41 = vshll.u32 %v13454_v13, 16  ;;  %v7998_v16 = vrot.slane %v7996_v7, 2  ;;  %v13486_v7 = vld [vmem:[#allocation3 + $0x58] sm:$0xff]  }
 0x40e   : > { %10357 = vmatprep.mubr.bf16.mxu1 %v13125_v22  ;;  %v7973_v22 = vshll.u32 %v13450_v11, 16  ;;  %v8005_v61 = vshrl.u32 %v13460_v52, 16  ;;  %v8008_v50 = vshll.u32 %v13460_v52, 16  ;;  %v8001_v46 = vrot.slane %v7999_v47, 3 }
 0x40f   : > { %v7992_v45 = vrot.slane %v7990_v41, 3  ;;  %v8017_v41 = vshll.u32 %v13467_v58, 16  ;;  %v8053_v59 = vshll.u32 %v13486_v7, 16 }
 0x410   : > { %v7975_v11 = vrot.slane %v7973_v22, 3  ;;  %v8010_v38 = vrot.slane %v8008_v50, 3  ;;  %v8002_v40 = vor.u32 %v8001_v46, %v7998_v16  ;;  %v13496_v50 = vld [vmem:[#allocation3 + $0x60] sm:$0xff]  }
 0x411   : > { %v7993_v22 = vor.u32 %v7992_v45, %v7989_v55  ;;  %v8019_v47 = vrot.slane %v8017_v41, 3 }
 0x412   : > { %v7976_v2 = vor.u32 %v7975_v11, %v7972_v57  ;;  %v8023_v57 = vshrl.u32 %v13473_v9, 16 }
 0x414   : > { %v8025_v45 = vrot.slane %v8023_v57, 2  ;;  %v8050_v57 = vshrl.u32 %v13486_v7, 16 }
 0x415   : > { %10358 = vmatmul.mubr.bf16.gmra.mrb[16].mxu1 %v13141_v39  ;;  %v7983_v39 = vrot.slane %v7981_v20, 3  ;;  %v8007_v20 = vrot.slane %v8005_v61, 2  ;;  %v8026_v61 = vshll.u32 %v13473_v9, 16 }
 0x416   : > { %10361 = vmatprep.mubr.bf16.mxu1 %v13146_v32  ;;  %v13481_v32 = vld [vmem:[#allocation3 + $0x50] sm:$0xff]  }
 0x417   : > { %v7984_v17 = vor.u32 %v7983_v39, %v7980_v4  ;;  %v8016_v4 = vrot.slane %v8014_v1, 2  ;;  %v8011_v55 = vor.u32 %v8010_v38, %v8007_v20  ;;  %v13499_v39 = vsel %vm3450_vm15, %v7993_v22, %v8002_v40  ;;  %v13505_v1 = vld [vmem:[#allocation3 + $0x68] sm:$0xff]  }
 0x418   : > { %14197 = vst [vmem:[#allocation50_spill] sm:$0xff] %v13499_v39  ;;  %v8044_v20 = vshll.u32 %v13481_v32, 16  ;;  %v13512_v39 = vld [vmem:[#allocation3 + $0x70] sm:$0xff]  }
 0x419   : > { %v13489_v11 = vsel %vm3450_vm15, %v7976_v2, %v7984_v17  ;;  %v13492_v8 = vsel %vm3450_vm15, %v7984_v17, %v7993_v22  ;;  %v8032_v2 = vshrl.u32 %v13479_v23, 16  ;;  %v8041_v17 = vshrl.u32 %v13481_v32, 16 }
 0x41a   : > { %14195 = vst [vmem:[#allocation48_spill] sm:$0xff] %v13489_v11  ;;  %14196 = vst [vmem:[#allocation49_spill] sm:$0xff] %v13492_v8  ;;  %v8035_v11 = vshll.u32 %v13479_v23, 16  ;;  %v13508_v16 = vsel %vm3450_vm15, %v8002_v40, %v8011_v55  ;;  %v8020_v46 = vor.u32 %v8019_v47, %v8016_v4  ;;  %v8046_v31 = vrot.slane %v8044_v20, 3  ;;  %v13518_v40 = vld [vmem:[#allocation3 + $0x78] sm:$0xff]  }
 0x41b   : > { %14198 = vst [vmem:[#allocation51_spill] sm:$0xff] %v13508_v16  ;;  %v8034_v38 = vrot.slane %v8032_v2, 2  ;;  %v8043_v41 = vrot.slane %v8041_v17, 2  ;;  %v8052_v47 = vrot.slane %v8050_v57, 2  ;;  %v13522_v2 = vld [vmem:[#allocation3 + $0x80] sm:$0xff]  }
 0x41c   : > { %v8037_v22 = vrot.slane %v8035_v11, 3  ;;  %v13515_v8 = vsel %vm3450_vm15, %v8011_v55, %v8020_v46  ;;  %v8062_v11 = vshll.u32 %v13496_v50, 16  ;;  %v8055_v55 = vrot.slane %v8053_v59, 3  ;;  %v13539_v59 = vld [vmem:[#allocation3 + $0x90] sm:$0xff]  }
 0x41d   : > { %10362 = vmatmul.mubr.bf16.gmra.mrb[20].mxu1 %v13152_v26  ;;  %v8028_v26 = vrot.slane %v8026_v61, 3  ;;  %14199 = vst [vmem:[#allocation52_spill] sm:$0xff] %v13515_v8  ;;  %v8059_v61 = vshrl.u32 %v13496_v50, 16  ;;  %v8047_v16 = vor.u32 %v8046_v31, %v8043_v41  ;;  %v8113_v49 = vshrl.u32 %v13539_v59, 16 }
 0x41e   : > { %10365 = vmatprep.mubr.bf16.mxu1 %v13154_v63  ;;  %v8038_v4 = vor.u32 %v8037_v22, %v8034_v38  ;;  %v8064_v8 = vrot.slane %v8062_v11, 3  ;;  %v8071_v38 = vshll.u32 %v13505_v1, 16  ;;  %v13532_v22 = vld [vmem:[#allocation3 + $0x88] sm:$0xff]   ;;  %v8056_v25 = vor.u32 %v8055_v55, %v8052_v47 }
 0x41f   : > { %v8029_v63 = vor.u32 %v8028_v26, %v8025_v45  ;;  %v8068_v45 = vshrl.u32 %v13505_v1, 16  ;;  %v8061_v20 = vrot.slane %v8059_v61, 2  ;;  %v8086_v61 = vshrl.u32 %v13518_v40, 16 }
 0x420   : > { %v13535_v57 = vsel %vm3450_vm15, %v8038_v4, %v8047_v16  ;;  %v8073_v41 = vrot.slane %v8071_v38, 3  ;;  %v13545_v11 = vsel %vm3450_vm15, %v8047_v16, %v8056_v25  ;;  %v8089_v47 = vshll.u32 %v13518_v40, 16 }
 0x421   : > { %v13525_v17 = vsel %vm3450_vm15, %v8020_v46, %v8029_v63  ;;  %v13529_v26 = vsel %vm3450_vm15, %v8029_v63, %v8038_v4  ;;  %14202 = vst [vmem:[#allocation55_spill] sm:$0xff] %v13535_v57  ;;  %v8070_v27 = vrot.slane %v8068_v45, 2  ;;  %v8077_v46 = vshrl.u32 %v13512_v39, 16  ;;  %14203 = vst [vmem:[#allocation56_spill] sm:$0xff] %v13545_v11  ;;  %v13549_v45 = vld [vmem:[#allocation3 + $0x98] sm:$0xff]  }
 0x422   : > { %14200 = vst [vmem:[#allocation53_spill] sm:$0xff] %v13525_v17  ;;  %14201 = vst [vmem:[#allocation54_spill] sm:$0xff] %v13529_v26  ;;  %v8065_v31 = vor.u32 %v8064_v8, %v8061_v20  ;;  %v8080_v63 = vshll.u32 %v13512_v39, 16  ;;  %v8095_v55 = vshrl.u32 %v13522_v2, 16  ;;  %v8088_v38 = vrot.slane %v8086_v61, 2 }
 0x423   : > { %v8079_v4 = vrot.slane %v8077_v46, 2  ;;  %v8074_v8 = vor.u32 %v8073_v41, %v8070_v27  ;;  %v8091_v57 = vrot.slane %v8089_v47, 3  ;;  %v8098_v17 = vshll.u32 %v13522_v2, 16 }
 0x424   : > { %v8082_v20 = vrot.slane %v8080_v63, 3  ;;  %v8097_v26 = vrot.slane %v8095_v55, 2  ;;  %v8104_v16 = vshrl.u32 %v13532_v22, 16  ;;  %v8107_v33 = vshll.u32 %v13532_v22, 16  ;;  %v8418_v55 = vld [vmem:[#allocation3 + $0x10] sm:$0x8] }
 0x425   : > { %10366 = vmatmul.mubr.bf16.gmra.mrb[24].mxu1 %v13162_v15  ;;  %v13552_v15 = vsel %vm3450_vm15, %v8056_v25, %v8065_v31  ;;  %v13557_v46 = vsel %vm3450_vm15, %v8065_v31, %v8074_v8  ;;  %v8092_v6 = vor.u32 %v8091_v57, %v8088_v38  ;;  %v8100_v25 = vrot.slane %v8098_v17, 3 }
 0x426   : > { %10369 = vmatprep.mubr.bf16.mxu1 %v13173_v12  ;;  %14204 = vst [vmem:[#allocation57_spill] sm:$0xff] %v13552_v15  ;;  %14205 = vst [vmem:[#allocation58_spill] sm:$0xff] %v13557_v46  ;;  %v8083_v11 = vor.u32 %v8082_v20, %v8079_v4  ;;  %v8106_v15 = vrot.slane %v8104_v16, 2  ;;  %v8116_v27 = vshll.u32 %v13539_v59, 16  ;;  %v8109_v63 = vrot.slane %v8107_v33, 3 }
 0x427   : > { %v8115_v61 = vrot.slane %v8113_v49, 2  ;;  %v8122_v47 = vshrl.u32 %v13549_v45, 16  ;;  %v8101_v4 = vor.u32 %v8100_v25, %v8097_v26  ;;  %v8125_v46 = vshll.u32 %v13549_v45, 16 }
 0x428   : > { %v13563_v41 = vsel %vm3450_vm15, %v8074_v8, %v8083_v11  ;;  %v13567_v31 = vsel %vm3450_vm15, %v8083_v11, %v8092_v6  ;;  %v8118_v20 = vrot.slane %v8116_v27, 3  ;;  %v14207_v17 = vrot.slane %v13243_v29, 1 }
 0x429   : > { %14206 = vst [vmem:[#allocation59_spill] sm:$0xff] %v13567_v31  ;;  %v5902_v33 = vrot.slane %v13251_v10, 1  ;;  %v8110_v49 = vor.u32 %v8109_v63, %v8106_v15  ;;  %v8124_v8 = vrot.slane %v8122_v47, 2  ;;  %v13577_v38 = vsel %vm3450_vm15, %v8092_v6, %v8101_v4 }
 0x42a   : > { %v5901_v57 = vsel %vm1497_vm12, %v13458_v36, %v14207_v17  ;;  %v8119_v11 = vor.u32 %v8118_v20, %v8115_v61  ;;  %v8127_v26 = vrot.slane %v8125_v46, 3  ;;  %v9473_v16 = vcombine.low %v8418_v55, %v13447_v24 }
 0x42b   : > { %v5904_v25 = vrot.slane %v13292_v37, 1  ;;  %v5906_v27 = vrot.slane %v13299_v0, 1  ;;  %v13583_v31 = vsel %vm3450_vm15, %v8101_v4, %v8110_v49  ;;  %v8440_v36 = vrot.slane %v13452_v35, 3 }
 0x42c   : > { %v13587_v10 = vsel %vm3450_vm15, %v8110_v49, %v8119_v11  ;;  %v13589_v15 = vor.u32 %v8127_v26, %v8124_v8  ;;  %v8439_v6 = vrot.slane %v9473_v16, 3  ;;  %v8442_v63 = vrot.slane %v13454_v13, 3 }
 0x42d   : > { %10370 = vmatmul.mubr.bf16.gmra.mrb[28].mxu1 %v13185_v56  ;;  %v14208_v46 = vmov %v14207_v17  ;;  %v8444_v37 = vrot.slane %v13456_v34, 3  ;;  %v8446_v0 = vrot.slane %v13460_v52, 3  ;;  %v8448_v61 = vrot.slane %v13467_v58, 3  ;;  %v11490_v17 = vld [vmem:[%s14132_s4 + $0xc8] sm:$0xff]  }
 0x42e   : > { %10389 = vmatprep.mubr.bf16.mxu1 %v5901_v57  ;;  %v5903_v24 = vsel %vm1497_vm12, %v14208_v46, %v5902_v33  ;;  %v13600_v47 = vsel %vm3450_vm15, %v8119_v11, %v13589_v15  ;;  %v13603_v55 = vsel %vm3897_vm1, %v8439_v6, %v8440_v36  ;;  %v13606_v4 = vsel %vm3897_vm1, %v8440_v36, %v8442_v63  ;;  %v13622_v11 = vld [vmem:[#allocation3 + $0xa0] ss:$0 sps:$4 sm:$0x77]  }
 0x42f   : > { %v8450_v29 = vrot.slane %v13473_v9, 3  ;;  %v5905_v20 = vsel %vm1497_vm12, %v5902_v33, %v5904_v25  ;;  %v13614_v57 = vsel %vm3897_vm1, %v8442_v63, %v8444_v37  ;;  %v13617_v49 = vsel %vm3897_vm1, %v8444_v37, %v8446_v0 }
 0x430   : > { %14209 = vst [vmem:[#allocation60_spill] sm:$0xff] %v13617_v49  ;;  %v13620_v8 = vsel %vm3897_vm1, %v8446_v0, %v8448_v61  ;;  %v8452_v33 = vrot.slane %v13479_v23, 3  ;;  %v8454_v16 = vrot.slane %v13481_v32, 3  ;;  %v8456_v36 = vrot.slane %v13486_v7, 3 }
 0x431   : > { %14210 = vst [vmem:[#allocation61_spill] sm:$0xff] %v13620_v8  ;;  %v13625_v26 = vsel %vm3897_vm1, %v8448_v61, %v8450_v29  ;;  %v8458_v6 = vrot.slane %v13496_v50, 3  ;;  %v8460_v63 = vrot.slane %v13505_v1, 3  ;;  %v8462_v46 = vrot.slane %v13512_v39, 3  ;;  %v11491_v8 = vld [vmem:[%s14132_s4 + $0xd0] sm:$0xff]  }
 0x432   : > { %14211 = vst [vmem:[#allocation62_spill] sm:$0xff] %v13625_v26  ;;  %v8464_v37 = vrot.slane %v13518_v40, 3  ;;  %v13636_v0 = vsel %vm3897_vm1, %v8450_v29, %v8452_v33  ;;  %v13639_v61 = vsel %vm3897_vm1, %v8452_v33, %v8454_v16  ;;  %v13642_v26 = vsel %vm3897_vm1, %v8454_v16, %v8456_v36 }
 0x433   : > { %14212 = vst [vmem:[#allocation63_spill] sm:$0xff] %v13639_v61  ;;  %14213 = vst [vmem:[#allocation64_spill] sm:$0xff] %v13642_v26  ;;  %v13649_v49 = vsel %vm3897_vm1, %v8456_v36, %v8458_v6  ;;  %v13655_v29 = vsel %vm3897_vm1, %v8460_v63, %v8462_v46  ;;  %v8468_v16 = vrot.slane %v13532_v22, 3  ;;  %v8470_v26 = vrot.slane %v13539_v59, 3  ;;  %v11593_v36 = vld [vmem:[#allocation3 + $0x28] sm:$0xff]  }
 0x434   : > { %14214 = vst [vmem:[#allocation65_spill] sm:$0xff] %v13649_v49  ;;  %v8472_v61 = vrot.slane %v13549_v45, 3  ;;  %v5908_v49 = vrot.slane %v11593_v36, 1  ;;  %v5907_v36 = vsel %vm1497_vm12, %v5904_v25, %v5906_v27  ;;  %v11494_v25 = vld [vmem:[%s14132_s4 + $0xe8] sm:$0xff]  }
 0x435   : > { %10390 = vmatmul.mubr.bf16.vlgmr.msra.gmra.mrb[32].mxu1 %v5903_v24  ;;  %v8466_v24 = vrot.slane %v13522_v2, 3 }
 0x436   : > { %10426 = vmatpush3.bf16.msra.mxu1 %v13404_v51  ;;  %10393 = vmatprep.mubr.bf16.mxu1 %v5905_v20  ;;  %v13652_v51 = vsel %vm3897_vm1, %v8458_v6, %v8460_v63  ;;  %v13658_v20 = vsel %vm3897_vm1, %v8462_v46, %v8464_v37  ;;  %v8474_v6 = vrot.slane %v13622_v11, 3  ;;  %v13671_v46 = vsel %vm3897_vm1, %v8468_v16, %v8470_v26 }
 0x437   : > { %10427 = vmatprep.subr.bf16.mxu1 %v11490_v17  ;;  %14215 = vst [vmem:[#allocation66_spill] sm:$0xff] %v13658_v20  ;;  %v13661_v33 = vsel %vm3897_vm1, %v8464_v37, %v8466_v24  ;;  %v13668_v63 = vsel %vm3897_vm1, %v8466_v24, %v8468_v16  ;;  %14218 = vst [vmem:[#allocation69_spill] sm:$0xff] %v13671_v46  ;;  %v13674_v37 = vsel %vm3897_vm1, %v8470_v26, %v8472_v61  ;;  %v11493_v26 = vld [vmem:[%s14132_s4 + $0xe0] sm:$0xff]   ;;  %v11594_v24 = vld [vmem:[#allocation3 + $0x30] sm:$0xff]  }
 0x438   : > { %14216 = vst [vmem:[#allocation67_spill] sm:$0xff] %v13661_v33  ;;  %14217 = vst [vmem:[#allocation68_spill] sm:$0xff] %v13668_v63  ;;  %v11492_v33 = vld [vmem:[%s14132_s4 + $0xd8] sm:$0xff]   ;;  %v13680_v20 = vsel %vm3897_vm1, %v8472_v61, %v8474_v6  ;;  %v5910_v16 = vrot.slane %v11594_v24, 1  ;;  %v11596_v6 = vld [vmem:[#allocation3 + $0x40] sm:$0xff]  }
 0x439   : > { %14219 = vst [vmem:[#allocation70_spill] sm:$0xff] %v13674_v37  ;;  %14220 = vst [vmem:[#allocation71_spill] sm:$0xff] %v13680_v20  ;;  %v11595_v37 = vld [vmem:[#allocation3 + $0x38] sm:$0xff]  }
 0x43a   : > { %10428 = vmatpush3.bf16.msra.mxu1 %v11490_v17  ;;  %v5909_v17 = vsel %vm1497_vm12, %v5906_v27, %v5908_v49  ;;  %v5912_v46 = vrot.slane %v11595_v37, 1  ;;  %v5911_v61 = vsel %vm1497_vm12, %v5908_v49, %v5910_v16  ;;  %v5914_v37 = vrot.slane %v11596_v6, 1  ;;  %v11496_v49 = vld [vmem:[%s14132_s4 + $0xf8] sm:$0xff]   ;;  %v11499_v24 = vld [vmem:[%s14132_s4 + $0x100] sm:$0xff]  }
 0x43b   : > { %10429 = vmatprep.subr.bf16.mxu1 %v11491_v8 }
 0x43c   : > { %v5913_v27 = vsel %vm1497_vm12, %v5910_v16, %v5912_v46  ;;  %v11598_v16 = vld [vmem:[#allocation3 + $0x50] sm:$0xff]  }
 0x43d   : > { %10394 = vmatmul.mubr.bf16.gmra.mrb[0].mxu1 %v5907_v36 }
 0x43e   : > { %10397 = vmatprep.mubr.bf16.mxu1 %v5909_v17  ;;  %10430 = vmatpush3.bf16.msra.mxu1 %v11491_v8  ;;  %v11495_v8 = vld [vmem:[%s14132_s4 + $0xf0] sm:$0xff]   ;;  %v5915_v17 = vsel %vm1497_vm12, %v5912_v46, %v5914_v37 }
 0x43f   : > { %10431 = vmatprep.subr.bf16.mxu1 %v11492_v33 }
 0x442   : > { %10432 = vmatpush3.bf16.msra.mxu1 %v11492_v33  ;;  %v11597_v33 = vld [vmem:[#allocation3 + $0x48] sm:$0xff]  }
 0x443   : > { %10433 = vmatprep.subr.bf16.mxu1 %v11493_v26  ;;  %v5916_v36 = vrot.slane %v11597_v33, 1 }
 0x445   : > { %10398 = vmatmul.mubr.bf16.gmra.mrb[4].mxu1 %v5911_v61  ;;  %v5918_v61 = vrot.slane %v11598_v16, 1  ;;  %v11602_v16 = vld [vmem:[#allocation3 + $0x70] sm:$0xff]  }
 0x446   : > { %10401 = vmatprep.mubr.bf16.mxu1 %v5913_v27  ;;  %10434 = vmatpush3.bf16.msra.mxu1 %v11493_v26  ;;  %v5917_v26 = vsel %vm1497_vm12, %v5914_v37, %v5916_v36  ;;  %v11600_v37 = vld [vmem:[#allocation3 + $0x60] sm:$0xff]  }
 0x447   : > { %10435 = vmatprep.subr.bf16.mxu1 %v11494_v25  ;;  %v5919_v6 = vsel %vm1497_vm12, %v5916_v36, %v5918_v61  ;;  %v5922_v33 = vrot.slane %v11600_v37, 1 }
 0x44a   : > { %10436 = vmatpush3.bf16.msra.mxu1 %v11494_v25  ;;  %v11599_v25 = vld [vmem:[#allocation3 + $0x58] sm:$0xff]  }
 0x44b   : > { %10437 = vmatprep.subr.bf16.mxu1 %v11495_v8  ;;  %v5920_v27 = vrot.slane %v11599_v25, 1  ;;  %v5926_v25 = vrot.slane %v11602_v16, 1  ;;  %v6362_v16 = vrot.slane %v13198_v54, 1 }
 0x44d   : > { %10402 = vmatmul.mubr.bf16.gmra.mrb[8].mxu1 %v5915_v17  ;;  %v5921_v46 = vsel %vm1497_vm12, %v5918_v61, %v5920_v27 }
 0x44e   : > { %10405 = vmatprep.mubr.bf16.mxu1 %v5917_v26  ;;  %10438 = vmatpush3.bf16.msra.mxu1 %v11495_v8  ;;  %v11601_v8 = vld [vmem:[#allocation3 + $0x68] sm:$0xff]   ;;  %v5923_v26 = vsel %vm1497_vm12, %v5920_v27, %v5922_v33 }
 0x44f   : > { %10439 = vmatprep.subr.bf16.mxu1 %v11496_v49  ;;  %v5924_v17 = vrot.slane %v11601_v8, 1 }
 0x451   : > { %v5925_v20 = vsel %vm1497_vm12, %v5922_v33, %v5924_v17  ;;  %v5927_v36 = vsel %vm1497_vm12, %v5924_v17, %v5926_v25  ;;  %v5932_v33 = vrot.slane %v13185_v56, 1  ;;  %v6367_v56 = vrot.slane %v13205_v62, 1 }
 0x452   : > { %10440 = vmatpush3.bf16.msra.mxu1 %v11496_v49  ;;  %v11603_v49 = vld [vmem:[#allocation3 + $0x78] sm:$0xff]   ;;  %v6371_v62 = vrot.slane %v13210_v42, 1  ;;  %v6373_v42 = vrot.slane %v13218_v21, 1  ;;  %v11519_v21 = vld [vmem:[%s14132_s4 + $0x130] sm:$0xff]  }
 0x453   : > { %10477 = vmatprep.subr.bf16.mxu1 %v11499_v24  ;;  %v5928_v63 = vrot.slane %v11603_v49, 1 }
 0x455   : > { %10406 = vmatmul.mubr.bf16.gmra.mrb[12].mxu1 %v5919_v6  ;;  %v5929_v61 = vsel %vm1497_vm12, %v5926_v25, %v5928_v63  ;;  %v6363_v25 = vrot.slane %v13200_v48, 1  ;;  %v11507_v48 = vld [vmem:[%s14132_s4 + $0x110] sm:$0xff]  }
 0x456   : > { %10409 = vmatprep.mubr.bf16.mxu1 %v5921_v46 }
 0x45d   : > { %10410 = vmatmul.mubr.bf16.gmra.mrb[16].mxu1 %v5923_v26  ;;  %v5934_v26 = vrot.slane %v13188_v18, 1 }
 0x45e   : > { %10413 = vmatprep.mubr.bf16.mxu1 %v5925_v20  ;;  %v5930_v20 = vrot.slane %v13173_v12, 1  ;;  %v6365_v12 = vrot.slane %v13202_v28, 1  ;;  %v6369_v28 = vrot.slane %v13207_v43, 1  ;;  %v11513_v43 = vld [vmem:[%s14132_s4 + $0x120] sm:$0xff]  }
 0x45f   : > { %v5935_v49 = vsel %vm1497_vm12, %v5932_v33, %v5934_v26 }
 0x460   : > { %v5931_v8 = vsel %vm1497_vm12, %v5928_v63, %v5930_v20  ;;  %v5933_v17 = vsel %vm1497_vm12, %v5930_v20, %v5932_v33  ;;  %v11503_v63 = vld [vmem:[%s14132_s4 + $0x108] sm:$0xff]   ;;  %v6366_v18 = vsel %vm1497_vm12, %v6363_v25, %v6365_v12  ;;  %v6368_v54 = vsel %vm1497_vm12, %v6365_v12, %v6367_v56 }
 0x461   : > { %v6370_v20 = vsel %vm1497_vm12, %v6367_v56, %v6369_v28  ;;  %v6375_v33 = vrot.slane %v13223_v5, 1  ;;  %v6377_v5 = vrot.slane %v13227_v44, 1  ;;  %v11524_v44 = vld [vmem:[%s14132_s4 + $0x140] sm:$0xff]   ;;  %v6383_v12 = vrot.slane %v13261_v19, 1 }
 0x462   : > { %v14221_v19 = vld [vmem:[#allocation14_spill] sm:$0xff] }
 0x463   : > { %v6376_v26 = vsel %vm1497_vm12, %v6373_v42, %v6375_v33 }
 0x464   : > { %v13708_v6 = vpop.f32.mrb[36].mxu0 }
 0x465   : > { %10414 = vmatmul.mubr.bf16.gmra.mrb[20].mxu1 %v5927_v36  ;;  %v13711_v46 = vpop.f32.mrb[37].mxu0  ;;  %v6364_v36 = vsel %vm1497_vm12, %v6362_v16, %v6363_v25  ;;  %v6379_v16 = vrot.slane %v13236_v53, 1  ;;  %v11522_v25 = vld [vmem:[%s14132_s4 + $0x138] sm:$0xff]   ;;  %v6381_v53 = vrot.slane %v13246_v60, 1  ;;  %v6389_v60 = vrot.slane %v13288_v30, 1 }
 0x466   : > { %10417 = vmatprep.mubr.bf16.mxu1 %v5929_v61  ;;  %v13713_v37 = vpop.f32.mrb[38].mxu0  ;;  %v11510_v61 = vld [vmem:[%s14132_s4 + $0x118] sm:$0xff]  }
 0x467   : > { %v13715_v27 = vpop.f32.mrb[39].mxu0  ;;  %v6382_v56 = vsel %vm1497_vm12, %v6379_v16, %v6381_v53 }
 0x46d   : > { %10418 = vmatmul.mubr.bf16.gmra.mrb[24].mxu1 %v5931_v8  ;;  %v11516_v8 = vld [vmem:[%s14132_s4 + $0x128] sm:$0xff]  }
 0x46e   : > { %10421 = vmatprep.mubr.bf16.mxu1 %v5933_v17  ;;  %v6374_v17 = vsel %vm1497_vm12, %v6371_v62, %v6373_v42 }
 0x475   : > { %10422 = vmatmul.mubr.bf16.gmra.mrb[28].mxu1 %v5935_v49  ;;  %v6378_v49 = vsel %vm1497_vm12, %v6375_v33, %v6377_v5  ;;  %v11523_v33 = vld [vmem:[#allocation3 + $0x98] ss:$0 sps:$4 sm:$0x11]  }
 0x476   : > { %10441 = vmatprep.mubr.bf16.mxu1 %v6364_v36  ;;  %v6380_v36 = vsel %vm1497_vm12, %v6377_v5, %v6379_v16  ;;  %v6397_v30 = vrot.slane %v11523_v33, 1  ;;  %v14225_v5 = vld [vmem:[#allocation8_spill] sm:$0xff]  ;;  %v14226_v16 = vld [vmem:[#allocation9_spill] sm:$0xff] }
 0x47d   : > { %10442 = vmatmul.mubr.bf16.vlgmr.msra.gmra.mrb[32].mxu1 %v6366_v18  ;;  %v6385_v18 = vrot.slane %v13266_v3, 1 }
 0x47e   : > { %10478 = vmatpush3.bf16.msra.mxu1 %v11499_v24  ;;  %10445 = vmatprep.mubr.bf16.mxu1 %v6368_v54  ;;  %v6372_v24 = vsel %vm1497_vm12, %v6369_v28, %v6371_v62  ;;  %v6387_v54 = vrot.slane %v13270_v14, 1  ;;  %v6391_v62 = vrot.slane %v14221_v19, 1  ;;  %v14233_v19 = vld [vmem:[#allocation19_spill] sm:$0xff] }
 0x47f   : > { %10479 = vmatprep.subr.bf16.mxu1 %v11503_v63 }
 0x480   : > { %v6388_v28 = vsel %vm1497_vm12, %v6385_v18, %v6387_v54 }
 0x482   : > { %10480 = vmatpush3.bf16.msra.mxu1 %v11503_v63  ;;  %v6384_v63 = vsel %vm1497_vm12, %v6381_v53, %v6383_v12  ;;  %v14228_v53 = vld [vmem:[#allocation11_spill] sm:$0xff] }
 0x483   : > { %10481 = vmatprep.subr.bf16.mxu1 %v11507_v48 }
 0x485   : > { %10446 = vmatmul.mubr.bf16.gmra.mrb[0].mxu1 %v6370_v20  ;;  %v6392_v20 = vsel %vm1497_vm12, %v6389_v60, %v6391_v62 }
 0x486   : > { %10449 = vmatprep.mubr.bf16.mxu1 %v6372_v24  ;;  %10482 = vmatpush3.bf16.msra.mxu1 %v11507_v48  ;;  %v6386_v48 = vsel %vm1497_vm12, %v6383_v12, %v6385_v18  ;;  %v14222_v24 = vld [vmem:[#allocation15_spill] sm:$0xff]  ;;  %v11530_v18 = vld [vmem:[%s14132_s4 + $0x170] sm:$0xff]  }
 0x487   : > { %10483 = vmatprep.subr.bf16.mxu1 %v11510_v61  ;;  %v6393_v3 = vrot.slane %v14222_v24, 1  ;;  %v11529_v12 = vld [vmem:[%s14132_s4 + $0x168] sm:$0xff]  }
 0x488   : > { %v14237_v24 = vld [vmem:[#allocation23_spill] sm:$0xff] }
 0x489   : > { %v6394_v42 = vsel %vm1497_vm12, %v6391_v62, %v6393_v3  ;;  %v14234_v62 = vld [vmem:[#allocation20_spill] sm:$0xff] }
 0x48a   : > { %10484 = vmatpush3.bf16.msra.mxu1 %v11510_v61  ;;  %v6390_v61 = vsel %vm1497_vm12, %v6387_v54, %v6389_v60  ;;  %v11531_v54 = vld [vmem:[%s14132_s4 + $0x178] sm:$0xff]   ;;  %v11534_v60 = vld [vmem:[%s14132_s4 + $0x180] sm:$0xff]  }
 0x48b   : > { %10485 = vmatprep.subr.bf16.mxu1 %v11513_v43 }
 0x48d   : > { %10450 = vmatmul.mubr.bf16.gmra.mrb[4].mxu1 %v6374_v17 }
 0x48e   : > { %10453 = vmatprep.mubr.bf16.mxu1 %v6376_v26  ;;  %10486 = vmatpush3.bf16.msra.mxu1 %v11513_v43  ;;  %v14223_v43 = vld [vmem:[#allocation18_spill] sm:$0xff]  ;;  %v14224_v26 = vld [vmem:[#allocation7_spill] sm:$0xff] }
 0x48f   : > { %10487 = vmatprep.subr.bf16.mxu1 %v11516_v8  ;;  %v6395_v14 = vrot.slane %v14223_v43, 1  ;;  %v14239_v43 = vld [vmem:[#allocation32_spill] sm:$0xff] }
 0x491   : > { %v6398_v17 = vsel %vm1497_vm12, %v6395_v14, %v6397_v30  ;;  %v14240_v30 = vld [vmem:[#allocation26_spill] sm:$0xff] }
 0x492   : > { %10488 = vmatpush3.bf16.msra.mxu1 %v11516_v8  ;;  %v6396_v8 = vsel %vm1497_vm12, %v6393_v3, %v6395_v14  ;;  %v14238_v3 = vld [vmem:[#allocation24_spill] sm:$0xff]  ;;  %v6861_v14 = vshrl.u32 %v14239_v43, 16 }
 0x493   : > { %10489 = vmatprep.subr.bf16.mxu1 %v11519_v21 }
 0x494   : > { %v6863_v33 = vrot.slane %v6861_v14, 1  ;;  %v14256_v14 = vld [vmem:[#allocation42_spill] sm:$0xff] }
 0x495   : > { %10454 = vmatmul.mubr.bf16.gmra.mrb[8].mxu1 %v6378_v49  ;;  %v11527_v49 = vld [vmem:[%s14132_s4 + $0x158] sm:$0xff]  }
 0x496   : > { %10457 = vmatprep.mubr.bf16.mxu1 %v6380_v36  ;;  %10490 = vmatpush3.bf16.msra.mxu1 %v11519_v21  ;;  %v11525_v21 = vld [vmem:[%s14132_s4 + $0x148] sm:$0xff]   ;;  %v14227_v36 = vld [vmem:[#allocation10_spill] sm:$0xff] }
 0x497   : > { %10491 = vmatprep.subr.bf16.mxu1 %v11522_v25 }
 0x49a   : > { %10492 = vmatpush3.bf16.msra.mxu1 %v11522_v25  ;;  %v11526_v25 = vld [vmem:[%s14132_s4 + $0x150] sm:$0xff]  }
 0x49b   : > { %10529 = vmatprep.subr.bf16.mxu1 %v11524_v44 }
 0x49d   : > { %10458 = vmatmul.mubr.bf16.gmra.mrb[12].mxu1 %v6382_v56  ;;  %v14229_v56 = vld [vmem:[#allocation12_spill] sm:$0xff] }
 0x49e   : > { %10461 = vmatprep.mubr.bf16.mxu1 %v6384_v63  ;;  %v14230_v63 = vld [vmem:[#allocation13_spill] sm:$0xff] }
 0x4a5   : > { %10462 = vmatmul.mubr.bf16.gmra.mrb[16].mxu1 %v6386_v48  ;;  %v14231_v48 = vld [vmem:[#allocation16_spill] sm:$0xff] }
 0x4a6   : > { %10465 = vmatprep.mubr.bf16.mxu1 %v6388_v28  ;;  %v14232_v28 = vld [vmem:[#allocation17_spill] sm:$0xff] }
 0x4ad   : > { %10466 = vmatmul.mubr.bf16.gmra.mrb[20].mxu1 %v6390_v61  ;;  %v14235_v61 = vld [vmem:[#allocation21_spill] sm:$0xff] }
 0x4ae   : > { %10469 = vmatprep.mubr.bf16.mxu1 %v6392_v20  ;;  %v14236_v20 = vld [vmem:[#allocation22_spill] sm:$0xff] }
 0x4b5   : > { %10470 = vmatmul.mubr.bf16.gmra.mrb[24].mxu1 %v6394_v42  ;;  %v6864_v42 = vshll.u32 %v14239_v43, 16  ;;  %v14255_v43 = vld [vmem:[#allocation41_spill] sm:$0xff] }
 0x4b6   : > { %10473 = vmatprep.mubr.bf16.mxu1 %v6396_v8 }
 0x4b7   : > { %v6866_v8 = vrot.slane %v6864_v42, 2  ;;  %v14257_v42 = vld [vmem:[#allocation43_spill] sm:$0xff] }
 0x4bd   : > { %10474 = vmatmul.mubr.bf16.gmra.mrb[28].mxu1 %v6398_v17  ;;  %v14241_v17 = vld [vmem:[#allocation28_spill] sm:$0xff] }
 0x4be   : > { %10493 = vmatprep.mubr.bf16.mxu1 %v14224_v26  ;;  %v6867_v26 = vor.u32 %v6866_v8, %v6863_v33  ;;  %v14258_v33 = vld [vmem:[#allocation44_spill] sm:$0xff]  ;;  %v14259_v8 = vld [vmem:[#allocation45_spill] sm:$0xff] }
 0x4c5   : > { %10494 = vmatmul.mubr.bf16.vlgmr.msra.gmra.mrb[32].mxu1 %v14225_v5 }
 0x4c6   : > { %10530 = vmatpush3.bf16.msra.mxu1 %v11524_v44  ;;  %10497 = vmatprep.mubr.bf16.mxu1 %v14226_v16  ;;  %v11528_v44 = vld [vmem:[%s14132_s4 + $0x160] sm:$0xff]   ;;  %v14243_v16 = vld [vmem:[#allocation29_spill] sm:$0xff] }
 0x4c7   : > { %10531 = vmatprep.subr.bf16.mxu1 %v11525_v21 }
 0x4ca   : > { %10532 = vmatpush3.bf16.msra.mxu1 %v11525_v21  ;;  %v14242_v21 = vld [vmem:[#allocation25_spill] sm:$0xff] }
 0x4cb   : > { %10533 = vmatprep.subr.bf16.mxu1 %v11526_v25  ;;  %v6868_v5 = vsel %vm2250_vm13, %v14242_v21, %v6867_v26  ;;  %v14261_v21 = vld [vmem:[#allocation46_spill] sm:$0xff] }
 0x4cd   : > { %10498 = vmatmul.mubr.bf16.gmra.mrb[0].mxu1 %v14227_v36  ;;  %v14245_v36 = vld [vmem:[#allocation30_spill] sm:$0xff] }
 0x4ce   : > { %10501 = vmatprep.mubr.bf16.mxu1 %v14228_v53  ;;  %10534 = vmatpush3.bf16.msra.mxu1 %v11526_v25  ;;  %v11535_v25 = vld [vmem:[%s14132_s4 + $0x188] sm:$0xff]   ;;  %v11536_v53 = vld [vmem:[%s14132_s4 + $0x190] sm:$0xff]  }
 0x4cf   : > { %10535 = vmatprep.subr.bf16.mxu1 %v11527_v49 }
 0x4d2   : > { %10536 = vmatpush3.bf16.msra.mxu1 %v11527_v49  ;;  %v14244_v49 = vld [vmem:[#allocation27_spill] sm:$0xff] }
 0x4d3   : > { %10537 = vmatprep.subr.bf16.mxu1 %v11528_v44 }
 0x4d5   : > { %10502 = vmatmul.mubr.bf16.gmra.mrb[4].mxu1 %v14229_v56  ;;  %v14247_v56 = vld [vmem:[#allocation33_spill] sm:$0xff] }
 0x4d6   : > { %10505 = vmatprep.mubr.bf16.mxu1 %v14230_v63  ;;  %10538 = vmatpush3.bf16.msra.mxu1 %v11528_v44  ;;  %v11537_v44 = vld [vmem:[%s14132_s4 + $0x198] sm:$0xff]   ;;  %v11538_v63 = vld [vmem:[%s14132_s4 + $0x1a0] sm:$0xff]  }
 0x4d7   : > { %10539 = vmatprep.subr.bf16.mxu1 %v11529_v12 }
 0x4da   : > { %10540 = vmatpush3.bf16.msra.mxu1 %v11529_v12  ;;  %v14246_v12 = vld [vmem:[#allocation31_spill] sm:$0xff] }
 0x4db   : > { %10541 = vmatprep.subr.bf16.mxu1 %v11530_v18 }
 0x4dd   : > { %10506 = vmatmul.mubr.bf16.gmra.mrb[8].mxu1 %v14231_v48  ;;  %v14249_v48 = vld [vmem:[#allocation35_spill] sm:$0xff] }
 0x4de   : > { %10509 = vmatprep.mubr.bf16.mxu1 %v14232_v28  ;;  %10542 = vmatpush3.bf16.msra.mxu1 %v11530_v18  ;;  %v11539_v18 = vld [vmem:[%s14132_s4 + $0x1a8] sm:$0xff]   ;;  %v11540_v28 = vld [vmem:[%s14132_s4 + $0x1b0] sm:$0xff]  }
 0x4df   : > { %10543 = vmatprep.subr.bf16.mxu1 %v11531_v54 }
 0x4e2   : > { %10544 = vmatpush3.bf16.msra.mxu1 %v11531_v54  ;;  %v14248_v54 = vld [vmem:[#allocation34_spill] sm:$0xff] }
 0x4e3   : > { %10581 = vmatprep.subr.bf16.mxu1 %v11534_v60 }
 0x4e5   : > { %10510 = vmatmul.mubr.bf16.gmra.mrb[12].mxu1 %v14233_v19  ;;  %v14250_v19 = vld [vmem:[#allocation36_spill] sm:$0xff] }
 0x4e6   : > { %10513 = vmatprep.mubr.bf16.mxu1 %v14234_v62  ;;  %v14251_v62 = vld [vmem:[#allocation37_spill] sm:$0xff] }
 0x4ed   : > { %10514 = vmatmul.mubr.bf16.gmra.mrb[16].mxu1 %v14235_v61  ;;  %v11544_v61 = vld [vmem:[%s14132_s4 + $0x1c0] sm:$0xff]  }
 0x4ee   : > { %10517 = vmatprep.mubr.bf16.mxu1 %v14236_v20  ;;  %v14252_v20 = vld [vmem:[#allocation38_spill] sm:$0xff] }
 0x4f5   : > { %10518 = vmatmul.mubr.bf16.gmra.mrb[20].mxu1 %v14237_v24  ;;  %v14253_v24 = vld [vmem:[#allocation39_spill] sm:$0xff] }
 0x4f6   : > { %10521 = vmatprep.mubr.bf16.mxu1 %v14238_v3  ;;  %v14254_v3 = vld [vmem:[#allocation40_spill] sm:$0xff] }
 0x4fd   : > { %10522 = vmatmul.mubr.bf16.gmra.mrb[24].mxu1 %v14240_v30  ;;  %v7633_v30 = vrot.slane %v13452_v35, 2 }
 0x4fe   : > { %10525 = vmatprep.mubr.bf16.mxu1 %v14241_v17  ;;  %v14260_v17 = vld [vmem:[#allocation47_spill] sm:$0xff] }
 0x4ff   : > { %v7632_v26 = vrot.slane %v14260_v17, 2  ;;  %v11568_v17 = vld [vmem:[#allocation3 + $0xa0] ss:$0 sps:$4 sm:$0x33]  }
 0x505   : > { %10526 = vmatmul.mubr.bf16.gmra.mrb[28].mxu1 %v6868_v5  ;;  %v7634_v5 = vsel %vm2697_vm14, %v7632_v26, %v7633_v30 }
 0x506   : > { %10545 = vmatprep.mubr.bf16.mxu1 %v14243_v16  ;;  %v7635_v16 = vrot.slane %v13454_v13, 2  ;;  %v7639_v13 = vrot.slane %v13460_v52, 2  ;;  %v11558_v52 = vld [vmem:[%s14132_s4 + $0x1e0] sm:$0xff]  }
 0x50d   : > { %10546 = vmatmul.mubr.bf16.vlgmr.msra.gmra.mrb[32].mxu1 %v14244_v49  ;;  %v11548_v49 = vld [vmem:[%s14132_s4 + $0x1c8] sm:$0xff]  }
 0x50e   : > { %10582 = vmatpush3.bf16.msra.mxu1 %v11534_v60  ;;  %10549 = vmatprep.mubr.bf16.mxu1 %v14245_v36  ;;  %v11541_v60 = vld [vmem:[%s14132_s4 + $0x1b8] sm:$0xff]   ;;  %v7636_v36 = vsel %vm2697_vm14, %v7633_v30, %v7635_v16 }
 0x50f   : > { %10583 = vmatprep.subr.bf16.mxu1 %v11535_v25 }
 0x512   : > { %10584 = vmatpush3.bf16.msra.mxu1 %v11535_v25  ;;  %v7637_v25 = vrot.slane %v13456_v34, 2  ;;  %v7641_v34 = vrot.slane %v13467_v58, 2  ;;  %v7643_v58 = vrot.slane %v13473_v9, 2  ;;  %v11564_v9 = vld [vmem:[%s14132_s4 + $0x1f0] sm:$0xff]  }
 0x513   : > { %10585 = vmatprep.subr.bf16.mxu1 %v11536_v53 }
 0x514   : > { %v7638_v35 = vsel %vm2697_vm14, %v7635_v16, %v7637_v25  ;;  %v11571_v16 = vld [vmem:[%s14132_s4 + $0x210] sm:$0xff]  }
 0x515   : > { %10550 = vmatmul.mubr.bf16.gmra.mrb[0].mxu1 %v14246_v12  ;;  %v7640_v12 = vsel %vm2697_vm14, %v7637_v25, %v7639_v13  ;;  %v11572_v25 = vld [vmem:[%s14132_s4 + $0x218] sm:$0xff]  }
 0x516   : > { %10553 = vmatprep.mubr.bf16.mxu1 %v14247_v56  ;;  %10586 = vmatpush3.bf16.msra.mxu1 %v11536_v53  ;;  %v11552_v53 = vld [vmem:[%s14132_s4 + $0x1d0] sm:$0xff]   ;;  %v7642_v56 = vsel %vm2697_vm14, %v7639_v13, %v7641_v34  ;;  %v14267_v13 = vld [vmem:[#allocation53_spill] sm:$0xff] }
 0x517   : > { %10587 = vmatprep.subr.bf16.mxu1 %v11537_v44 }
 0x51a   : > { %10588 = vmatpush3.bf16.msra.mxu1 %v11537_v44  ;;  %v11555_v44 = vld [vmem:[%s14132_s4 + $0x1d8] sm:$0xff]  }
 0x51b   : > { %10589 = vmatprep.subr.bf16.mxu1 %v11538_v63 }
 0x51d   : > { %10554 = vmatmul.mubr.bf16.gmra.mrb[4].mxu1 %v14248_v54  ;;  %v7644_v54 = vsel %vm2697_vm14, %v7641_v34, %v7643_v58  ;;  %v14268_v34 = vld [vmem:[#allocation54_spill] sm:$0xff] }
 0x51e   : > { %10557 = vmatprep.mubr.bf16.mxu1 %v14249_v48  ;;  %10590 = vmatpush3.bf16.msra.mxu1 %v11538_v63  ;;  %v7645_v63 = vrot.slane %v13479_v23, 2  ;;  %v7647_v23 = vrot.slane %v13481_v32, 2  ;;  %v11569_v32 = vld [vmem:[%s14132_s4 + $0x200] sm:$0xff]  }
 0x51f   : > { %10591 = vmatprep.subr.bf16.mxu1 %v11539_v18 }
 0x520   : > { %v7646_v48 = vsel %vm2697_vm14, %v7643_v58, %v7645_v63  ;;  %v14271_v58 = vld [vmem:[#allocation57_spill] sm:$0xff] }
 0x522   : > { %10592 = vmatpush3.bf16.msra.mxu1 %v11539_v18  ;;  %v11561_v18 = vld [vmem:[%s14132_s4 + $0x1e8] sm:$0xff]  }
 0x523   : > { %10593 = vmatprep.subr.bf16.mxu1 %v11540_v28 }
 0x525   : > { %10558 = vmatmul.mubr.bf16.gmra.mrb[8].mxu1 %v14250_v19  ;;  %v7648_v19 = vsel %vm2697_vm14, %v7645_v63, %v7647_v23  ;;  %v14272_v63 = vld [vmem:[#allocation58_spill] sm:$0xff] }
 0x526   : > { %10561 = vmatprep.mubr.bf16.mxu1 %v14251_v62  ;;  %10594 = vmatpush3.bf16.msra.mxu1 %v11540_v28  ;;  %v7649_v28 = vrot.slane %v13486_v7, 2  ;;  %v7651_v7 = vrot.slane %v13496_v50, 2  ;;  %v7659_v50 = vrot.slane %v13522_v2, 2  ;;  %v7667_v2 = vrot.slane %v11568_v17, 2 }
 0x527   : > { %10595 = vmatprep.subr.bf16.mxu1 %v11541_v60 }
 0x528   : > { %v7650_v62 = vsel %vm2697_vm14, %v7647_v23, %v7649_v28 }
 0x52a   : > { %10596 = vmatpush3.bf16.msra.mxu1 %v11541_v60  ;;  %v11567_v60 = vld [vmem:[%s14132_s4 + $0x1f8] sm:$0xff]  }
 0x52b   : > { %10633 = vmatprep.subr.bf16.mxu1 %v11544_v61 }
 0x52d   : > { %10562 = vmatmul.mubr.bf16.gmra.mrb[12].mxu1 %v14252_v20  ;;  %v7652_v20 = vsel %vm2697_vm14, %v7649_v28, %v7651_v7 }
 0x52e   : > { %10565 = vmatprep.mubr.bf16.mxu1 %v14253_v24 }
 0x535   : > { %10566 = vmatmul.mubr.bf16.gmra.mrb[16].mxu1 %v14254_v3  ;;  %v7655_v3 = vrot.slane %v13512_v39, 2  ;;  %v7663_v39 = vrot.slane %v13539_v59, 2  ;;  %v14263_v59 = vld [vmem:[#allocation49_spill] sm:$0xff] }
 0x536   : > { %10569 = vmatprep.mubr.bf16.mxu1 %v14255_v43  ;;  %v7657_v43 = vrot.slane %v13518_v40, 2  ;;  %v7665_v40 = vrot.slane %v13549_v45, 2  ;;  %v14264_v45 = vld [vmem:[#allocation50_spill] sm:$0xff] }
 0x538   : > { %v7666_v26 = vsel %vm2697_vm14, %v7663_v39, %v7665_v40 }
 0x53d   : > { %10570 = vmatmul.mubr.bf16.gmra.mrb[20].mxu1 %v14256_v14 }
 0x53e   : > { %10573 = vmatprep.mubr.bf16.mxu1 %v14257_v42  ;;  %v7658_v42 = vsel %vm2697_vm14, %v7655_v3, %v7657_v43 }
 0x545   : > { %10574 = vmatmul.mubr.bf16.gmra.mrb[24].mxu1 %v14258_v33  ;;  %v7660_v33 = vsel %vm2697_vm14, %v7657_v43, %v7659_v50 }
 0x546   : > { %10577 = vmatprep.mubr.bf16.mxu1 %v14259_v8 }
 0x54d   : > { %10578 = vmatmul.mubr.bf16.gmra.mrb[28].mxu1 %v14261_v21  ;;  %v14262_v21 = vld [vmem:[#allocation48_spill] sm:$0xff] }
 0x54e   : > { %10597 = vmatprep.mubr.bf16.mxu1 %v7634_v5  ;;  %v11570_v5 = vld [vmem:[%s14132_s4 + $0x208] sm:$0xff]  }
 0x555   : > { %10598 = vmatmul.mubr.bf16.vlgmr.msra.gmra.mrb[32].mxu1 %v7636_v36  ;;  %v14266_v36 = vld [vmem:[#allocation52_spill] sm:$0xff] }
 0x556   : > { %10634 = vmatpush3.bf16.msra.mxu1 %v11544_v61  ;;  %10601 = vmatprep.mubr.bf16.mxu1 %v7638_v35  ;;  %v7653_v61 = vrot.slane %v13505_v1, 2  ;;  %v7661_v1 = vrot.slane %v13532_v22, 2  ;;  %v7668_v22 = vsel %vm2697_vm14, %v7665_v40, %v7667_v2  ;;  %v11573_v35 = vld [vmem:[%s14132_s4 + $0x220] sm:$0xff]  }
 0x557   : > { %10635 = vmatprep.subr.bf16.mxu1 %v11548_v49 }
 0x558   : > { %v7654_v24 = vsel %vm2697_vm14, %v7651_v7, %v7653_v61  ;;  %v7656_v14 = vsel %vm2697_vm14, %v7653_v61, %v7655_v3  ;;  %v7662_v8 = vsel %vm2697_vm14, %v7659_v50, %v7661_v1  ;;  %v7664_v30 = vsel %vm2697_vm14, %v7661_v1, %v7663_v39 }
 0x55a   : > { %10636 = vmatpush3.bf16.msra.mxu1 %v11548_v49  ;;  %v14265_v49 = vld [vmem:[#allocation51_spill] sm:$0xff] }
 0x55b   : > { %10637 = vmatprep.subr.bf16.mxu1 %v11552_v53 }
 0x55d   : > { %10602 = vmatmul.mubr.bf16.gmra.mrb[0].mxu1 %v7640_v12  ;;  %v11576_v12 = vld [vmem:[%s14132_s4 + $0x238] sm:$0xff]  }
 0x55e   : > { %10605 = vmatprep.mubr.bf16.mxu1 %v7642_v56  ;;  %10638 = vmatpush3.bf16.msra.mxu1 %v11552_v53  ;;  %v11574_v53 = vld [vmem:[%s14132_s4 + $0x228] sm:$0xff]  }
 0x55f   : > { %10639 = vmatprep.subr.bf16.mxu1 %v11555_v44  ;;  %v14269_v56 = vld [vmem:[#allocation55_spill] sm:$0xff] }
 0x562   : > { %10640 = vmatpush3.bf16.msra.mxu1 %v11555_v44  ;;  %v11575_v44 = vld [vmem:[%s14132_s4 + $0x230] sm:$0xff]  }
 0x563   : > { %10641 = vmatprep.subr.bf16.mxu1 %v11558_v52 }
 0x565   : > { %10606 = vmatmul.mubr.bf16.gmra.mrb[4].mxu1 %v7644_v54  ;;  %v8131_v54 = vshrl.u32 %v13622_v11, 16 }
 0x566   : > { %10609 = vmatprep.mubr.bf16.mxu1 %v7646_v48  ;;  %10642 = vmatpush3.bf16.msra.mxu1 %v11558_v52  ;;  %v14270_v52 = vld [vmem:[#allocation56_spill] sm:$0xff]  ;;  %v8134_v48 = vshll.u32 %v13622_v11, 16  ;;  %v14279_v11 = vld [vmem:[#allocation65_spill] sm:$0xff] }
 0x567   : > { %10643 = vmatprep.subr.bf16.mxu1 %v11561_v18 }
 0x568   : > { %v8136_v23 = vrot.slane %v8134_v48, 3 }
 0x56a   : > { %10644 = vmatpush3.bf16.msra.mxu1 %v11561_v18  ;;  %v14273_v18 = vld [vmem:[#allocation59_spill] sm:$0xff] }
 0x56b   : > { %10645 = vmatprep.subr.bf16.mxu1 %v11564_v9 }
 0x56d   : > { %10610 = vmatmul.mubr.bf16.gmra.mrb[8].mxu1 %v7648_v19  ;;  %v14284_v19 = vld [vmem:[#allocation70_spill] sm:$0xff] }
 0x56e   : > { %10613 = vmatprep.mubr.bf16.mxu1 %v7650_v62  ;;  %10646 = vmatpush3.bf16.msra.mxu1 %v11564_v9  ;;  %v8133_v9 = vrot.slane %v8131_v54, 2 }
 0x56f   : > { %10647 = vmatprep.subr.bf16.mxu1 %v11567_v60 }
 0x570   : > { %v8137_v28 = vor.u32 %v8136_v23, %v8133_v9 }
 0x572   : > { %10648 = vmatpush3.bf16.msra.mxu1 %v11567_v60  ;;  %v14283_v60 = vld [vmem:[#allocation69_spill] sm:$0xff] }
 0x573   : > { %10685 = vmatprep.subr.bf16.mxu1 %v11569_v32 }
 0x575   : > { %10614 = vmatmul.mubr.bf16.gmra.mrb[12].mxu1 %v7652_v20 }
 0x576   : > { %10617 = vmatprep.mubr.bf16.mxu1 %v7654_v24 }
 0x57d   : > { %10618 = vmatmul.mubr.bf16.gmra.mrb[16].mxu1 %v7656_v14 }
 0x57e   : > { %10621 = vmatprep.mubr.bf16.mxu1 %v7658_v42 }
 0x585   : > { %10622 = vmatmul.mubr.bf16.gmra.mrb[20].mxu1 %v7660_v33 }
 0x586   : > { %10625 = vmatprep.mubr.bf16.mxu1 %v7662_v8 }
 0x58d   : > { %10626 = vmatmul.mubr.bf16.gmra.mrb[24].mxu1 %v7664_v30 }
 0x58e   : > { %10629 = vmatprep.mubr.bf16.mxu1 %v7666_v26 }
 0x595   : > { %10630 = vmatmul.mubr.bf16.gmra.mrb[28].mxu1 %v7668_v22 }
 0x596   : > { %10649 = vmatprep.mubr.bf16.mxu1 %v14262_v21 }
 0x59d   : > { %10650 = vmatmul.mubr.bf16.vlgmr.msra.gmra.mrb[32].mxu1 %v14263_v59 }
 0x59e   : > { %10686 = vmatpush3.bf16.msra.mxu1 %v11569_v32  ;;  %10653 = vmatprep.mubr.bf16.mxu1 %v14264_v45 }
 0x59f   : > { %10687 = vmatprep.subr.bf16.mxu1 %v11570_v5 }
 0x5a2   : > { %10688 = vmatpush3.bf16.msra.mxu1 %v11570_v5 }
 0x5a3   : > { %10689 = vmatprep.subr.bf16.mxu1 %v11571_v16 }
 0x5a5   : > { %10654 = vmatmul.mubr.bf16.gmra.mrb[0].mxu1 %v14265_v49 }
 0x5a6   : > { %10657 = vmatprep.mubr.bf16.mxu1 %v14266_v36  ;;  %10690 = vmatpush3.bf16.msra.mxu1 %v11571_v16 }
 0x5a7   : > { %10691 = vmatprep.subr.bf16.mxu1 %v11572_v25 }
 0x5aa   : > { %10692 = vmatpush3.bf16.msra.mxu1 %v11572_v25 }
 0x5ab   : > { %10693 = vmatprep.subr.bf16.mxu1 %v11573_v35 }
 0x5ad   : > { %10658 = vmatmul.mubr.bf16.gmra.mrb[4].mxu1 %v14267_v13 }
 0x5ae   : > { %10661 = vmatprep.mubr.bf16.mxu1 %v14268_v34  ;;  %10694 = vmatpush3.bf16.msra.mxu1 %v11573_v35 }
 0x5af   : > { %10695 = vmatprep.subr.bf16.mxu1 %v11574_v53 }
 0x5b2   : > { %10696 = vmatpush3.bf16.msra.mxu1 %v11574_v53 }
 0x5b3   : > { %10697 = vmatprep.subr.bf16.mxu1 %v11575_v44 }
 0x5b5   : > { %10662 = vmatmul.mubr.bf16.gmra.mrb[8].mxu1 %v14269_v56 }
 0x5b6   : > { %10665 = vmatprep.mubr.bf16.mxu1 %v14270_v52  ;;  %10698 = vmatpush3.bf16.msra.mxu1 %v11575_v44 }
 0x5b7   : > { %10699 = vmatprep.subr.bf16.mxu1 %v11576_v12 }
 0x5ba   : > { %10700 = vmatpush3.bf16.msra.mxu1 %v11576_v12 }
 0x5bd   : > { %10666 = vmatmul.mubr.bf16.gmra.mrb[12].mxu1 %v14271_v58 }
 0x5be   : > { %10669 = vmatprep.mubr.bf16.mxu1 %v14272_v63 }
 0x5c5   : > { %10670 = vmatmul.mubr.bf16.gmra.mrb[16].mxu1 %v13563_v41  ;;  %v8138_v41 = vsel %vm3450_vm15, %v13589_v15, %v8137_v28  ;;  %v14278_v15 = vld [vmem:[#allocation64_spill] sm:$0xff] }
 0x5c6   : > { %10673 = vmatprep.mubr.bf16.mxu1 %v14273_v18 }
 0x5cd   : > { %10674 = vmatmul.mubr.bf16.gmra.mrb[20].mxu1 %v13577_v38  ;;  %v14275_v38 = vld [vmem:[#allocation61_spill] sm:$0xff] }
 0x5ce   : > { %10677 = vmatprep.mubr.bf16.mxu1 %v13583_v31  ;;  %v14274_v31 = vld [vmem:[#allocation60_spill] sm:$0xff] }
 0x5d5   : > { %10678 = vmatmul.mubr.bf16.gmra.mrb[24].mxu1 %v13587_v10  ;;  %v14276_v10 = vld [vmem:[#allocation62_spill] sm:$0xff] }
 0x5d6   : > { %10681 = vmatprep.mubr.bf16.mxu1 %v13600_v47  ;;  %v14277_v47 = vld [vmem:[#allocation63_spill] sm:$0xff] }
 0x5dd   : > { %10682 = vmatmul.mubr.bf16.gmra.mrb[28].mxu1 %v8138_v41 }
 0x5de   : > { %10701 = vmatprep.mubr.bf16.mxu1 %v13603_v55  ;;  %v14280_v55 = vld [vmem:[#allocation66_spill] sm:$0xff] }
 0x5e5   : > { %10702 = vmatmul.mubr.bf16.vlgmr.msra.gmra.mrb[32].mxu1 %v13606_v4  ;;  %v14281_v4 = vld [vmem:[#allocation67_spill] sm:$0xff] }
 0x5e6   : > { %10705 = vmatprep.mubr.bf16.mxu1 %v13614_v57  ;;  %v14282_v57 = vld [vmem:[#allocation68_spill] sm:$0xff] }
 0x5ed   : > { %10706 = vmatmul.mubr.bf16.gmra.mrb[0].mxu1 %v14274_v31 }
 0x5ee   : > { %10709 = vmatprep.mubr.bf16.mxu1 %v14275_v38 }
 0x5f5   : > { %10710 = vmatmul.mubr.bf16.gmra.mrb[4].mxu1 %v14276_v10 }
 0x5f6   : > { %10713 = vmatprep.mubr.bf16.mxu1 %v13636_v0  ;;  %v14285_v0 = vld [vmem:[#allocation71_spill] sm:$0xff] }
 0x5fd   : > { %10714 = vmatmul.mubr.bf16.gmra.mrb[8].mxu1 %v14277_v47 }
 0x5fe   : > { %10717 = vmatprep.mubr.bf16.mxu1 %v14278_v15 }
 0x605   : > { %10718 = vmatmul.mubr.bf16.gmra.mrb[12].mxu1 %v14279_v11 }
 0x606   : > { %10721 = vmatprep.mubr.bf16.mxu1 %v13652_v51  ;;  %v13996_v51 = vld [vmem:[%s14133_s5] ss:$0 sm:$0xff] }
 0x60d   : > { %10722 = vmatmul.mubr.bf16.gmra.mrb[16].mxu1 %v13655_v29 }
 0x60e   : > { %10725 = vmatprep.mubr.bf16.mxu1 %v14280_v55 }
 0x615   : > { %10726 = vmatmul.mubr.bf16.gmra.mrb[20].mxu1 %v14281_v4 }
 0x616   : > { %10729 = vmatprep.mubr.bf16.mxu1 %v14282_v57 }
 0x61d   : > { %10730 = vmatmul.mubr.bf16.gmra.mrb[24].mxu1 %v14283_v60 }
 0x61e   : > { %10733 = vmatprep.mubr.bf16.mxu1 %v14284_v19 }
 0x625   : > { %10734 = vmatmul.mubr.bf16.gmra.mrb[28].mxu1 %v14285_v0 }
 0x6b8   : > { %v10703_v62 = vpop.f32.mrb[32].mxu1 }
 0x6b9   : > { %v10753_v29 = vadd.f32 %v10703_v62, %v13708_v6  ;;  %v8576_v32 = vpop.f32.mrb[33].mxu1 }
 0x6ba   : > { %v10754_v7 = vadd.f32 %v8576_v32, %v13711_v46  ;;  %v10704_v61 = vpop.f32.mrb[34].mxu1 }
 0x6bb   : > { %v8764_v20 = vadd.f32 %v10753_v29, %v13996_v51  ;;  %v10755_v24 = vadd.f32 %v10704_v61, %v13713_v37  ;;  %v8579_v3 = vpop.f32.mrb[35].mxu1 }
 0x6bc   : > { %v8762_v43 = vadd.f32 %v10754_v7, %v13996_v51  ;;  %v10756_v14 = vadd.f32 %v8579_v3, %v13715_v27 }
 0x6bd   : > { %v8800_v42 = vmax.f32 %v8764_v20, 0.0  ;;  %v8765_v50 = vadd.f32 %v10755_v24, %v13996_v51 }
 0x6be   : > { %v8798_v1 = vmax.f32 %v8762_v43, 0.0  ;;  %v8763_v33 = vadd.f32 %v10756_v14, %v13996_v51 }
 0x6bf   : > { %8836 = vst [vmem:[%s14006_s16 + $0x10] sm:$0xff] %v8800_v42  ;;  %v8801_v6 = vmax.f32 %v8765_v50, 0.0 }
 0x6c0   : > { %8834 = vst [vmem:[%s14006_s16] sm:$0xff] %v8798_v1  ;;  %v8799_v46 = vmax.f32 %v8763_v33, 0.0  ;;  %v10707_v37 = vpop.f32.mrb[0].mxu1 }
 0x6c1   : > { %8837 = vst [vmem:[%s14006_s16 + $0x18] sm:$0xff] %v8801_v6  ;;  %v8768_v27 = vadd.f32 %v10707_v37, %v13996_v51  ;;  %v8592_v8 = vpop.f32.mrb[1].mxu1 }
 0x6c2   : > { %8835 = vst [vmem:[%s14006_s16 + $0x8] sm:$0xff] %v8799_v46  ;;  %v8766_v39 = vadd.f32 %v13996_v51, %v8592_v8  ;;  %v10708_v40 = vpop.f32.mrb[2].mxu1 }
 0x6c3   : > { %v8804_v30 = vmax.f32 %v8768_v27, 0.0  ;;  %v8769_v17 = vadd.f32 %v10708_v40, %v13996_v51  ;;  %v8595_v26 = vpop.f32.mrb[3].mxu1 }
 0x6c4   : > { %v8802_v2 = vmax.f32 %v8766_v39, 0.0  ;;  %v8767_v22 = vadd.f32 %v13996_v51, %v8595_v26 }
 0x6c5   : > { %8840 = vst [vmem:[%s14006_s16 + $0x30] sm:$0xff] %v8804_v30  ;;  %v8805_v21 = vmax.f32 %v8769_v17, 0.0 }
 0x6c6   : > { %8838 = vst [vmem:[%s14006_s16 + $0x20] sm:$0xff] %v8802_v2  ;;  %v8803_v5 = vmax.f32 %v8767_v22, 0.0 }
 0x6c7   : > { %8841 = vst [vmem:[%s14006_s16 + $0x38] sm:$0xff] %v8805_v21 }
 0x6c8   : > { %8839 = vst [vmem:[%s14006_s16 + $0x28] sm:$0xff] %v8803_v5  ;;  %v10711_v59 = vpop.f32.mrb[4].mxu1 }
 0x6c9   : > { %v8772_v45 = vadd.f32 %v10711_v59, %v13996_v51  ;;  %v8608_v16 = vpop.f32.mrb[5].mxu1 }
 0x6ca   : > { %v8770_v25 = vadd.f32 %v13996_v51, %v8608_v16  ;;  %v10712_v49 = vpop.f32.mrb[6].mxu1 }
 0x6cb   : > { %v8808_v36 = vmax.f32 %v8772_v45, 0.0  ;;  %v8773_v35 = vadd.f32 %v10712_v49, %v13996_v51  ;;  %v8611_v53 = vpop.f32.mrb[7].mxu1 }
 0x6cc   : > { %v8806_v13 = vmax.f32 %v8770_v25, 0.0  ;;  %v8771_v34 = vadd.f32 %v13996_v51, %v8611_v53 }
 0x6cd   : > { %8844 = vst [vmem:[%s14006_s16 + $0x50] sm:$0xff] %v8808_v36  ;;  %v8809_v44 = vmax.f32 %v8773_v35, 0.0 }
 0x6ce   : > { %8842 = vst [vmem:[%s14006_s16 + $0x40] sm:$0xff] %v8806_v13  ;;  %v8807_v12 = vmax.f32 %v8771_v34, 0.0 }
 0x6cf   : > { %8845 = vst [vmem:[%s14006_s16 + $0x58] sm:$0xff] %v8809_v44 }
 0x6d0   : > { %8843 = vst [vmem:[%s14006_s16 + $0x48] sm:$0xff] %v8807_v12  ;;  %v10715_v56 = vpop.f32.mrb[8].mxu1 }
 0x6d1   : > { %v8776_v52 = vadd.f32 %v10715_v56, %v13996_v51  ;;  %v8624_v58 = vpop.f32.mrb[9].mxu1 }
 0x6d2   : > { %v8774_v63 = vadd.f32 %v13996_v51, %v8624_v58  ;;  %v10716_v18 = vpop.f32.mrb[10].mxu1 }
 0x6d3   : > { %v8812_v54 = vmax.f32 %v8776_v52, 0.0  ;;  %v8777_v48 = vadd.f32 %v10716_v18, %v13996_v51  ;;  %v8627_v9 = vpop.f32.mrb[11].mxu1 }
 0x6d4   : > { %v8810_v23 = vmax.f32 %v8774_v63, 0.0  ;;  %v8775_v28 = vadd.f32 %v13996_v51, %v8627_v9 }
 0x6d5   : > { %8848 = vst [vmem:[%s14006_s16 + $0x70] sm:$0xff] %v8812_v54  ;;  %v8813_v41 = vmax.f32 %v8777_v48, 0.0 }
 0x6d6   : > { %8846 = vst [vmem:[%s14006_s16 + $0x60] sm:$0xff] %v8810_v23  ;;  %v8811_v31 = vmax.f32 %v8775_v28, 0.0 }
 0x6d7   : > { %8849 = vst [vmem:[%s14006_s16 + $0x78] sm:$0xff] %v8813_v41 }
 0x6d8   : > { %8847 = vst [vmem:[%s14006_s16 + $0x68] sm:$0xff] %v8811_v31  ;;  %v10719_v38 = vpop.f32.mrb[12].mxu1 }
 0x6d9   : > { %v8780_v10 = vadd.f32 %v10719_v38, %v13996_v51  ;;  %v8640_v47 = vpop.f32.mrb[13].mxu1 }
 0x6da   : > { %v8778_v15 = vadd.f32 %v13996_v51, %v8640_v47  ;;  %v10720_v11 = vpop.f32.mrb[14].mxu1 }
 0x6db   : > { %v8816_v55 = vmax.f32 %v8780_v10, 0.0  ;;  %v8781_v4 = vadd.f32 %v10720_v11, %v13996_v51  ;;  %v8643_v57 = vpop.f32.mrb[15].mxu1 }
 0x6dc   : > { %v8814_v60 = vmax.f32 %v8778_v15, 0.0  ;;  %v8779_v19 = vadd.f32 %v13996_v51, %v8643_v57 }
 0x6dd   : > { %8852 = vst [vmem:[%s14006_s16 + $0x90] sm:$0xff] %v8816_v55  ;;  %v8817_v0 = vmax.f32 %v8781_v4, 0.0 }
 0x6de   : > { %8850 = vst [vmem:[%s14006_s16 + $0x80] sm:$0xff] %v8814_v60  ;;  %v8815_v62 = vmax.f32 %v8779_v19, 0.0 }
 0x6df   : > { %8853 = vst [vmem:[%s14006_s16 + $0x98] sm:$0xff] %v8817_v0 }
 0x6e0   : > { %8851 = vst [vmem:[%s14006_s16 + $0x88] sm:$0xff] %v8815_v62  ;;  %v10723_v29 = vpop.f32.mrb[16].mxu1 }
 0x6e1   : > { %v8784_v32 = vadd.f32 %v10723_v29, %v13996_v51  ;;  %v8656_v7 = vpop.f32.mrb[17].mxu1 }
 0x6e2   : > { %v8782_v61 = vadd.f32 %v13996_v51, %v8656_v7  ;;  %v10724_v20 = vpop.f32.mrb[18].mxu1 }
 0x6e3   : > { %v8820_v24 = vmax.f32 %v8784_v32, 0.0  ;;  %v8785_v3 = vadd.f32 %v10724_v20, %v13996_v51  ;;  %v8659_v43 = vpop.f32.mrb[19].mxu1 }
 0x6e4   : > { %v8818_v14 = vmax.f32 %v8782_v61, 0.0  ;;  %v8783_v42 = vadd.f32 %v13996_v51, %v8659_v43 }
 0x6e5   : > { %8856 = vst [vmem:[%s14006_s16 + $0xb0] sm:$0xff] %v8820_v24  ;;  %v8821_v50 = vmax.f32 %v8785_v3, 0.0 }
 0x6e6   : > { %8854 = vst [vmem:[%s14006_s16 + $0xa0] sm:$0xff] %v8818_v14  ;;  %v8819_v1 = vmax.f32 %v8783_v42, 0.0 }
 0x6e7   : > { %8857 = vst [vmem:[%s14006_s16 + $0xb8] sm:$0xff] %v8821_v50 }
 0x6e8   : > { %8855 = vst [vmem:[%s14006_s16 + $0xa8] sm:$0xff] %v8819_v1  ;;  %v10727_v33 = vpop.f32.mrb[20].mxu1 }
 0x6e9   : > { %v8788_v6 = vadd.f32 %v10727_v33, %v13996_v51  ;;  %v8672_v46 = vpop.f32.mrb[21].mxu1 }
 0x6ea   : > { %v8786_v37 = vadd.f32 %v13996_v51, %v8672_v46  ;;  %v10728_v27 = vpop.f32.mrb[22].mxu1 }
 0x6eb   : > { %v8824_v8 = vmax.f32 %v8788_v6, 0.0  ;;  %v8789_v39 = vadd.f32 %v10728_v27, %v13996_v51  ;;  %v8675_v40 = vpop.f32.mrb[23].mxu1 }
 0x6ec   : > { %v8822_v30 = vmax.f32 %v8786_v37, 0.0  ;;  %v8787_v17 = vadd.f32 %v13996_v51, %v8675_v40 }
 0x6ed   : > { %8860 = vst [vmem:[%s14006_s16 + $0xd0] sm:$0xff] %v8824_v8  ;;  %v8825_v26 = vmax.f32 %v8789_v39, 0.0 }
 0x6ee   : > { %8858 = vst [vmem:[%s14006_s16 + $0xc0] sm:$0xff] %v8822_v30  ;;  %v8823_v2 = vmax.f32 %v8787_v17, 0.0 }
 0x6ef   : > { %8861 = vst [vmem:[%s14006_s16 + $0xd8] sm:$0xff] %v8825_v26 }
 0x6f0   : > { %8859 = vst [vmem:[%s14006_s16 + $0xc8] sm:$0xff] %v8823_v2  ;;  %v10731_v22 = vpop.f32.mrb[24].mxu1 }
 0x6f1   : > { %v8792_v21 = vadd.f32 %v10731_v22, %v13996_v51  ;;  %v8688_v5 = vpop.f32.mrb[25].mxu1 }
 0x6f2   : > { %v8790_v59 = vadd.f32 %v13996_v51, %v8688_v5  ;;  %v10732_v45 = vpop.f32.mrb[26].mxu1 }
 0x6f3   : > { %v8828_v16 = vmax.f32 %v8792_v21, 0.0  ;;  %v8793_v25 = vadd.f32 %v10732_v45, %v13996_v51  ;;  %v8691_v49 = vpop.f32.mrb[27].mxu1 }
 0x6f4   : > { %v8826_v36 = vmax.f32 %v8790_v59, 0.0  ;;  %v8791_v35 = vadd.f32 %v13996_v51, %v8691_v49 }
 0x6f5   : > { %8864 = vst [vmem:[%s14006_s16 + $0xf0] sm:$0xff] %v8828_v16  ;;  %v8829_v53 = vmax.f32 %v8793_v25, 0.0 }
 0x6f6   : > { %8862 = vst [vmem:[%s14006_s16 + $0xe0] sm:$0xff] %v8826_v36  ;;  %v8827_v13 = vmax.f32 %v8791_v35, 0.0 }
 0x6f7   : > { %8865 = vst [vmem:[%s14006_s16 + $0xf8] sm:$0xff] %v8829_v53 }
 0x6f8   : > { %8863 = vst [vmem:[%s14006_s16 + $0xe8] sm:$0xff] %v8827_v13  ;;  %v10735_v34 = vpop.f32.mrb[28].mxu1 }
 0x6f9   : > { %v8796_v44 = vadd.f32 %v10735_v34, %v13996_v51  ;;  %v8704_v12 = vpop.f32.mrb[29].mxu1 }
 0x6fa   : > { %v8794_v56 = vadd.f32 %v13996_v51, %v8704_v12  ;;  %v10736_v52 = vpop.f32.mrb[30].mxu1 }
 0x6fb   : > { %v8832_v58 = vmax.f32 %v8796_v44, 0.0  ;;  %v8797_v63 = vadd.f32 %v10736_v52, %v13996_v51  ;;  %v8707_v18 = vpop.f32.mrb[31].mxu1 }
 0x6fc   : > { %v8830_v54 = vmax.f32 %v8794_v56, 0.0  ;;  %v8795_v48 = vadd.f32 %v13996_v51, %v8707_v18 }
 0x6fd   : > { %8868 = vst [vmem:[%s14006_s16 + $0x110] sm:$0xff] %v8832_v58  ;;  %v8833_v9 = vmax.f32 %v8797_v63, 0.0 }
 0x6fe   : > { %8866 = vst [vmem:[%s14006_s16 + $0x100] sm:$0xff] %v8830_v54  ;;  %v8831_v23 = vmax.f32 %v8795_v48, 0.0 }
 0x6ff   : > { %8869 = vst [vmem:[%s14006_s16 + $0x118] sm:$0xff] %v8833_v9 }
 0x700   : > { %8867 = vst [vmem:[%s14006_s16 + $0x108] sm:$0xff] %v8831_v23 }
 0x701   : > { %11617 = shalt.err (!%p11614_p3)
}
 0x702   : > { %s11618_s11 = scalar_lea.hbm %s14078_s25, 4608  ;;  %s11622_s14 = scalar_lea.hbm %s14134_s6, 9216 }
 0x703   : > { %p11619_p4 = scmp.ne.s32.totalorder %s14078_s25, %s11618_s11  ;;  %p11623_p9 = scmp.lt.u32.totalorder %s14078_s25, %s14134_s6 }
 0x704   : > { %p11624_p10 = scmp.lt.u32.totalorder %s11622_s14, %s11618_s11  ;;  %p11626_p12 = scmp.lt.u32.totalorder %s11618_s11, %s14078_s25 }
 0x705   : > { %p11620_p7 = pnand %p11619_p4, %p11745_p5 }
 0x706   : > { %p11625_p11 = por %p11624_p10, %p11623_p9 }
 0x707   : > { %p11621_p8 = pneg %p11620_p7 }
 0x708   : > { %p11627_p13 = por %p11626_p12, %p11625_p11 }
 0x70a   : > { %p11628_p0 = pnand %p11627_p13, %p11621_p8 }
 0x70c   : > { %11631 = shalt.err (!%p11628_p0)
}
 0x70d   : > { %s11670_s17 = smov 128   ;;  %s11671_s19 = smov 8  }
 0x70e   : > { %11341 = dma.vmem_to_hbm [thread:$0]  (%p11745_p5), %s14081_s18, 4608, %s14078_s25, %s14087_s26, %s11670_s17, %s11670_s17, %s11671_s19  }
 0x70f PF: > { %p11347_p1 = scmp.ge.s32.totalorder %s11666_s24, 2  ;;  %s8899_s20 = sand.u32 1, %s11654_s21  }
 0x710   : > { %s8900_s28 = scalar_lea.sflag [#allocation5], %s8899_s20 }
 0x711   : > { %p11344_p2 = pnand %p11347_p1, %p11749_p6 }
 0x713   : > { %11649 = dma.done.wait (!%p11344_p2), %s8900_s28, 4608  }
 0x714   : > { %11651 = vsyncadd (!%p11344_p2), %s8900_s28, 4294962688  ;;  %p16_p3 = scmp.ge.s32.totalorder %s11732_s27, 4   ;;  %s14286_s21 = smov %s11658_s22 }
 0x715   : > { %s14287_s22 = smov %s11662_s23  ;;  %s14288_s23 = smov %s11743_s30 }
 0x716   : > { %s14289_s24 = smov %s11732_s27  ;;  %18 = sbr.rel (!%p16_p3) target bundleno = 3 (0x3), region = 95 }
 0x71d   :  { %8905 = vsyncpa [#allocation5], 1 }
 0x71e   :  { %8907 = vsyncpa [#allocation5 + $0x1], 1 }

</bundles_post_ra>
